<compile_context>
chip_gen: v5e
topology: v5e:2x2
jax: 0.10.0
libtpu: 0.0.40
codegen_flags: <defaults>
</compile_context>

<pallas_src>
import functools

import jax
import jax.numpy as jnp
from jax.experimental import pallas as pl
from jax.experimental.pallas import tpu as pltpu

HIDDEN_TRUE = 1000        # logical hidden width (PyTorch model)
H = 1024                  # padded hidden width (multiple of 128 lanes)
N_OUT = 2                 # logical output features
N_OUT_PAD = 128           # padded output features
N_MID = 4                 # number of identical 1000->1000 hidden layers
ALPHA = 0.2               # LeakyReLU negative slope


def _leaky(y, alpha):
    return jnp.where(y > 0, y, alpha * y)


def _fused_mlp_kernel(x_ref, w0_ref, b0_ref, wm_ref, bm_ref, w5_ref, b5_ref,
                      o_ref, h_ref, *, alpha):
    """One grid step == one of the four stacked 1000x1000 hidden layers.

    Grid step 0 additionally runs the input layer (z_dim -> H); the last grid
    step additionally runs the output layer (H -> 2).  The activation stays in
    the bf16 VMEM scratch `h_ref` across grid iterations.
    """
    l = pl.program_id(0)

    @pl.when(l == 0)
    def _():
        y = jnp.dot(x_ref[...], w0_ref[...], preferred_element_type=jnp.float32)
        y = y + b0_ref[...]
        h_ref[...] = _leaky(y, alpha).astype(h_ref.dtype)

    # Streamed hidden layer l (weights double-buffered by the BlockSpec grid).
    y = jnp.dot(h_ref[...], wm_ref[0], preferred_element_type=jnp.float32)
    y = y + bm_ref[0]
    h_ref[...] = _leaky(y, alpha).astype(h_ref.dtype)

    @pl.when(l == pl.num_programs(0) - 1)
    def _():
        y = jnp.dot(h_ref[...], w5_ref[...], preferred_element_type=jnp.float32)
        o_ref[...] = (y + b5_ref[...]).astype(o_ref.dtype)


def _round_up(x, m):
    return ((x + m - 1) // m) * m


def init_discriminator_params(key, z_dim: int):
    """Matches `normal_init`: W ~ N(0, 0.02), b = 0.

    Weights are stored (in, out), zero-padded to the lane-aligned shapes and
    cast to bf16 (padded rows/cols are zero, so padded activation columns stay
    exactly zero through every layer).
    """
    z_pad = _round_up(max(z_dim, 128), 128)
    keys = jax.random.split(key, 2 + N_MID)

    def pad_to(w, shape):
        out = jnp.zeros(shape, jnp.float32)
        return out.at[: w.shape[0], : w.shape[1]].set(w)

    # Input layer: z_dim -> 1000 (padded z_pad -> H).
    w0 = 0.02 * jax.random.normal(keys[0], (z_dim, HIDDEN_TRUE), jnp.float32)
    w0 = pad_to(w0, (z_pad, H)).astype(jnp.bfloat16)
    b0 = jnp.zeros((1, H), jnp.float32)

    # Four identical 1000 -> 1000 layers, stacked for grid streaming.
    wm = jnp.stack([
        pad_to(0.02 * jax.random.normal(keys[1 + i], (HIDDEN_TRUE, HIDDEN_TRUE),
                                        jnp.float32), (H, H))
        for i in range(N_MID)
    ]).astype(jnp.bfloat16)
    bm = jnp.zeros((N_MID, 1, H), jnp.float32)

    # Output layer: 1000 -> 2 (padded H -> N_OUT_PAD).
    w5 = 0.02 * jax.random.normal(keys[1 + N_MID], (HIDDEN_TRUE, N_OUT),
                                  jnp.float32)
    w5 = pad_to(w5, (H, N_OUT_PAD)).astype(jnp.bfloat16)
    b5 = jnp.zeros((1, N_OUT_PAD), jnp.float32)

    return (w0, b0, wm, bm, w5, b5)


def discriminator_forward(params, z):
    """Forward pass of Discriminator; output squeezed like PyTorch `.squeeze()`."""
    w0, b0, wm, bm, w5, b5 = params
    B, z_dim = z.shape
    z_pad = w0.shape[0]
    b_pad = _round_up(max(B, 8), 8)

    # Zero-pad batch to full sublanes and features to full lanes; cast to bf16.
    x = jnp.zeros((b_pad, z_pad), jnp.bfloat16)
    x = x.at[:B, :z_dim].set(z.astype(jnp.bfloat16))

    kernel = functools.partial(_fused_mlp_kernel, alpha=ALPHA)
    out = pl.pallas_call(
        kernel,
        out_shape=jax.ShapeDtypeStruct((b_pad, N_OUT_PAD), jnp.float32),
        grid=(N_MID,),
        in_specs=[
            pl.BlockSpec((b_pad, z_pad), lambda l: (0, 0)),      # x (resident)
            pl.BlockSpec((z_pad, H), lambda l: (0, 0)),          # w0 (resident)
            pl.BlockSpec((1, H), lambda l: (0, 0)),              # b0 (resident)
            pl.BlockSpec((1, H, H), lambda l: (l, 0, 0)),        # wm (streamed)
            pl.BlockSpec((1, 1, H), lambda l: (l, 0, 0)),        # bm (streamed)
            pl.BlockSpec((H, N_OUT_PAD), lambda l: (0, 0)),      # w5 (resident)
            pl.BlockSpec((1, N_OUT_PAD), lambda l: (0, 0)),      # b5 (resident)
        ],
        out_specs=pl.BlockSpec((b_pad, N_OUT_PAD), lambda l: (0, 0)),
        scratch_shapes=[pltpu.VMEM((b_pad, H), jnp.bfloat16)],   # activation
        compiler_params=pltpu.CompilerParams(
            dimension_semantics=("arbitrary",),   # layers are sequential
            vmem_limit_bytes=24 << 20,            # ~6 MiB actually used
        ),
    )(x, w0, b0, wm, bm, w5, b5)

    return jnp.squeeze(out[:B, :N_OUT])


def _reference_forward(params, z):
    """Pure-JAX reference doing the identical (padded, bf16-weight) math."""
    w0, b0, wm, bm, w5, b5 = params
    B, z_dim = z.shape
    z_pad = w0.shape[0]
    b_pad = _round_up(max(B, 8), 8)

    h = jnp.zeros((b_pad, z_pad), jnp.bfloat16)
    h = h.at[:B, :z_dim].set(z.astype(jnp.bfloat16))

    y = jnp.dot(h, w0, preferred_element_type=jnp.float32) + b0
    h = _leaky(y, ALPHA).astype(jnp.bfloat16)
    for i in range(N_MID):
        y = jnp.dot(h, wm[i], preferred_element_type=jnp.float32) + bm[i]
        h = _leaky(y, ALPHA).astype(jnp.bfloat16)
    y = jnp.dot(h, w5, preferred_element_type=jnp.float32) + b5
    return jnp.squeeze(y[:B, :N_OUT])


if __name__ == "__main__":
    key = jax.random.PRNGKey(0)
    k_param, k_data = jax.random.split(key)

    z_dim = 32
    batch = 2
    params = init_discriminator_params(k_param, z_dim)
    z = jax.random.normal(k_data, (batch, z_dim), dtype=jnp.float32)

    out = jax.block_until_ready(discriminator_forward(params, z))
    ref = jax.block_until_ready(_reference_forward(params, z))

    assert out.shape == (batch, N_OUT), f"unexpected output shape {out.shape}"
    assert jnp.allclose(out, ref, atol=1e-3, rtol=1e-2), (
        f"mismatch vs reference: {out} vs {ref}")

    print("KERNEL_OK")
</pallas_src>

<mosaic_0001>
module attributes {stable_mosaic.version = 11 : i64} {
  func.func @_fused_mlp_kernel(%arg0: i32, %arg1: memref<8x128xbf16, #tpu.memory_space<vmem>>, %arg2: memref<128x1024xbf16, #tpu.memory_space<vmem>>, %arg3: memref<1x1024xf32, #tpu.memory_space<vmem>>, %arg4: memref<1x1024x1024xbf16, #tpu.memory_space<vmem>>, %arg5: memref<1x1x1024xf32, #tpu.memory_space<vmem>>, %arg6: memref<1024x128xbf16, #tpu.memory_space<vmem>>, %arg7: memref<1x128xf32, #tpu.memory_space<vmem>>, %arg8: memref<8x128xf32, #tpu.memory_space<vmem>>, %arg9: memref<8x1024xbf16, #tpu.memory_space<vmem>>) attributes {dimension_semantics = [#tpu.dimension_semantics<arbitrary>], iteration_bounds = array<i64: 4>, scalar_prefetch = 0 : i64, scratch_operands = 1 : i64, tpu.core_type = #tpu.core_type<tc>, window_params = [{pipeline_mode = #tpu.pipeline_mode<synchronous>, transform_indices = @transform_0, window_bounds = array<i64: 8, 128>}, {pipeline_mode = #tpu.pipeline_mode<synchronous>, transform_indices = @transform_1, window_bounds = array<i64: 128, 1024>}, {pipeline_mode = #tpu.pipeline_mode<synchronous>, transform_indices = @transform_2, window_bounds = array<i64: 1, 1024>}, {transform_indices = @transform_3, window_bounds = array<i64: 1, 1024, 1024>}, {transform_indices = @transform_4, window_bounds = array<i64: 1, 1, 1024>}, {pipeline_mode = #tpu.pipeline_mode<synchronous>, transform_indices = @transform_5, window_bounds = array<i64: 1024, 128>}, {pipeline_mode = #tpu.pipeline_mode<synchronous>, transform_indices = @transform_6, window_bounds = array<i64: 1, 128>}, {pipeline_mode = #tpu.pipeline_mode<synchronous>, transform_indices = @transform_7, window_bounds = array<i64: 8, 128>}]} {
    %c0_i32 = arith.constant 0 : i32
    %0 = arith.cmpi eq, %arg0, %c0_i32 : i32
    %1 = arith.extui %0 : i1 to i32
    %c0_i32_0 = arith.constant 0 : i32
    %2 = arith.cmpi ne, %1, %c0_i32_0 : i32
    scf.if %2 {
      %c0_13 = arith.constant 0 : index
      %c0_14 = arith.constant 0 : index
      %21 = vector.load %arg1[%c0_13, %c0_14] : memref<8x128xbf16, #tpu.memory_space<vmem>>, vector<8x128xbf16>
      %c0_15 = arith.constant 0 : index
      %c0_16 = arith.constant 0 : index
      %22 = vector.load %arg2[%c0_15, %c0_16] : memref<128x1024xbf16, #tpu.memory_space<vmem>>, vector<128x1024xbf16>
      %cst_17 = arith.constant dense<0.000000e+00> : vector<8x1024xf32>
      %23 = tpu.matmul %21, %22, %cst_17 {dimension_numbers = #tpu.dot_dimension_numbers<[1], [0], [0], [1], [0, 0, 1, 1], [], []>} : vector<8x128xbf16>, vector<128x1024xbf16>, vector<8x1024xf32> -> vector<8x1024xf32>
      %c0_18 = arith.constant 0 : index
      %c0_19 = arith.constant 0 : index
      %24 = vector.load %arg3[%c0_18, %c0_19] : memref<1x1024xf32, #tpu.memory_space<vmem>>, vector<1x1024xf32>
      %25 = vector.broadcast %24 : vector<1x1024xf32> to vector<8x1024xf32>
      %26 = arith.addf %23, %25 : vector<8x1024xf32>
      %cst_20 = arith.constant 0.000000e+00 : f32
      %27 = vector.broadcast %cst_20 : f32 to vector<8x1024xf32>
      %28 = arith.cmpf ogt, %26, %27 : vector<8x1024xf32>
      %cst_21 = arith.constant 2.000000e-01 : f32
      %29 = vector.broadcast %cst_21 : f32 to vector<8x1024xf32>
      %30 = arith.mulf %29, %26 : vector<8x1024xf32>
      %31 = arith.select %28, %26, %30 : vector<8x1024xi1>, vector<8x1024xf32>
      %32 = arith.truncf %31 : vector<8x1024xf32> to vector<8x1024xbf16>
      %c0_22 = arith.constant 0 : index
      %c0_23 = arith.constant 0 : index
      %33 = vector.load %arg9[%c0_22, %c0_23] : memref<8x1024xbf16, #tpu.memory_space<vmem>>, vector<8x1024xbf16>
      tpu.vector_store %arg9[%c0_22, %c0_23], %32 {strides = array<i32>} : memref<8x1024xbf16, #tpu.memory_space<vmem>>, vector<8x1024xbf16>,
    } else {
    }
    %c0 = arith.constant 0 : index
    %c0_1 = arith.constant 0 : index
    %3 = vector.load %arg9[%c0, %c0_1] : memref<8x1024xbf16, #tpu.memory_space<vmem>>, vector<8x1024xbf16>
    %c0_2 = arith.constant 0 : index
    %c0_3 = arith.constant 0 : index
    %c0_4 = arith.constant 0 : index
    %4 = vector.load %arg4[%c0_2, %c0_3, %c0_4] : memref<1x1024x1024xbf16, #tpu.memory_space<vmem>>, vector<1x1024x1024xbf16>
    %5 = vector.shape_cast %4 : vector<1x1024x1024xbf16> to vector<1024x1024xbf16>
    %cst = arith.constant dense<0.000000e+00> : vector<8x1024xf32>
    %6 = tpu.matmul %3, %5, %cst {dimension_numbers = #tpu.dot_dimension_numbers<[1], [0], [0], [1], [0, 0, 1, 1], [], []>} : vector<8x1024xbf16>, vector<1024x1024xbf16>, vector<8x1024xf32> -> vector<8x1024xf32>
    %c0_5 = arith.constant 0 : index
    %c0_6 = arith.constant 0 : index
    %c0_7 = arith.constant 0 : index
    %7 = vector.load %arg5[%c0_5, %c0_6, %c0_7] : memref<1x1x1024xf32, #tpu.memory_space<vmem>>, vector<1x1x1024xf32>
    %8 = vector.shape_cast %7 : vector<1x1x1024xf32> to vector<1x1024xf32>
    %9 = vector.broadcast %8 : vector<1x1024xf32> to vector<8x1024xf32>
    %10 = arith.addf %6, %9 : vector<8x1024xf32>
    %cst_8 = arith.constant 0.000000e+00 : f32
    %11 = vector.broadcast %cst_8 : f32 to vector<8x1024xf32>
    %12 = arith.cmpf ogt, %10, %11 : vector<8x1024xf32>
    %cst_9 = arith.constant 2.000000e-01 : f32
    %13 = vector.broadcast %cst_9 : f32 to vector<8x1024xf32>
    %14 = arith.mulf %13, %10 : vector<8x1024xf32>
    %15 = arith.select %12, %10, %14 : vector<8x1024xi1>, vector<8x1024xf32>
    %16 = arith.truncf %15 : vector<8x1024xf32> to vector<8x1024xbf16>
    %c0_10 = arith.constant 0 : index
    %c0_11 = arith.constant 0 : index
    %17 = vector.load %arg9[%c0_10, %c0_11] : memref<8x1024xbf16, #tpu.memory_space<vmem>>, vector<8x1024xbf16>
    tpu.vector_store %arg9[%c0_10, %c0_11], %16 {strides = array<i32>} : memref<8x1024xbf16, #tpu.memory_space<vmem>>, vector<8x1024xbf16>,
    %c3_i32 = arith.constant 3 : i32
    %18 = arith.cmpi eq, %arg0, %c3_i32 : i32
    %19 = arith.extui %18 : i1 to i32
    %c0_i32_12 = arith.constant 0 : i32
    %20 = arith.cmpi ne, %19, %c0_i32_12 : i32
    scf.if %20 {
      %c0_13 = arith.constant 0 : index
      %c0_14 = arith.constant 0 : index
      %21 = vector.load %arg9[%c0_13, %c0_14] : memref<8x1024xbf16, #tpu.memory_space<vmem>>, vector<8x1024xbf16>
      %c0_15 = arith.constant 0 : index
      %c0_16 = arith.constant 0 : index
      %22 = vector.load %arg6[%c0_15, %c0_16] : memref<1024x128xbf16, #tpu.memory_space<vmem>>, vector<1024x128xbf16>
      %cst_17 = arith.constant dense<0.000000e+00> : vector<8x128xf32>
      %23 = tpu.matmul %21, %22, %cst_17 {dimension_numbers = #tpu.dot_dimension_numbers<[1], [0], [0], [1], [0, 0, 1, 1], [], []>} : vector<8x1024xbf16>, vector<1024x128xbf16>, vector<8x128xf32> -> vector<8x128xf32>
      %c0_18 = arith.constant 0 : index
      %c0_19 = arith.constant 0 : index
      %24 = vector.load %arg7[%c0_18, %c0_19] : memref<1x128xf32, #tpu.memory_space<vmem>>, vector<1x128xf32>
      %25 = vector.broadcast %24 : vector<1x128xf32> to vector<8x128xf32>
      %26 = arith.addf %23, %25 : vector<8x128xf32>
      %c0_20 = arith.constant 0 : index
      %c0_21 = arith.constant 0 : index
      %27 = vector.load %arg8[%c0_20, %c0_21] : memref<8x128xf32, #tpu.memory_space<vmem>>, vector<8x128xf32>
      tpu.vector_store %arg8[%c0_20, %c0_21], %26 {strides = array<i32>} : memref<8x128xf32, #tpu.memory_space<vmem>>, vector<8x128xf32>,
    } else {
    }
    return
  }
  func.func @transform_0(%arg0: i32) -> (i32, i32) {
    %c0_i32 = arith.constant 0 : i32
    %c0_i32_0 = arith.constant 0 : i32
    %c0_i32_1 = arith.constant 0 : i32
    return %c0_i32, %c0_i32_0 : i32, i32
  }
  func.func @transform_1(%arg0: i32) -> (i32, i32) {
    %c0_i32 = arith.constant 0 : i32
    %c0_i32_0 = arith.constant 0 : i32
    %c0_i32_1 = arith.constant 0 : i32
    return %c0_i32, %c0_i32_0 : i32, i32
  }
  func.func @transform_2(%arg0: i32) -> (i32, i32) {
    %c0_i32 = arith.constant 0 : i32
    %c0_i32_0 = arith.constant 0 : i32
    %c0_i32_1 = arith.constant 0 : i32
    return %c0_i32, %c0_i32_0 : i32, i32
  }
  func.func @transform_3(%arg0: i32) -> (i32, i32, i32) {
    %c0_i32 = arith.constant 0 : i32
    %c0_i32_0 = arith.constant 0 : i32
    %c0_i32_1 = arith.constant 0 : i32
    return %arg0, %c0_i32, %c0_i32_0 : i32, i32, i32
  }
  func.func @transform_4(%arg0: i32) -> (i32, i32, i32) {
    %c0_i32 = arith.constant 0 : i32
    %c0_i32_0 = arith.constant 0 : i32
    %c0_i32_1 = arith.constant 0 : i32
    return %arg0, %c0_i32, %c0_i32_0 : i32, i32, i32
  }
  func.func @transform_5(%arg0: i32) -> (i32, i32) {
    %c0_i32 = arith.constant 0 : i32
    %c0_i32_0 = arith.constant 0 : i32
    %c0_i32_1 = arith.constant 0 : i32
    return %c0_i32, %c0_i32_0 : i32, i32
  }
  func.func @transform_6(%arg0: i32) -> (i32, i32) {
    %c0_i32 = arith.constant 0 : i32
    %c0_i32_0 = arith.constant 0 : i32
    %c0_i32_1 = arith.constant 0 : i32
    return %c0_i32, %c0_i32_0 : i32, i32
  }
  func.func @transform_7(%arg0: i32) -> (i32, i32) {
    %c0_i32 = arith.constant 0 : i32
    %c0_i32_0 = arith.constant 0 : i32
    %c0_i32_1 = arith.constant 0 : i32
    return %c0_i32, %c0_i32_0 : i32, i32
  }
}

</mosaic_0001>

<bundles_post_ra>
// kernel: tpu_custom_call.1
= control target key start
LH: loop header
LB: loop body
LE: loop exit
PB: predicated region body
PF: predicated region fallthrough
CT: control target
= control target key end

     0   :  { %s10783_s0 = inlined_call_operand.hbm [shape: bf16[8,128], index: 0, kind: input, shape index: {}]   ;;  %s10784_s1 = inlined_call_operand.hbm [shape: bf16[128,1024], index: 1, kind: input, shape index: {}]   ;;  %s10785_s2 = inlined_call_operand.hbm [shape: f32[1,1024], index: 2, kind: input, shape index: {}]   ;;  %s10786_s3 = inlined_call_operand.hbm [shape: bf16[4,1024,1024], index: 3, kind: input, shape index: {}]   ;;  %s10787_s4 = inlined_call_operand.hbm [shape: f32[4,1,1024], index: 4, kind: input, shape index: {}]   ;;  %s10788_s5 = inlined_call_operand.hbm [shape: bf16[1024,128], index: 5, kind: input, shape index: {}]   ;;  %s10789_s6 = inlined_call_operand.hbm [shape: f32[1,128], index: 6, kind: input, shape index: {}]   ;;  %s10790_s7 = inlined_call_operand.hbm [shape: f32[8,128], index: 7, kind: output, shape index: {}]  }
   0x1   :  { %10794 = sst [smem:[#allocation21_spill]] %s10783_s0 }
   0x2   :  { %10795 = sst [smem:[#allocation22_spill]] %s10784_s1 }
   0x3   :  { %10796 = sst [smem:[#allocation23_spill]] %s10786_s3 }
   0x4   :  { %12 = vsyncpa [#allocation4], 0 }
   0x5   :  { %13 = vsyncpa [#allocation7], 0 }
   0x6   :  { %14 = vsyncpa [#allocation10], 0 }
   0x7   :  { %16 = vsyncpa [#allocation10 + $0x1], 0 }
   0x8   :  { %17 = vsyncpa [#allocation13], 0 }
   0x9   :  { %18 = vsyncpa [#allocation5], 0  ;;  %s9392_s24 = smov 0   ;;  %s9394_s25 = smov 0  }
   0xa   :  { %s9396_s26 = smov 0   ;;  %s9398_s27 = smov 0  }
   0xb LB: > { %s10797_s1 = sld [smem:[#allocation22_spill]]  ;;  %s9416_s8 = sadd.s32 4294967295, %s9340_s27   ;;  %s9340_s27 = sphi %s9398_s27, %s10810_s27   ;;  %s9336_s26 = sphi %s9396_s26, %s10809_s26   ;;  %s9332_s25 = sphi %s9394_s25, %s10808_s25   ;;  %s9328_s24 = sphi %s9392_s24, %s10807_s24  }
   0xc   : > { %p5716_p0 = scmp.ge.s32.totalorder %s9340_s27, 1  ;;  %p108_p1 = scmp.eq.s32.totalorder %s9416_s8, 0 }
   0xd   : > { %p207_p2 = scmp.lt.s32.totalorder %s9340_s27, 5  ;;  %p5717_p3 = scmp.ne.s32.totalorder %s9416_s8, 0 }
   0xe   : > { %s9342_s10 = smov [#allocation6]   ;;  %s256_s14 = sshll.u32 %s10788_s5, 4  ;;  %s257_s14 = int_to_ptr.hbm [resolvable:$true] %s256_s14 }
   0xf   : > { %p9422_p4 = pnand %p5716_p0, %p207_p2  ;;  %s232_s11 = sshll.u32 %s9342_s10, 4  ;;  %s233_s11 = int_to_ptr.vmem [resolvable:$true] %s232_s11 }
  0x10   : > { %s9343_s16 = smov [#allocation12]   ;;  %s10791_s18 = smov 512  }
  0x11   : > { %s230_s30 = sshll.u32 %s10797_s1, 4  ;;  %p8971_p5 = pneg %p9422_p4  ;;  %s231_s30 = int_to_ptr.hbm [resolvable:$true] %s230_s30 }
  0x12   : > { %s258_s17 = sshll.u32 %s9343_s16, 4  ;;  %s10793_s19 = smov 32   ;;  %s259_s17 = int_to_ptr.vmem [resolvable:$true] %s258_s17 }
  0x13   : > { %p9433_p6 = pnand %p8971_p5, %p108_p1  ;;  %s9346_s20 = smov 64  }
  0x14   : > { %s9347_s21 = smov 4   ;;  %s9445_s22 = sadd.s32 1, %s9340_s27  }
  0x15   : > { %8977 = dma.hbm_to_vmem [thread:$0]  (!%p9433_p6), %s231_s30, 8192, %s233_s11, [#allocation7], %s10791_s18, %s10791_s18, %s10793_s19  }
  0x16   : > { %8983 = dma.hbm_to_vmem [thread:$0]  (!%p9433_p6), %s257_s14, 8192, %s259_s17, [#allocation13], %s9346_s20, %s9346_s20, %s9347_s21  }
  0x17   : > { %s94_s23 = sadd.s32 1, %s9336_s26  ;;  %s91_s28 = ssub.s32 %s9340_s27, %s9445_s22 }
  0x18   : > { %p101_p7 = scmp.ne.s32.totalorder %s9336_s26, %s9332_s25  ;;  %p92_p8 = scmp.eq.s32.totalorder %s91_s28, 0 }
  0x19   : > { %p102_p9 = scmp.eq.s32.totalorder %s9340_s27, 0  ;;  %p107_p10 = scmp.ne.s32.totalorder %s9332_s25, %s9328_s24 }
  0x1a   : > { %p8999_p11 = scmp.lt.s32.totalorder %s9340_s27, 4  ;;  %s284_s10 = sand.u32 1, %s9340_s27  }
  0x1b   : > { %s9457_s29 = scalar_select %p92_p8, %s9336_s26, %s94_s23  }
  0x1c   : > { %p103_p12 = por %p102_p9, %p101_p7  ;;  %p9461_p13 = por %p108_p1, %p107_p10 }
  0x1d   : > { %s10792_s11 = sand.u32 1, %s9336_s26   ;;  %s8302_s13 = sshll.u32 %s9340_s27, 12 }
  0x1e   : > { %s5723_s12 = sshll.u32 %s10792_s11, 12  ;;  %s10801_s3 = sld [smem:[#allocation23_spill]] }
  0x1f   : > { %s288_s20 = scalar_lea.vmem [#allocation9], %s5723_s12  ;;  %p9475_p0 = pnand %p8999_p11, %p103_p12 }
  0x20   : > { %s296_s24 = sshll.u32 %s288_s20, 4  ;;  %s10803_s0 = sld [smem:[#allocation21_spill]]  ;;  %s297_s24 = int_to_ptr.vmem [resolvable:$true] %s296_s24 }
  0x21   : > { %s9482_s19 = scalar_lea.sflag [#allocation10], %s284_s10  ;;  %p9116_p5 = pneg %p9475_p0 }
  0x24   : > { %s293_s17 = scalar_lea.hbm %s10801_s3, %s8302_s13  ;;  %s9119_s18 = scalar_lea.hbm %s10801_s3, 16384 }
  0x25   : > { %s294_s21 = sshll.u32 %s293_s17, 4  ;;  %s295_s21 = int_to_ptr.hbm [resolvable:$true] %s294_s21 }
  0x26   : > { %s219_s11 = sshll.u32 %s10803_s0, 4  ;;  %s9112_s13 = sshra.s32 %s295_s21, 4  ;;  %s220_s11 = int_to_ptr.hbm [resolvable:$true] %s219_s11  ;;  %s9113_s13 = int_to_ptr.hbm [resolvable:$true] %s9112_s13 }
  0x27   : > { %s9114_s12 = scalar_lea.hbm %s9113_s13, 4096  ;;  %p9120_p9 = scmp.lt.s32.totalorder %s9113_s13, %s10801_s3 }
  0x28   : > { %p9115_p2 = scmp.ne.s32.totalorder %s9113_s13, %s9114_s12  ;;  %p9121_p10 = scmp.lt.s32.totalorder %s9119_s18, %s9114_s12 }
  0x2a   : > { %p9117_p7 = pnand %p9116_p5, %p9115_p2  ;;  %p9122_p11 = por %p9121_p10, %p9120_p9 }
  0x2c   : > { %p9118_p8 = pneg %p9117_p7 }
  0x2e   : > { %p9123_p12 = pnand %p9122_p11, %p9118_p8 }
  0x30   : > { %9126 = shalt.err (!%p9123_p12)
}
  0x31   : > { %s10804_s10 = smov 32   ;;  %s10805_s28 = smov 512  }
  0x32   : > { %8990 = dma.hbm_to_vmem [thread:$0]  (!%p9475_p0), %s295_s21, 65536, %s297_s24, %s9482_s19, %s10805_s28, %s10805_s28, %s10804_s10  }
  0x33   : > { %s9348_s14 = smov [#allocation3]   ;;  %s245_s13 = sshll.u32 %s10785_s2, 4  ;;  %s246_s13 = int_to_ptr.hbm [resolvable:$true] %s245_s13 }
  0x34   : > { %s221_s16 = sshll.u32 %s9348_s14, 4  ;;  %s271_s20 = sshll.u32 %s10789_s6, 4  ;;  %s222_s16 = int_to_ptr.vmem [resolvable:$true] %s221_s16  ;;  %s272_s20 = int_to_ptr.hbm [resolvable:$true] %s271_s20 }
  0x35   : > { %8974 = dma.hbm_to_vmem [thread:$0]  (!%p9433_p6), %s220_s11, 64, %s222_s16, [#allocation4]  }
  0x36   : > { %s9349_s1 = smov [#allocation8]   ;;  %s9350_s24 = smov [#allocation14]  }
  0x37   : > { %s247_s3 = sshll.u32 %s9349_s1, 4  ;;  %s273_s21 = sshll.u32 %s9350_s24, 4  ;;  %s248_s3 = int_to_ptr.vmem [resolvable:$true] %s247_s3  ;;  %s274_s21 = int_to_ptr.vmem [resolvable:$true] %s273_s21 }
  0x38   : > { %8980 = dma.hbm_to_vmem [thread:$0]  (!%p9433_p6), %s246_s13, 128, %s248_s3, [#allocation7]  }
  0x39   : > { %s10806_s0 = sand.u32 1, %s9336_s26   ;;  %s5727_s28 = sshll.u32 %s9340_s27, 3 }
  0x3a   : > { %s5726_s10 = sshll.u32 %s10806_s0, 3  ;;  %s314_s12 = scalar_lea.hbm %s10787_s4, %s5727_s28 }
  0x3b   : > { %8986 = dma.hbm_to_vmem [thread:$0]  (!%p9433_p6), %s272_s20, 16, %s274_s21, [#allocation13]  }
  0x3c   : > { %s310_s11 = scalar_lea.vmem [#allocation11], %s5726_s10  ;;  %s316_s1 = sshll.u32 %s314_s12, 4  ;;  %s317_s1 = int_to_ptr.hbm [resolvable:$true] %s316_s1 }
  0x3d   : > { %s318_s14 = sshll.u32 %s310_s11, 4  ;;  %s9232_s18 = sshra.s32 %s317_s1, 4  ;;  %s319_s14 = int_to_ptr.vmem [resolvable:$true] %s318_s14  ;;  %s9233_s18 = int_to_ptr.hbm [resolvable:$true] %s9232_s18 }
  0x3e   : > { %s9234_s3 = scalar_lea.hbm %s9233_s18, 8  ;;  %s9239_s27 = scalar_lea.hbm %s10787_s4, 32 }
  0x3f   : > { %p9235_p2 = scmp.ne.s32.totalorder %s9233_s18, %s9234_s3  ;;  %p9240_p6 = scmp.lt.s32.totalorder %s9233_s18, %s10787_s4 }
  0x40   : > { %p9241_p9 = scmp.lt.s32.totalorder %s9239_s27, %s9234_s3 }
  0x41   : > { %p9237_p7 = pnand %p9235_p2, %p9116_p5 }
  0x42   : > { %p9242_p10 = por %p9241_p9, %p9240_p6 }
  0x43   : > { %p9238_p8 = pneg %p9237_p7 }
  0x45   : > { %p9243_p11 = pnand %p9242_p10, %p9238_p8 }
  0x47   : > { %9246 = shalt.err (!%p9243_p11)
}
  0x48   : > { %8993 = dma.hbm_to_vmem [thread:$0]  (!%p9475_p0), %s317_s1, 128, %s319_s14, %s9482_s19  }
  0x49   : > { %327 = sbr.rel (%p9422_p4) target bundleno = 1443 (0x5a3), region = 48 }
  0x4e   : > { %9307 = dma.done.wait (%p108_p1), [#allocation4], 64  }
  0x4f   : > { %9309 = vsyncadd (%p108_p1), [#allocation4], 4294967232 }
  0x50   : > { %9311 = dma.done.wait (%p108_p1), [#allocation7], 8320  }
  0x51   : > { %9313 = vsyncadd (%p108_p1), [#allocation7], 4294958976  ;;  %s344_s23 = sand.u32 1, %s9416_s8   ;;  %s346_s19 = sand.u32 1, %s9332_s25  }
  0x52   : > { %s5732_s21 = sshll.u32 %s346_s19, 12  ;;  %s345_s9 = scalar_lea.sflag [#allocation10], %s344_s23 }
  0x53   : > { %s9543_s0 = scalar_lea.vmem [#allocation9], %s5732_s21 }
  0x54   : > { %9315 = dma.done.wait (%p9461_p13), %s345_s9, 65664  }
  0x55   : > { %9317 = vsyncadd (%p9461_p13), %s345_s9, 4294901632  ;;  %s5733_s10 = sshll.u32 %s346_s19, 3 }
  0x56   : > { %s9549_s28 = scalar_lea.vmem [#allocation11], %s5733_s10 }
  0x57   : > { %9319 = dma.done.wait (%p108_p1), [#allocation13], 8208  }
  0x58   : > { %9321 = vsyncadd (%p108_p1), [#allocation13], 4294959088  ;;  %403 = sbr.rel (%p5717_p3) target bundleno = 302 (0x12e), region = 80 }
  0x5d   : > { %v5963_v0 = vld [vmem:[#allocation6 + $0x1c0] sm:$0xf]  ;;  %v8359_v2 = vld [vmem:[#allocation6 + $0x1c4] sm:$0xf]  ;;  %v5971_v5 = vld [vmem:[#allocation6 + $0x1c8] sm:$0xf] }
  0x5e   : > { %v8363_v1 = vld [vmem:[#allocation6 + $0x1dc] sm:$0xf0]  ;;  %v5965_v4 = vld [vmem:[#allocation6 + $0x1e0] sm:$0xf0]  ;;  %v8364_v6 = vld [vmem:[#allocation6 + $0x1e4] sm:$0xf0] }
  0x5f   : > { %v5964_v3 = vor.u32 %v8363_v1, %v5963_v0  ;;  %v5968_v7 = vor.u32 %v8359_v2, %v5965_v4  ;;  %v5972_v8 = vor.u32 %v8364_v6, %v5971_v5  ;;  %v8360_v9 = vld [vmem:[#allocation6 + $0x1cc] sm:$0xf]  ;;  %v5931_v11 = vld [vmem:[#allocation6 + $0x180] sm:$0xf]  ;;  %v8351_v14 = vld [vmem:[#allocation6 + $0x184] sm:$0xf] }
  0x60   : > { %v5973_v10 = vld [vmem:[#allocation6 + $0x1e8] sm:$0xf0]  ;;  %v8355_v13 = vld [vmem:[#allocation6 + $0x19c] sm:$0xf0]  ;;  %v5933_v15 = vld [vmem:[#allocation6 + $0x1a0] sm:$0xf0] }
  0x61   : > { %807 = vmatpush.bf16.msra.mxu0 %v5964_v3  ;;  %v5976_v12 = vor.u32 %v8360_v9, %v5973_v10  ;;  %820 = vmatpush.bf16.msra.mxu1 %v5968_v7  ;;  %v5932_v16 = vor.u32 %v8355_v13, %v5931_v11  ;;  %v5936_v17 = vor.u32 %v8351_v14, %v5933_v15  ;;  %v5939_v18 = vld [vmem:[#allocation6 + $0x188] sm:$0xf]  ;;  %v8352_v20 = vld [vmem:[#allocation6 + $0x18c] sm:$0xf]  ;;  %v5899_v23 = vld [vmem:[#allocation6 + $0x140] sm:$0xf] }
  0x62   : > { %833 = vmatpush.bf16.msra.mxu2 %v5972_v8  ;;  %v8356_v19 = vld [vmem:[#allocation6 + $0x1a4] sm:$0xf0]  ;;  %v5941_v22 = vld [vmem:[#allocation6 + $0x1a8] sm:$0xf0]  ;;  %v8347_v24 = vld [vmem:[#allocation6 + $0x15c] sm:$0xf0] }
  0x63   : > { %846 = vmatpush.bf16.msra.mxu3 %v5976_v12  ;;  %v5940_v21 = vor.u32 %v8356_v19, %v5939_v18  ;;  %v5944_v25 = vor.u32 %v8352_v20, %v5941_v22  ;;  %v8343_v26 = vld [vmem:[#allocation6 + $0x144] sm:$0xf]  ;;  %v5907_v28 = vld [vmem:[#allocation6 + $0x148] sm:$0xf]  ;;  %v5900_v29 = vor.u32 %v8347_v24, %v5899_v23  ;;  %v8344_v31 = vld [vmem:[#allocation6 + $0x14c] sm:$0xf] }
  0x64   : > { %v5901_v27 = vld [vmem:[#allocation6 + $0x160] sm:$0xf0]  ;;  %v8348_v30 = vld [vmem:[#allocation6 + $0x164] sm:$0xf0]  ;;  %v5909_v32 = vld [vmem:[#allocation6 + $0x168] sm:$0xf0] }
  0x65   : > { %808 = vmatpush.bf16.msra.mxu0 %v5932_v16  ;;  %821 = vmatpush.bf16.msra.mxu1 %v5936_v17  ;;  %v5904_v33 = vor.u32 %v8343_v26, %v5901_v27  ;;  %v5908_v34 = vor.u32 %v8348_v30, %v5907_v28  ;;  %v5867_v35 = vld [vmem:[#allocation6 + $0x100] sm:$0xf]  ;;  %v8335_v37 = vld [vmem:[#allocation6 + $0x104] sm:$0xf]  ;;  %v5912_v38 = vor.u32 %v8344_v31, %v5909_v32  ;;  %v5875_v40 = vld [vmem:[#allocation6 + $0x108] sm:$0xf] }
  0x66   : > { %834 = vmatpush.bf16.msra.mxu2 %v5940_v21  ;;  %v8339_v36 = vld [vmem:[#allocation6 + $0x11c] sm:$0xf0]  ;;  %v5869_v39 = vld [vmem:[#allocation6 + $0x120] sm:$0xf0]  ;;  %v8340_v41 = vld [vmem:[#allocation6 + $0x124] sm:$0xf0] }
  0x67   : > { %847 = vmatpush.bf16.msra.mxu3 %v5944_v25  ;;  %v8336_v42 = vld [vmem:[#allocation6 + $0x10c] sm:$0xf]  ;;  %v5868_v44 = vor.u32 %v8339_v36, %v5867_v35  ;;  %v5872_v45 = vor.u32 %v8335_v37, %v5869_v39  ;;  %v5876_v46 = vor.u32 %v8340_v41, %v5875_v40  ;;  %v5835_v47 = vld [vmem:[#allocation6 + $0xc0] sm:$0xf]  ;;  %v8327_v49 = vld [vmem:[#allocation6 + $0xc4] sm:$0xf] }
  0x68   : > { %v5877_v43 = vld [vmem:[#allocation6 + $0x128] sm:$0xf0]  ;;  %v8331_v48 = vld [vmem:[#allocation6 + $0xdc] sm:$0xf0]  ;;  %v5837_v51 = vld [vmem:[#allocation6 + $0xe0] sm:$0xf0] }
  0x69   : > { %809 = vmatpush.bf16.msra.mxu0 %v5900_v29  ;;  %822 = vmatpush.bf16.msra.mxu1 %v5904_v33  ;;  %v5880_v50 = vor.u32 %v8336_v42, %v5877_v43  ;;  %v5843_v52 = vld [vmem:[#allocation6 + $0xc8] sm:$0xf]  ;;  %v8328_v54 = vld [vmem:[#allocation6 + $0xcc] sm:$0xf]  ;;  %v5836_v56 = vor.u32 %v8331_v48, %v5835_v47  ;;  %v5840_v57 = vor.u32 %v8327_v49, %v5837_v51  ;;  %v5803_v59 = vld [vmem:[#allocation6 + $0x80] sm:$0xf] }
  0x6a   : > { %835 = vmatpush.bf16.msra.mxu2 %v5908_v34  ;;  %v8332_v53 = vld [vmem:[#allocation6 + $0xe4] sm:$0xf0]  ;;  %v5845_v55 = vld [vmem:[#allocation6 + $0xe8] sm:$0xf0]  ;;  %v8323_v60 = vld [vmem:[#allocation6 + $0x9c] sm:$0xf0] }
  0x6b   : > { %848 = vmatpush.bf16.msra.mxu3 %v5912_v38  ;;  %v5844_v58 = vor.u32 %v8332_v53, %v5843_v52  ;;  %v8319_v61 = vld [vmem:[#allocation6 + $0x84] sm:$0xf]  ;;  %v5848_v62 = vor.u32 %v8328_v54, %v5845_v55  ;;  %v5811_v0 = vld [vmem:[#allocation6 + $0x88] sm:$0xf]  ;;  %v8320_v2 = vld [vmem:[#allocation6 + $0x8c] sm:$0xf]  ;;  %v5804_v4 = vor.u32 %v8323_v60, %v5803_v59 }
  0x6c   : > { %v5805_v63 = vld [vmem:[#allocation6 + $0xa0] sm:$0xf0]  ;;  %v8324_v1 = vld [vmem:[#allocation6 + $0xa4] sm:$0xf0]  ;;  %v5813_v3 = vld [vmem:[#allocation6 + $0xa8] sm:$0xf0] }
  0x6d   : > { %810 = vmatpush.bf16.msra.mxu0 %v5868_v44  ;;  %823 = vmatpush.bf16.msra.mxu1 %v5872_v45  ;;  %v5808_v5 = vor.u32 %v8319_v61, %v5805_v63  ;;  %v5812_v6 = vor.u32 %v8324_v1, %v5811_v0  ;;  %v5771_v7 = vld [vmem:[#allocation6 + $0x40] sm:$0xf]  ;;  %v8311_v9 = vld [vmem:[#allocation6 + $0x44] sm:$0xf]  ;;  %v5816_v10 = vor.u32 %v8320_v2, %v5813_v3  ;;  %v5779_v12 = vld [vmem:[#allocation6 + $0x48] sm:$0xf] }
  0x6e   : > { %836 = vmatpush.bf16.msra.mxu2 %v5876_v46  ;;  %v8315_v8 = vld [vmem:[#allocation6 + $0x5c] sm:$0xf0]  ;;  %v5773_v11 = vld [vmem:[#allocation6 + $0x60] sm:$0xf0]  ;;  %v8316_v13 = vld [vmem:[#allocation6 + $0x64] sm:$0xf0] }
  0x6f   : > { %849 = vmatpush.bf16.msra.mxu3 %v5880_v50  ;;  %v8312_v14 = vld [vmem:[#allocation6 + $0x4c] sm:$0xf]  ;;  %v5772_v16 = vor.u32 %v8315_v8, %v5771_v7  ;;  %v5739_v17 = vld [vmem:[#allocation6] sm:$0xf]  ;;  %v5776_v19 = vor.u32 %v8311_v9, %v5773_v11  ;;  %v5780_v20 = vor.u32 %v8316_v13, %v5779_v12  ;;  %v8303_v21 = vld [vmem:[#allocation6 + $0x4] sm:$0xf] }
  0x70   : > { %v5781_v15 = vld [vmem:[#allocation6 + $0x68] sm:$0xf0]  ;;  %v8307_v18 = vld [vmem:[#allocation6 + $0x1c] sm:$0xf0]  ;;  %v5741_v22 = vld [vmem:[#allocation6 + $0x20] sm:$0xf0] }
  0x71   : > { %811 = vmatpush.bf16.msra.mxu0 %v5836_v56  ;;  %824 = vmatpush.bf16.msra.mxu1 %v5840_v57  ;;  %v5747_v23 = vld [vmem:[#allocation6 + $0x8] sm:$0xf]  ;;  %v5784_v24 = vor.u32 %v8312_v14, %v5781_v15  ;;  %v8304_v26 = vld [vmem:[#allocation6 + $0xc] sm:$0xf]  ;;  %v5979_v28 = vld [vmem:[#allocation6 + $0x1d0] sm:$0xf]  ;;  %v5740_v31 = vor.u32 %v8307_v18, %v5739_v17  ;;  %v5744_v35 = vor.u32 %v8303_v21, %v5741_v22 }
  0x72   : > { %837 = vmatpush.bf16.msra.mxu2 %v5844_v58  ;;  %v8308_v25 = vld [vmem:[#allocation6 + $0x24] sm:$0xf0]  ;;  %v5749_v27 = vld [vmem:[#allocation6 + $0x28] sm:$0xf0]  ;;  %v8365_v29 = vld [vmem:[#allocation6 + $0x1ec] sm:$0xf0] }
  0x73   : > { %850 = vmatpush.bf16.msra.mxu3 %v5848_v62  ;;  %v8361_v30 = vld [vmem:[#allocation6 + $0x1d4] sm:$0xf]  ;;  %v5987_v33 = vld [vmem:[#allocation6 + $0x1d8] sm:$0xf]  ;;  %v5748_v36 = vor.u32 %v8308_v25, %v5747_v23  ;;  %v8362_v37 = vld [vmem:[#allocation6 + $0x1dc] sm:$0xf]  ;;  %v5752_v39 = vor.u32 %v8304_v26, %v5749_v27  ;;  %v5980_v40 = vor.u32 %v8365_v29, %v5979_v28 }
  0x74   : > { %v5981_v32 = vld [vmem:[#allocation6 + $0x1f0] sm:$0xf0]  ;;  %v8366_v34 = vld [vmem:[#allocation6 + $0x1f4] sm:$0xf0]  ;;  %v5989_v38 = vld [vmem:[#allocation6 + $0x1f8] sm:$0xf0] }
  0x75   : > { %812 = vmatpush.bf16.msra.mxu0 %v5804_v4  ;;  %825 = vmatpush.bf16.msra.mxu1 %v5808_v5  ;;  %v5984_v41 = vor.u32 %v8361_v30, %v5981_v32  ;;  %v5988_v42 = vor.u32 %v8366_v34, %v5987_v33  ;;  %v5947_v43 = vld [vmem:[#allocation6 + $0x190] sm:$0xf]  ;;  %v8353_v45 = vld [vmem:[#allocation6 + $0x194] sm:$0xf]  ;;  %v5992_v46 = vor.u32 %v8362_v37, %v5989_v38  ;;  %v5955_v48 = vld [vmem:[#allocation6 + $0x198] sm:$0xf] }
  0x76   : > { %838 = vmatpush.bf16.msra.mxu2 %v5812_v6  ;;  %v8357_v44 = vld [vmem:[#allocation6 + $0x1ac] sm:$0xf0]  ;;  %v5949_v47 = vld [vmem:[#allocation6 + $0x1b0] sm:$0xf0]  ;;  %v8358_v49 = vld [vmem:[#allocation6 + $0x1b4] sm:$0xf0] }
  0x77   : > { %851 = vmatpush.bf16.msra.mxu3 %v5816_v10  ;;  %v8354_v50 = vld [vmem:[#allocation6 + $0x19c] sm:$0xf]  ;;  %v5948_v53 = vor.u32 %v8357_v44, %v5947_v43  ;;  %v5952_v54 = vor.u32 %v8353_v45, %v5949_v47  ;;  %v5956_v55 = vor.u32 %v8358_v49, %v5955_v48  ;;  %v5915_v56 = vld [vmem:[#allocation6 + $0x150] sm:$0xf]  ;;  %v8345_v58 = vld [vmem:[#allocation6 + $0x154] sm:$0xf] }
  0x78   : > { %v5957_v51 = vld [vmem:[#allocation6 + $0x1b8] sm:$0xf0]  ;;  %v8349_v57 = vld [vmem:[#allocation6 + $0x16c] sm:$0xf0]  ;;  %v5917_v60 = vld [vmem:[#allocation6 + $0x170] sm:$0xf0] }
  0x79   : > { %813 = vmatpush.bf16.msra.mxu0 %v5772_v16  ;;  %826 = vmatpush.bf16.msra.mxu1 %v5776_v19  ;;  %v9557_v52 = vld [vmem:[#allocation3] sm:$0xf]  ;;  %v5960_v59 = vor.u32 %v8354_v50, %v5957_v51  ;;  %v5923_v61 = vld [vmem:[#allocation6 + $0x158] sm:$0xf]  ;;  %v5916_v1 = vor.u32 %v8349_v57, %v5915_v56  ;;  %v5920_v2 = vor.u32 %v8345_v58, %v5917_v60  ;;  %v5883_v4 = vld [vmem:[#allocation6 + $0x110] sm:$0xf] }
  0x7a   : > { %839 = vmatpush.bf16.msra.mxu2 %v5780_v20  ;;  %v8350_v62 = vld [vmem:[#allocation6 + $0x174] sm:$0xf0]  ;;  %v8346_v63 = vld [vmem:[#allocation6 + $0x15c] sm:$0xf]  ;;  %v8341_v5 = vld [vmem:[#allocation6 + $0x12c] sm:$0xf0] }
  0x7b   : > { %852 = vmatpush.bf16.msra.mxu3 %v5784_v24  ;;  %v5925_v0 = vld [vmem:[#allocation6 + $0x178] sm:$0xf0]  ;;  %v5924_v3 = vor.u32 %v8350_v62, %v5923_v61  ;;  %v8337_v6 = vld [vmem:[#allocation6 + $0x114] sm:$0xf]  ;;  %v5891_v9 = vld [vmem:[#allocation6 + $0x118] sm:$0xf]  ;;  %v5884_v13 = vor.u32 %v8341_v5, %v5883_v4 }
  0x7c   : > { %v5928_v7 = vor.u32 %v8346_v63, %v5925_v0  ;;  %v5885_v8 = vld [vmem:[#allocation6 + $0x130] sm:$0xf0]  ;;  %v8342_v10 = vld [vmem:[#allocation6 + $0x134] sm:$0xf0]  ;;  %v8338_v11 = vld [vmem:[#allocation6 + $0x11c] sm:$0xf] }
  0x7d   : > { %814 = vmatpush.bf16.msra.mxu0 %v5740_v31  ;;  %827 = vmatpush.bf16.msra.mxu1 %v5744_v35  ;;  %v5893_v12 = vld [vmem:[#allocation6 + $0x138] sm:$0xf0]  ;;  %v5888_v14 = vor.u32 %v8337_v6, %v5885_v8  ;;  %v5892_v15 = vor.u32 %v8342_v10, %v5891_v9  ;;  %v5851_v16 = vld [vmem:[#allocation6 + $0xd0] sm:$0xf]  ;;  %v8329_v18 = vld [vmem:[#allocation6 + $0xd4] sm:$0xf] }
  0x7e   : > { %840 = vmatpush.bf16.msra.mxu2 %v5748_v36  ;;  %v8333_v17 = vld [vmem:[#allocation6 + $0xec] sm:$0xf0]  ;;  %v5896_v19 = vor.u32 %v8338_v11, %v5893_v12  ;;  %v5853_v20 = vld [vmem:[#allocation6 + $0xf0] sm:$0xf0]  ;;  %v5859_v21 = vld [vmem:[#allocation6 + $0xd8] sm:$0xf] }
  0x7f   : > { %853 = vmatpush.bf16.msra.mxu3 %v5752_v39  ;;  %v8334_v22 = vld [vmem:[#allocation6 + $0xf4] sm:$0xf0]  ;;  %v8330_v23 = vld [vmem:[#allocation6 + $0xdc] sm:$0xf]  ;;  %v5852_v25 = vor.u32 %v8333_v17, %v5851_v16  ;;  %v5856_v26 = vor.u32 %v8329_v18, %v5853_v20  ;;  %v5819_v28 = vld [vmem:[#allocation6 + $0x90] sm:$0xf] }
  0x80   : > { %815 = vmatmul.bf16.vlgmr.msra.gmra.mxu0 %v9557_v52  ;;  %828 = vmatmul.bf16.vlgmr.msra.gmra.mxu1 %v9557_v52  ;;  %v5861_v24 = vld [vmem:[#allocation6 + $0xf8] sm:$0xf0]  ;;  %v5860_v27 = vor.u32 %v8334_v22, %v5859_v21  ;;  %v8325_v29 = vld [vmem:[#allocation6 + $0xac] sm:$0xf0]  ;;  %v8321_v30 = vld [vmem:[#allocation6 + $0x94] sm:$0xf] }
  0x81   : > { %859 = vmatpush.bf16.msrb.mxu0 %v5980_v40  ;;  %872 = vmatpush.bf16.msrb.mxu1 %v5984_v41  ;;  %v5864_v31 = vor.u32 %v8330_v23, %v5861_v24  ;;  %v5821_v32 = vld [vmem:[#allocation6 + $0xb0] sm:$0xf0]  ;;  %v5827_v33 = vld [vmem:[#allocation6 + $0x98] sm:$0xf]  ;;  %v8322_v35 = vld [vmem:[#allocation6 + $0x9c] sm:$0xf]  ;;  %v5820_v37 = vor.u32 %v8325_v29, %v5819_v28 }
  0x82   : > { %885 = vmatpush.bf16.msrb.mxu2 %v5988_v42  ;;  %854 = vmatmul.bf16.vlgmr.msra.gmra.mxu3 %v9557_v52  ;;  %v8326_v34 = vld [vmem:[#allocation6 + $0xb4] sm:$0xf0]  ;;  %v5829_v36 = vld [vmem:[#allocation6 + $0xb8] sm:$0xf0]  ;;  %v5824_v38 = vor.u32 %v8321_v30, %v5821_v32  ;;  %v5787_v40 = vld [vmem:[#allocation6 + $0x50] sm:$0xf] }
  0x83   : > { %898 = vmatpush.bf16.msrb.mxu3 %v5992_v46  ;;  %841 = vmatmul.bf16.vlgmr.msra.gmra.mxu2 %v9557_v52  ;;  %v5828_v39 = vor.u32 %v8326_v34, %v5827_v33  ;;  %v8317_v41 = vld [vmem:[#allocation6 + $0x6c] sm:$0xf0]  ;;  %v8313_v42 = vld [vmem:[#allocation6 + $0x54] sm:$0xf]  ;;  %v5832_v43 = vor.u32 %v8322_v35, %v5829_v36  ;;  %v5795_v45 = vld [vmem:[#allocation6 + $0x58] sm:$0xf] }
  0x84   : > { %v5789_v44 = vld [vmem:[#allocation6 + $0x70] sm:$0xf0]  ;;  %v8318_v46 = vld [vmem:[#allocation6 + $0x74] sm:$0xf0]  ;;  %v8314_v47 = vld [vmem:[#allocation6 + $0x5c] sm:$0xf]  ;;  %v5788_v49 = vor.u32 %v8317_v41, %v5787_v40 }
  0x85   : > { %860 = vmatpush.bf16.msrb.mxu0 %v5948_v53  ;;  %873 = vmatpush.bf16.msrb.mxu1 %v5952_v54  ;;  %v5797_v48 = vld [vmem:[#allocation6 + $0x78] sm:$0xf0]  ;;  %v5792_v50 = vor.u32 %v8313_v42, %v5789_v44  ;;  %v5796_v51 = vor.u32 %v8318_v46, %v5795_v45  ;;  %v5755_v53 = vld [vmem:[#allocation6 + $0x10] sm:$0xf]  ;;  %v5757_v57 = vld [vmem:[#allocation6 + $0x30] sm:$0xf0] }
  0x86   : > { %886 = vmatpush.bf16.msrb.mxu2 %v5956_v55  ;;  %v8309_v54 = vld [vmem:[#allocation6 + $0x2c] sm:$0xf0]  ;;  %v8305_v55 = vld [vmem:[#allocation6 + $0x14] sm:$0xf]  ;;  %v5800_v56 = vor.u32 %v8314_v47, %v5797_v48  ;;  %v5763_v58 = vld [vmem:[#allocation6 + $0x18] sm:$0xf] }
  0x87   : > { %899 = vmatpush.bf16.msrb.mxu3 %v5960_v59  ;;  %v8310_v59 = vld [vmem:[#allocation6 + $0x34] sm:$0xf0]  ;;  %v8306_v60 = vld [vmem:[#allocation6 + $0x1c] sm:$0xf]  ;;  %v5756_v62 = vor.u32 %v8309_v54, %v5755_v53  ;;  %v5760_v63 = vor.u32 %v8305_v55, %v5757_v57 }
  0x88   : > { %v5765_v61 = vld [vmem:[#allocation6 + $0x38] sm:$0xf0]  ;;  %v5764_v0 = vor.u32 %v8310_v59, %v5763_v58 }
  0x89   : > { %861 = vmatpush.bf16.msrb.mxu0 %v5916_v1  ;;  %874 = vmatpush.bf16.msrb.mxu1 %v5920_v2  ;;  %v5768_v1 = vor.u32 %v8306_v60, %v5765_v61  ;;  %v469_v2 = vld [vmem:[#allocation8] sm:$0xff] }
  0x8a   : > { %887 = vmatpush.bf16.msrb.mxu2 %v5924_v3  ;;  %v471_v3 = vperm.slane %v469_v2, 0  ;;  %v472_v4 = vperm.slane %v469_v2, 1  ;;  %v473_v9 = vperm.slane %v469_v2, 2  ;;  %v474_v11 = vperm.slane %v469_v2, 3 }
  0x8b   : > { %900 = vmatpush.bf16.msrb.mxu3 %v5928_v7  ;;  %v475_v28 = vperm.slane %v469_v2, 4  ;;  %v476_v29 = vperm.slane %v469_v2, 5  ;;  %v477_v36 = vperm.slane %v469_v2, 6 }
  0x8d   : > { %862 = vmatpush.bf16.msrb.mxu0 %v5884_v13  ;;  %875 = vmatpush.bf16.msrb.mxu1 %v5888_v14 }
  0x8e   : > { %888 = vmatpush.bf16.msrb.mxu2 %v5892_v15 }
  0x8f   : > { %901 = vmatpush.bf16.msrb.mxu3 %v5896_v19 }
  0x91   : > { %863 = vmatpush.bf16.msrb.mxu0 %v5852_v25  ;;  %876 = vmatpush.bf16.msrb.mxu1 %v5856_v26 }
  0x92   : > { %889 = vmatpush.bf16.msrb.mxu2 %v5860_v27 }
  0x93   : > { %902 = vmatpush.bf16.msrb.mxu3 %v5864_v31 }
  0x95   : > { %864 = vmatpush.bf16.msrb.mxu0 %v5820_v37  ;;  %877 = vmatpush.bf16.msrb.mxu1 %v5824_v38  ;;  %v478_v38 = vperm.slane %v469_v2, 7 }
  0x96   : > { %890 = vmatpush.bf16.msrb.mxu2 %v5828_v39 }
  0x97   : > { %903 = vmatpush.bf16.msrb.mxu3 %v5832_v43 }
  0x99   : > { %865 = vmatpush.bf16.msrb.mxu0 %v5788_v49  ;;  %878 = vmatpush.bf16.msrb.mxu1 %v5792_v50 }
  0x9a   : > { %891 = vmatpush.bf16.msrb.mxu2 %v5796_v51 }
  0x9b   : > { %904 = vmatpush.bf16.msrb.mxu3 %v5800_v56 }
  0x9d   : > { %866 = vmatpush.bf16.msrb.mxu0 %v5756_v62  ;;  %879 = vmatpush.bf16.msrb.mxu1 %v5760_v63 }
  0x9e   : > { %892 = vmatpush.bf16.msrb.mxu2 %v5764_v0 }
  0x9f   : > { %905 = vmatpush.bf16.msrb.mxu3 %v5768_v1 }
  0xa0   : > { %867 = vmatmul.bf16.vlgmr.msrb.gmra.mxu0 %v9557_v52  ;;  %880 = vmatmul.bf16.vlgmr.msrb.gmra.mxu1 %v9557_v52 }
  0xa1   : > { %893 = vmatmul.bf16.vlgmr.msrb.gmra.mxu2 %v9557_v52 }
  0xa2   : > { %906 = vmatmul.bf16.vlgmr.msrb.gmra.mxu3 %v9557_v52 }
  0xfd   : > { %v816_v5 = vpop.f32.mrf.mxu0  ;;  %v829_v7 = vpop.f32.mrf.mxu1 }
  0xfe   : > { %v817_v6 = vadd.f32 %v816_v5, %v471_v3  ;;  %v830_v8 = vadd.f32 %v829_v7, %v472_v4 }
 0x100   : > { %vm911_vm0 = vcmp.gt.f32.partialorder %v817_v6, 0.0  ;;  %v919_v10 = vmul.f32 0.2, %v817_v6  ;;  %vm912_vm1 = vcmp.gt.f32.partialorder %v830_v8, 0.0  ;;  %v920_v12 = vmul.f32 0.2, %v830_v8 }
 0x102   : > { %v927_v13 = vsel %vm911_vm0, %v817_v6, %v919_v10  ;;  %v928_v15 = vsel %vm912_vm1, %v830_v8, %v920_v12 }
 0x103   : > { %v935_v18 = vpack.c.bf16 %v928_v15, %v927_v13 }
 0x105   : > { %v855_v17 = vpop.f32.mrf.mxu3  ;;  %v818_v20 = vpop.f32.mrf.mxu0  ;;  %939 = vst [vmem:[#allocation2 + $0x10] sm:$0xff] %v935_v18 }
 0x106   : > { %v842_v14 = vpop.f32.mrf.mxu2  ;;  %v856_v52 = vadd.f32 %v855_v17, %v474_v11  ;;  %v831_v22 = vpop.f32.mrf.mxu1 }
 0x107   : > { %v843_v16 = vadd.f32 %v842_v14, %v473_v9 }
 0x108   : > { %vm914_vm3 = vcmp.gt.f32.partialorder %v856_v52, 0.0  ;;  %v922_v21 = vmul.f32 0.2, %v856_v52 }
 0x109   : > { %vm913_vm2 = vcmp.gt.f32.partialorder %v843_v16, 0.0  ;;  %v921_v19 = vmul.f32 0.2, %v843_v16 }
 0x10a   : > { %v930_v24 = vsel %vm914_vm3, %v856_v52, %v922_v21 }
 0x10b   : > { %v929_v23 = vsel %vm913_vm2, %v843_v16, %v921_v19 }
 0x10c   : > { %v936_v25 = vpack.c.bf16 %v930_v24, %v929_v23 }
 0x10d   : > { %v857_v27 = vpop.f32.mrf.mxu3 }
 0x10e   : > { %v844_v26 = vpop.f32.mrf.mxu2  ;;  %940 = vst [vmem:[#allocation2] sm:$0xff] %v936_v25 }
 0x11d   : > { %v868_v30 = vpop.f32.mrf.mxu0  ;;  %v881_v32 = vpop.f32.mrf.mxu1 }
 0x11e   : > { %v869_v31 = vadd.f32 %v868_v30, %v475_v28  ;;  %v882_v33 = vadd.f32 %v881_v32, %v476_v29 }
 0x120   : > { %vm915_vm4 = vcmp.gt.f32.partialorder %v869_v31, 0.0  ;;  %v923_v34 = vmul.f32 0.2, %v869_v31  ;;  %vm916_vm5 = vcmp.gt.f32.partialorder %v882_v33, 0.0  ;;  %v924_v35 = vmul.f32 0.2, %v882_v33 }
 0x122   : > { %v931_v37 = vsel %vm915_vm4, %v869_v31, %v923_v34  ;;  %v932_v39 = vsel %vm916_vm5, %v882_v33, %v924_v35 }
 0x123   : > { %v937_v40 = vpack.c.bf16 %v932_v39, %v931_v37 }
 0x124   : > { %v894_v41 = vpop.f32.mrf.mxu2 }
 0x125   : > { %v895_v42 = vadd.f32 %v894_v41, %v477_v36  ;;  %v907_v43 = vpop.f32.mrf.mxu3  ;;  %v870_v44 = vpop.f32.mrf.mxu0  ;;  %941 = vst [vmem:[#allocation2 + $0x18] sm:$0xff] %v937_v40 }
 0x126   : > { %v908_v45 = vadd.f32 %v907_v43, %v478_v38  ;;  %v883_v46 = vpop.f32.mrf.mxu1 }
 0x127   : > { %vm917_vm6 = vcmp.gt.f32.partialorder %v895_v42, 0.0  ;;  %v925_v47 = vmul.f32 0.2, %v895_v42 }
 0x128   : > { %vm918_vm7 = vcmp.gt.f32.partialorder %v908_v45, 0.0  ;;  %v926_v48 = vmul.f32 0.2, %v908_v45 }
 0x129   : > { %v933_v49 = vsel %vm917_vm6, %v895_v42, %v925_v47 }
 0x12a   : > { %v934_v50 = vsel %vm918_vm7, %v908_v45, %v926_v48 }
 0x12b   : > { %v938_v51 = vpack.c.bf16 %v934_v50, %v933_v49 }
 0x12c   : > { %v896_v53 = vpop.f32.mrf.mxu2 }
 0x12d   : > { %942 = vst [vmem:[#allocation2 + $0x8] sm:$0xff] %v938_v51  ;;  %v909_v54 = vpop.f32.mrf.mxu3 }
 0x12e PF: > { %v6219_v55 = vld [vmem:[%s9543_s0 + $0x1c0] sm:$0xf]  ;;  %p8041_p1 = scmp.ne.s32.totalorder %s9416_s8, 3 }
 0x12f   : > { %v8427_v56 = vld [vmem:[%s9543_s0 + $0x1dc] sm:$0xf0] }
 0x130   : > { %v6475_v57 = vld [vmem:[%s9543_s0 + $0x3c0] sm:$0xf]  ;;  %v6220_v58 = vor.u32 %v8427_v56, %v6219_v55 }
 0x131   : > { %v8491_v59 = vld [vmem:[%s9543_s0 + $0x3dc] sm:$0xf0] }
 0x132   : > { %v6731_v60 = vld [vmem:[%s9543_s0 + $0x5c0] sm:$0xf]  ;;  %v6476_v62 = vor.u32 %v8491_v59, %v6475_v57  ;;  %4065 = vmatpush.bf16.msra.mxu0 %v6220_v58 }
 0x133   : > { %v8555_v61 = vld [vmem:[%s9543_s0 + $0x5dc] sm:$0xf0] }
 0x134   : > { %v6732_v63 = vor.u32 %v8555_v61, %v6731_v60  ;;  %v6987_v0 = vld [vmem:[%s9543_s0 + $0x7c0] sm:$0xf]  ;;  %4078 = vmatpush.bf16.msra.mxu1 %v6476_v62 }
 0x135   : > { %v8619_v1 = vld [vmem:[%s9543_s0 + $0x7dc] sm:$0xf0] }
 0x136   : > { %v6187_v2 = vld [vmem:[%s9543_s0 + $0x180] sm:$0xf]  ;;  %v6988_v3 = vor.u32 %v8619_v1, %v6987_v0  ;;  %4091 = vmatpush.bf16.msra.mxu2 %v6732_v63 }
 0x137   : > { %v8419_v4 = vld [vmem:[%s9543_s0 + $0x19c] sm:$0xf0] }
 0x138   : > { %v6443_v5 = vld [vmem:[%s9543_s0 + $0x380] sm:$0xf]  ;;  %v6188_v7 = vor.u32 %v8419_v4, %v6187_v2  ;;  %4104 = vmatpush.bf16.msra.mxu3 %v6988_v3 }
 0x139   : > { %v8483_v6 = vld [vmem:[%s9543_s0 + $0x39c] sm:$0xf0] }
 0x13a   : > { %v6444_v8 = vor.u32 %v8483_v6, %v6443_v5  ;;  %v6699_v9 = vld [vmem:[%s9543_s0 + $0x580] sm:$0xf]  ;;  %4066 = vmatpush.bf16.msra.mxu0 %v6188_v7 }
 0x13b   : > { %v8547_v10 = vld [vmem:[%s9543_s0 + $0x59c] sm:$0xf0] }
 0x13c   : > { %v6955_v11 = vld [vmem:[%s9543_s0 + $0x780] sm:$0xf]  ;;  %v6700_v12 = vor.u32 %v8547_v10, %v6699_v9  ;;  %4079 = vmatpush.bf16.msra.mxu1 %v6444_v8 }
 0x13d   : > { %v8611_v13 = vld [vmem:[%s9543_s0 + $0x79c] sm:$0xf0] }
 0x13e   : > { %v6155_v14 = vld [vmem:[%s9543_s0 + $0x140] sm:$0xf]  ;;  %v6956_v16 = vor.u32 %v8611_v13, %v6955_v11  ;;  %4092 = vmatpush.bf16.msra.mxu2 %v6700_v12 }
 0x13f   : > { %v8411_v15 = vld [vmem:[%s9543_s0 + $0x15c] sm:$0xf0] }
 0x140   : > { %v6411_v17 = vld [vmem:[%s9543_s0 + $0x340] sm:$0xf]  ;;  %v6156_v19 = vor.u32 %v8411_v15, %v6155_v14  ;;  %4105 = vmatpush.bf16.msra.mxu3 %v6956_v16 }
 0x141   : > { %v8475_v18 = vld [vmem:[%s9543_s0 + $0x35c] sm:$0xf0] }
 0x142   : > { %v6667_v52 = vld [vmem:[%s9543_s0 + $0x540] sm:$0xf]  ;;  %v6412_v23 = vor.u32 %v8475_v18, %v6411_v17  ;;  %4067 = vmatpush.bf16.msra.mxu0 %v6156_v19 }
 0x143   : > { %v8539_v20 = vld [vmem:[%s9543_s0 + $0x55c] sm:$0xf0] }
 0x144   : > { %v6923_v21 = vld [vmem:[%s9543_s0 + $0x740] sm:$0xf]  ;;  %v6668_v24 = vor.u32 %v8539_v20, %v6667_v52  ;;  %4080 = vmatpush.bf16.msra.mxu1 %v6412_v23 }
 0x145   : > { %v8603_v22 = vld [vmem:[%s9543_s0 + $0x75c] sm:$0xf0] }
 0x146   : > { %v6123_v25 = vld [vmem:[%s9543_s0 + $0x100] sm:$0xf]  ;;  %v6924_v28 = vor.u32 %v8603_v22, %v6923_v21  ;;  %4093 = vmatpush.bf16.msra.mxu2 %v6668_v24 }
 0x147   : > { %v8403_v26 = vld [vmem:[%s9543_s0 + $0x11c] sm:$0xf0] }
 0x148   : > { %v6379_v27 = vld [vmem:[%s9543_s0 + $0x300] sm:$0xf]  ;;  %v6124_v34 = vor.u32 %v8403_v26, %v6123_v25  ;;  %4106 = vmatpush.bf16.msra.mxu3 %v6924_v28 }
 0x149   : > { %v8467_v29 = vld [vmem:[%s9543_s0 + $0x31c] sm:$0xf0] }
 0x14a   : > { %v6635_v30 = vld [vmem:[%s9543_s0 + $0x500] sm:$0xf]  ;;  %v6380_v35 = vor.u32 %v8467_v29, %v6379_v27  ;;  %4068 = vmatpush.bf16.msra.mxu0 %v6124_v34 }
 0x14b   : > { %v8531_v31 = vld [vmem:[%s9543_s0 + $0x51c] sm:$0xf0] }
 0x14c   : > { %v6891_v32 = vld [vmem:[%s9543_s0 + $0x700] sm:$0xf]  ;;  %v6636_v36 = vor.u32 %v8531_v31, %v6635_v30  ;;  %4081 = vmatpush.bf16.msra.mxu1 %v6380_v35 }
 0x14d   : > { %v8595_v33 = vld [vmem:[%s9543_s0 + $0x71c] sm:$0xf0] }
 0x14e   : > { %v6091_v37 = vld [vmem:[%s9543_s0 + $0xc0] sm:$0xf]  ;;  %v6892_v40 = vor.u32 %v8595_v33, %v6891_v32  ;;  %4094 = vmatpush.bf16.msra.mxu2 %v6636_v36 }
 0x14f   : > { %v8395_v38 = vld [vmem:[%s9543_s0 + $0xdc] sm:$0xf0] }
 0x150   : > { %v6347_v39 = vld [vmem:[%s9543_s0 + $0x2c0] sm:$0xf]  ;;  %v6092_v46 = vor.u32 %v8395_v38, %v6091_v37  ;;  %4107 = vmatpush.bf16.msra.mxu3 %v6892_v40 }
 0x151   : > { %v8459_v41 = vld [vmem:[%s9543_s0 + $0x2dc] sm:$0xf0] }
 0x152   : > { %v6603_v42 = vld [vmem:[%s9543_s0 + $0x4c0] sm:$0xf]  ;;  %v6348_v47 = vor.u32 %v8459_v41, %v6347_v39  ;;  %4069 = vmatpush.bf16.msra.mxu0 %v6092_v46 }
 0x153   : > { %v8523_v43 = vld [vmem:[%s9543_s0 + $0x4dc] sm:$0xf0] }
 0x154   : > { %v6859_v44 = vld [vmem:[%s9543_s0 + $0x6c0] sm:$0xf]  ;;  %v6604_v48 = vor.u32 %v8523_v43, %v6603_v42  ;;  %4082 = vmatpush.bf16.msra.mxu1 %v6348_v47 }
 0x155   : > { %v8587_v45 = vld [vmem:[%s9543_s0 + $0x6dc] sm:$0xf0] }
 0x156   : > { %v6059_v49 = vld [vmem:[%s9543_s0 + $0x80] sm:$0xf]  ;;  %v6860_v53 = vor.u32 %v8587_v45, %v6859_v44  ;;  %4095 = vmatpush.bf16.msra.mxu2 %v6604_v48  ;;  %v944_v48 = vld [vmem:[#allocation2] sm:$0xff] }
 0x157   : > { %v8387_v50 = vld [vmem:[%s9543_s0 + $0x9c] sm:$0xf0] }
 0x158   : > { %v6315_v51 = vld [vmem:[%s9543_s0 + $0x280] sm:$0xf]  ;;  %v6060_v59 = vor.u32 %v8387_v50, %v6059_v49  ;;  %4108 = vmatpush.bf16.msra.mxu3 %v6860_v53 }
 0x159   : > { %v8451_v54 = vld [vmem:[%s9543_s0 + $0x29c] sm:$0xf0] }
 0x15a   : > { %v6571_v55 = vld [vmem:[%s9543_s0 + $0x480] sm:$0xf]  ;;  %v6316_v60 = vor.u32 %v8451_v54, %v6315_v51  ;;  %4070 = vmatpush.bf16.msra.mxu0 %v6060_v59  ;;  %v1483_v54 = vunpack.c.l.b16 %v944_v48 }
 0x15b   : > { %v8515_v56 = vld [vmem:[%s9543_s0 + $0x49c] sm:$0xf0] }
 0x15c   : > { %v6827_v57 = vld [vmem:[%s9543_s0 + $0x680] sm:$0xf]  ;;  %v6572_v61 = vor.u32 %v8515_v56, %v6571_v55  ;;  %4083 = vmatpush.bf16.msra.mxu1 %v6316_v60  ;;  %v1484_v55 = vunpack.c.h.b16 %v944_v48  ;;  %v9655_v59 = vpack.c.b16 %v1483_v54, %v1483_v54  ;;  %v943_v60 = vld [vmem:[#allocation2 + $0x10] sm:$0xff] }
 0x15d   : > { %v8579_v58 = vld [vmem:[%s9543_s0 + $0x69c] sm:$0xf0] }
 0x15e   : > { %v6027_v62 = vld [vmem:[%s9543_s0 + $0x40] sm:$0xf]  ;;  %v6828_v1 = vor.u32 %v8579_v58, %v6827_v57  ;;  %4096 = vmatpush.bf16.msra.mxu2 %v6572_v61  ;;  %v9657_v61 = vpack.c.b16 %v1484_v55, %v1484_v55 }
 0x15f   : > { %v8379_v63 = vld [vmem:[%s9543_s0 + $0x5c] sm:$0xf0] }
 0x160   : > { %v6283_v0 = vld [vmem:[%s9543_s0 + $0x240] sm:$0xf]  ;;  %v6028_v7 = vor.u32 %v8379_v63, %v6027_v62  ;;  %4109 = vmatpush.bf16.msra.mxu3 %v6828_v1 }
 0x161   : > { %v8443_v2 = vld [vmem:[%s9543_s0 + $0x25c] sm:$0xf0] }
 0x162   : > { %v6539_v3 = vld [vmem:[%s9543_s0 + $0x440] sm:$0xf]  ;;  %v6284_v10 = vor.u32 %v8443_v2, %v6283_v0  ;;  %4071 = vmatpush.bf16.msra.mxu0 %v6028_v7 }
 0x163   : > { %v8507_v4 = vld [vmem:[%s9543_s0 + $0x45c] sm:$0xf0] }
 0x164   : > { %v6795_v5 = vld [vmem:[%s9543_s0 + $0x640] sm:$0xf]  ;;  %v6540_v11 = vor.u32 %v8507_v4, %v6539_v3  ;;  %4084 = vmatpush.bf16.msra.mxu1 %v6284_v10  ;;  %v1481_v3 = vunpack.c.l.b16 %v943_v60  ;;  %v1482_v4 = vunpack.c.h.b16 %v943_v60 }
 0x165   : > { %v8571_v6 = vld [vmem:[%s9543_s0 + $0x65c] sm:$0xf0] }
 0x166   : > { %v5995_v8 = vld [vmem:[%s9543_s0] sm:$0xf]  ;;  %v6796_v15 = vor.u32 %v8571_v6, %v6795_v5  ;;  %4097 = vmatpush.bf16.msra.mxu2 %v6540_v11  ;;  %v9668_v11 = vpack.c.b16 %v1481_v3, %v1481_v3  ;;  %v8487_v3 = vld [vmem:[%s9543_s0 + $0x3c4] sm:$0xf] }
 0x167   : > { %v8371_v9 = vld [vmem:[%s9543_s0 + $0x1c] sm:$0xf0] }
 0x168   : > { %v6251_v12 = vld [vmem:[%s9543_s0 + $0x200] sm:$0xf]  ;;  %v5996_v21 = vor.u32 %v8371_v9, %v5995_v8  ;;  %4110 = vmatpush.bf16.msra.mxu3 %v6796_v15 }
 0x169   : > { %v8435_v13 = vld [vmem:[%s9543_s0 + $0x21c] sm:$0xf0] }
 0x16a   : > { %v6507_v14 = vld [vmem:[%s9543_s0 + $0x400] sm:$0xf]  ;;  %v6252_v25 = vor.u32 %v8435_v13, %v6251_v12  ;;  %4072 = vmatpush.bf16.msra.mxu0 %v5996_v21  ;;  %v9671_v12 = vpack.c.b16 %v1482_v4, %v1482_v4 }
 0x16b   : > { %v8499_v16 = vld [vmem:[%s9543_s0 + $0x41c] sm:$0xf0] }
 0x16c   : > { %v6763_v17 = vld [vmem:[%s9543_s0 + $0x600] sm:$0xf]  ;;  %v6508_v26 = vor.u32 %v8499_v16, %v6507_v14  ;;  %4085 = vmatpush.bf16.msra.mxu1 %v6252_v25 }
 0x16d   : > { %v8563_v18 = vld [vmem:[%s9543_s0 + $0x61c] sm:$0xf0]  ;;  %4073 = vmatmul.bf16.vlgmr.msra.gmra.mxu0 %v9668_v11 }
 0x16e   : > { %v7243_v52 = vld [vmem:[%s9543_s0 + $0x9c0] sm:$0xf]  ;;  %v6764_v29 = vor.u32 %v8563_v18, %v6763_v17  ;;  %4098 = vmatpush.bf16.msra.mxu2 %v6508_v26 }
 0x16f   : > { %v8683_v19 = vld [vmem:[%s9543_s0 + $0x9dc] sm:$0xf0]  ;;  %4086 = vmatmul.bf16.vlgmr.msra.gmra.mxu1 %v9671_v12 }
 0x170   : > { %v7499_v20 = vld [vmem:[%s9543_s0 + $0xbc0] sm:$0xf]  ;;  %v7244_v30 = vor.u32 %v8683_v19, %v7243_v52  ;;  %4111 = vmatpush.bf16.msra.mxu3 %v6764_v29 }
 0x171   : > { %v8747_v22 = vld [vmem:[%s9543_s0 + $0xbdc] sm:$0xf0]  ;;  %4099 = vmatmul.bf16.vlgmr.msra.gmra.mxu2 %v9655_v59 }
 0x172   : > { %v7755_v23 = vld [vmem:[%s9543_s0 + $0xdc0] sm:$0xf]  ;;  %v7500_v31 = vor.u32 %v8747_v22, %v7499_v20  ;;  %4117 = vmatpush.bf16.msrb.mxu0 %v7244_v30 }
 0x173   : > { %v8811_v24 = vld [vmem:[%s9543_s0 + $0xddc] sm:$0xf0]  ;;  %4112 = vmatmul.bf16.vlgmr.msra.gmra.mxu3 %v9657_v61 }
 0x174   : > { %v8011_v27 = vld [vmem:[%s9543_s0 + $0xfc0] sm:$0xf]  ;;  %v7756_v32 = vor.u32 %v8811_v24, %v7755_v23  ;;  %4130 = vmatpush.bf16.msrb.mxu1 %v7500_v31 }
 0x175   : > { %v8875_v28 = vld [vmem:[%s9543_s0 + $0xfdc] sm:$0xf0] }
 0x176   : > { %v7211_v33 = vld [vmem:[%s9543_s0 + $0x980] sm:$0xf]  ;;  %v8012_v36 = vor.u32 %v8875_v28, %v8011_v27  ;;  %4143 = vmatpush.bf16.msrb.mxu2 %v7756_v32 }
 0x177   : > { %v8675_v34 = vld [vmem:[%s9543_s0 + $0x99c] sm:$0xf0] }
 0x178   : > { %v7467_v35 = vld [vmem:[%s9543_s0 + $0xb80] sm:$0xf]  ;;  %v7212_v42 = vor.u32 %v8675_v34, %v7211_v33  ;;  %4156 = vmatpush.bf16.msrb.mxu3 %v8012_v36 }
 0x179   : > { %v8739_v37 = vld [vmem:[%s9543_s0 + $0xb9c] sm:$0xf0] }
 0x17a   : > { %v7723_v38 = vld [vmem:[%s9543_s0 + $0xd80] sm:$0xf]  ;;  %v7468_v44 = vor.u32 %v8739_v37, %v7467_v35  ;;  %4118 = vmatpush.bf16.msrb.mxu0 %v7212_v42 }
 0x17b   : > { %v8803_v39 = vld [vmem:[%s9543_s0 + $0xd9c] sm:$0xf0] }
 0x17c   : > { %v7979_v40 = vld [vmem:[%s9543_s0 + $0xf80] sm:$0xf]  ;;  %v7724_v45 = vor.u32 %v8803_v39, %v7723_v38  ;;  %4131 = vmatpush.bf16.msrb.mxu1 %v7468_v44 }
 0x17d   : > { %v8867_v41 = vld [vmem:[%s9543_s0 + $0xf9c] sm:$0xf0] }
 0x17e   : > { %v7179_v43 = vld [vmem:[%s9543_s0 + $0x940] sm:$0xf]  ;;  %v7980_v49 = vor.u32 %v8867_v41, %v7979_v40  ;;  %4144 = vmatpush.bf16.msrb.mxu2 %v7724_v45 }
 0x17f   : > { %v8667_v46 = vld [vmem:[%s9543_s0 + $0x95c] sm:$0xf0] }
 0x180   : > { %v7435_v47 = vld [vmem:[%s9543_s0 + $0xb40] sm:$0xf]  ;;  %v7180_v58 = vor.u32 %v8667_v46, %v7179_v43  ;;  %4157 = vmatpush.bf16.msrb.mxu3 %v7980_v49 }
 0x181   : > { %v8731_v50 = vld [vmem:[%s9543_s0 + $0xb5c] sm:$0xf0] }
 0x182   : > { %v7691_v51 = vld [vmem:[%s9543_s0 + $0xd40] sm:$0xf]  ;;  %v7436_v62 = vor.u32 %v8731_v50, %v7435_v47  ;;  %4119 = vmatpush.bf16.msrb.mxu0 %v7180_v58 }
 0x183   : > { %v8795_v53 = vld [vmem:[%s9543_s0 + $0xd5c] sm:$0xf0] }
 0x184   : > { %v7947_v56 = vld [vmem:[%s9543_s0 + $0xf40] sm:$0xf]  ;;  %v7692_v63 = vor.u32 %v8795_v53, %v7691_v51  ;;  %4132 = vmatpush.bf16.msrb.mxu1 %v7436_v62 }
 0x185   : > { %v8859_v57 = vld [vmem:[%s9543_s0 + $0xf5c] sm:$0xf0] }
 0x186   : > { %v7147_v0 = vld [vmem:[%s9543_s0 + $0x900] sm:$0xf]  ;;  %v7948_v5 = vor.u32 %v8859_v57, %v7947_v56  ;;  %4145 = vmatpush.bf16.msrb.mxu2 %v7692_v63 }
 0x187   : > { %v8659_v1 = vld [vmem:[%s9543_s0 + $0x91c] sm:$0xf0] }
 0x188   : > { %v7403_v2 = vld [vmem:[%s9543_s0 + $0xb00] sm:$0xf]  ;;  %v7148_v13 = vor.u32 %v8659_v1, %v7147_v0  ;;  %4158 = vmatpush.bf16.msrb.mxu3 %v7948_v5  ;;  %v945_v0 = vld [vmem:[#allocation2 + $0x18] sm:$0xff]  ;;  %v8423_v1 = vld [vmem:[%s9543_s0 + $0x1c4] sm:$0xf] }
 0x189   : > { %v8723_v6 = vld [vmem:[%s9543_s0 + $0xb1c] sm:$0xf0]  ;;  %v6477_v5 = vld [vmem:[%s9543_s0 + $0x3e0] sm:$0xf0] }
 0x18a   : > { %v7659_v7 = vld [vmem:[%s9543_s0 + $0xd00] sm:$0xf]  ;;  %v7404_v14 = vor.u32 %v8723_v6, %v7403_v2  ;;  %4120 = vmatpush.bf16.msrb.mxu0 %v7148_v13  ;;  %v6221_v2 = vld [vmem:[%s9543_s0 + $0x1e0] sm:$0xf0] }
 0x18b   : > { %v8787_v8 = vld [vmem:[%s9543_s0 + $0xd1c] sm:$0xf0]  ;;  %v8551_v6 = vld [vmem:[%s9543_s0 + $0x5c4] sm:$0xf] }
 0x18c   : > { %v7915_v9 = vld [vmem:[%s9543_s0 + $0xf00] sm:$0xf]  ;;  %v7660_v15 = vor.u32 %v8787_v8, %v7659_v7  ;;  %4133 = vmatpush.bf16.msrb.mxu1 %v7404_v14  ;;  %v6733_v7 = vld [vmem:[%s9543_s0 + $0x5e0] sm:$0xf0] }
 0x18d   : > { %v8851_v10 = vld [vmem:[%s9543_s0 + $0xf1c] sm:$0xf0]  ;;  %v8615_v13 = vld [vmem:[%s9543_s0 + $0x7c4] sm:$0xf] }
 0x18e   : > { %v7115_v16 = vld [vmem:[%s9543_s0 + $0x8c0] sm:$0xf]  ;;  %v7916_v52 = vor.u32 %v8851_v10, %v7915_v9  ;;  %4146 = vmatpush.bf16.msrb.mxu2 %v7660_v15  ;;  %v6989_v14 = vld [vmem:[%s9543_s0 + $0x7e0] sm:$0xf0]  ;;  %v1485_v15 = vunpack.c.l.b16 %v945_v0 }
 0x18f   : > { %v8651_v17 = vld [vmem:[%s9543_s0 + $0x8dc] sm:$0xf0] }
 0x190   : > { %v7371_v18 = vld [vmem:[%s9543_s0 + $0xac0] sm:$0xf]  ;;  %v7116_v24 = vor.u32 %v8651_v17, %v7115_v16  ;;  %4159 = vmatpush.bf16.msrb.mxu3 %v7916_v52  ;;  %v1486_v52 = vunpack.c.h.b16 %v945_v0  ;;  %v8391_v0 = vld [vmem:[%s9543_s0 + $0xc4] sm:$0xf] }
 0x191   : > { %v8715_v19 = vld [vmem:[%s9543_s0 + $0xadc] sm:$0xf0] }
 0x192   : > { %v7627_v20 = vld [vmem:[%s9543_s0 + $0xcc0] sm:$0xf]  ;;  %v7372_v25 = vor.u32 %v8715_v19, %v7371_v18  ;;  %4121 = vmatpush.bf16.msrb.mxu0 %v7116_v24  ;;  %v6224_v18 = vor.u32 %v8423_v1, %v6221_v2  ;;  %v6480_v19 = vor.u32 %v8487_v3, %v6477_v5  ;;  %v6992_v24 = vor.u32 %v8615_v13, %v6989_v14  ;;  %v6093_v1 = vld [vmem:[%s9543_s0 + $0xe0] sm:$0xf0] }
 0x193   : > { %v8779_v21 = vld [vmem:[%s9543_s0 + $0xcdc] sm:$0xf0]  ;;  %v8455_v2 = vld [vmem:[%s9543_s0 + $0x2c4] sm:$0xf] }
 0x194   : > { %v7883_v22 = vld [vmem:[%s9543_s0 + $0xec0] sm:$0xf]  ;;  %v7628_v26 = vor.u32 %v8779_v21, %v7627_v20  ;;  %4134 = vmatpush.bf16.msrb.mxu1 %v7372_v25  ;;  %v6736_v20 = vor.u32 %v8551_v6, %v6733_v7  ;;  %v8415_v21 = vld [vmem:[%s9543_s0 + $0x184] sm:$0xf] }
 0x195   : > { %v8843_v23 = vld [vmem:[%s9543_s0 + $0xedc] sm:$0xf0]  ;;  %v6445_v25 = vld [vmem:[%s9543_s0 + $0x3a0] sm:$0xf0] }
 0x196   : > { %v7083_v27 = vld [vmem:[%s9543_s0 + $0x880] sm:$0xf]  ;;  %v7884_v30 = vor.u32 %v8843_v23, %v7883_v22  ;;  %4147 = vmatpush.bf16.msrb.mxu2 %v7628_v26  ;;  %v6189_v22 = vld [vmem:[%s9543_s0 + $0x1a0] sm:$0xf0] }
 0x197   : > { %v8643_v28 = vld [vmem:[%s9543_s0 + $0x89c] sm:$0xf0]  ;;  %v8479_v23 = vld [vmem:[%s9543_s0 + $0x384] sm:$0xf] }
 0x198   : > { %v7339_v29 = vld [vmem:[%s9543_s0 + $0xa80] sm:$0xf]  ;;  %v7084_v36 = vor.u32 %v8643_v28, %v7083_v27  ;;  %4160 = vmatpush.bf16.msrb.mxu3 %v7884_v30  ;;  %v8543_v26 = vld [vmem:[%s9543_s0 + $0x584] sm:$0xf] }
 0x199   : > { %v8707_v31 = vld [vmem:[%s9543_s0 + $0xa9c] sm:$0xf0]  ;;  %v6701_v27 = vld [vmem:[%s9543_s0 + $0x5a0] sm:$0xf0] }
 0x19a   : > { %v7595_v32 = vld [vmem:[%s9543_s0 + $0xc80] sm:$0xf]  ;;  %v7340_v37 = vor.u32 %v8707_v31, %v7339_v29  ;;  %4122 = vmatpush.bf16.msrb.mxu0 %v7084_v36  ;;  %v8607_v29 = vld [vmem:[%s9543_s0 + $0x784] sm:$0xf]  ;;  %v9725_v31 = vpack.c.b16 %v1485_v15, %v1485_v15  ;;  %v6704_v36 = vor.u32 %v8543_v26, %v6701_v27 }
 0x19b   : > { %v8771_v33 = vld [vmem:[%s9543_s0 + $0xc9c] sm:$0xf0]  ;;  %v6957_v30 = vld [vmem:[%s9543_s0 + $0x7a0] sm:$0xf0] }
 0x19c   : > { %v7851_v34 = vld [vmem:[%s9543_s0 + $0xe80] sm:$0xf]  ;;  %v7596_v38 = vor.u32 %v8771_v33, %v7595_v32  ;;  %4135 = vmatpush.bf16.msrb.mxu1 %v7340_v37  ;;  %v6192_v33 = vor.u32 %v8415_v21, %v6189_v22  ;;  %v8407_v37 = vld [vmem:[%s9543_s0 + $0x144] sm:$0xf] }
 0x19d   : > { %v8835_v35 = vld [vmem:[%s9543_s0 + $0xe9c] sm:$0xf0]  ;;  %v8519_v5 = vld [vmem:[%s9543_s0 + $0x4c4] sm:$0xf] }
 0x19e   : > { %v7051_v39 = vld [vmem:[%s9543_s0 + $0x840] sm:$0xf]  ;;  %v7852_v42 = vor.u32 %v8835_v35, %v7851_v34  ;;  %4148 = vmatpush.bf16.msrb.mxu2 %v7596_v38  ;;  %v9729_v34 = vpack.c.b16 %v1486_v52, %v1486_v52  ;;  %v6448_v35 = vor.u32 %v8479_v23, %v6445_v25  ;;  %v6157_v38 = vld [vmem:[%s9543_s0 + $0x160] sm:$0xf0] }
 0x19f   : > { %v8635_v40 = vld [vmem:[%s9543_s0 + $0x85c] sm:$0xf0]  ;;  %v6605_v6 = vld [vmem:[%s9543_s0 + $0x4e0] sm:$0xf0] }
 0x1a0   : > { %v7307_v41 = vld [vmem:[%s9543_s0 + $0xa40] sm:$0xf]  ;;  %v7052_v49 = vor.u32 %v8635_v40, %v7051_v39  ;;  %4161 = vmatpush.bf16.msrb.mxu3 %v7852_v42  ;;  %v8471_v39 = vld [vmem:[%s9543_s0 + $0x344] sm:$0xf]  ;;  %v6960_v40 = vor.u32 %v8607_v29, %v6957_v30  ;;  %v6608_v13 = vor.u32 %v8519_v5, %v6605_v6 }
 0x1a1   : > { %v8699_v43 = vld [vmem:[%s9543_s0 + $0xa5c] sm:$0xf0]  ;;  %v8535_v42 = vld [vmem:[%s9543_s0 + $0x544] sm:$0xf] }
 0x1a2   : > { %v7563_v44 = vld [vmem:[%s9543_s0 + $0xc40] sm:$0xf]  ;;  %v7308_v54 = vor.u32 %v8699_v43, %v7307_v41  ;;  %4123 = vmatpush.bf16.msrb.mxu0 %v7052_v49  ;;  %v6413_v41 = vld [vmem:[%s9543_s0 + $0x360] sm:$0xf0] }
 0x1a3   : > { %v8763_v45 = vld [vmem:[%s9543_s0 + $0xc5c] sm:$0xf0]  ;;  %v6669_v43 = vld [vmem:[%s9543_s0 + $0x560] sm:$0xf0] }
 0x1a4   : > { %v7819_v46 = vld [vmem:[%s9543_s0 + $0xe40] sm:$0xf]  ;;  %v7564_v55 = vor.u32 %v8763_v45, %v7563_v44  ;;  %4136 = vmatpush.bf16.msrb.mxu1 %v7308_v54  ;;  %v8599_v44 = vld [vmem:[%s9543_s0 + $0x744] sm:$0xf] }
 0x1a5   : > { %v8827_v47 = vld [vmem:[%s9543_s0 + $0xe5c] sm:$0xf0]  ;;  %v6925_v45 = vld [vmem:[%s9543_s0 + $0x760] sm:$0xf0] }
 0x1a6   : > { %v7019_v48 = vld [vmem:[%s9543_s0 + $0x800] sm:$0xf]  ;;  %v7820_v60 = vor.u32 %v8827_v47, %v7819_v46  ;;  %4149 = vmatpush.bf16.msrb.mxu2 %v7564_v55  ;;  %v6160_v46 = vor.u32 %v8407_v37, %v6157_v38  ;;  %v6416_v47 = vor.u32 %v8471_v39, %v6413_v41  ;;  %v8399_v49 = vld [vmem:[%s9543_s0 + $0x104] sm:$0xf] }
 0x1a7   : > { %v8627_v50 = vld [vmem:[%s9543_s0 + $0x81c] sm:$0xf0]  ;;  %v6381_v54 = vld [vmem:[%s9543_s0 + $0x320] sm:$0xf0] }
 0x1a8   : > { %v7275_v51 = vld [vmem:[%s9543_s0 + $0xa00] sm:$0xf]  ;;  %v7020_v4 = vor.u32 %v8627_v50, %v7019_v48  ;;  %4162 = vmatpush.bf16.msrb.mxu3 %v7820_v60  ;;  %v6672_v48 = vor.u32 %v8535_v42, %v6669_v43  ;;  %v6125_v50 = vld [vmem:[%s9543_s0 + $0x120] sm:$0xf0] }
 0x1a9   : > { %v8691_v53 = vld [vmem:[%s9543_s0 + $0xa1c] sm:$0xf0]  ;;  %v8527_v55 = vld [vmem:[%s9543_s0 + $0x504] sm:$0xf]  ;;  %v6128_v60 = vor.u32 %v8399_v49, %v6125_v50 }
 0x1aa   : > { %v7531_v56 = vld [vmem:[%s9543_s0 + $0xc00] sm:$0xf]  ;;  %v7276_v9 = vor.u32 %v8691_v53, %v7275_v51  ;;  %4124 = vmatpush.bf16.msrb.mxu0 %v7020_v4  ;;  %v8463_v51 = vld [vmem:[%s9543_s0 + $0x304] sm:$0xf]  ;;  %v6928_v53 = vor.u32 %v8599_v44, %v6925_v45 }
 0x1ab   : > { %v8755_v57 = vld [vmem:[%s9543_s0 + $0xc1c] sm:$0xf0]  ;;  %v6349_v4 = vld [vmem:[%s9543_s0 + $0x2e0] sm:$0xf0] }
 0x1ac   : > { %v946_v58 = vld [vmem:[#allocation2 + $0x8] sm:$0xff]  ;;  %v7532_v10 = vor.u32 %v8755_v57, %v7531_v56  ;;  %4137 = vmatpush.bf16.msrb.mxu1 %v7276_v9  ;;  %v6637_v56 = vld [vmem:[%s9543_s0 + $0x520] sm:$0xf0]  ;;  %v6096_v9 = vor.u32 %v8391_v0, %v6093_v1 }
 0x1ad   : > { %v7787_v62 = vld [vmem:[%s9543_s0 + $0xe00] sm:$0xf]  ;;  %v1487_v8 = vunpack.c.l.b16 %v946_v58  ;;  %v1488_v16 = vunpack.c.h.b16 %v946_v58  ;;  %4125 = vmatmul.bf16.vlgmr.msrb.gmra.mxu0 %v9725_v31  ;;  %v8591_v57 = vld [vmem:[%s9543_s0 + $0x704] sm:$0xf] }
 0x1ae   : > { %v8819_v63 = vld [vmem:[%s9543_s0 + $0xe1c] sm:$0xf0]  ;;  %4150 = vmatpush.bf16.msrb.mxu2 %v7532_v10  ;;  %4169 = vmatpush.bf16.msra.mxu0 %v6224_v18  ;;  %v6893_v58 = vld [vmem:[%s9543_s0 + $0x720] sm:$0xf0]  ;;  %v6352_v10 = vor.u32 %v8455_v2, %v6349_v4 }
 0x1af   : > { %v7788_v17 = vor.u32 %v8819_v63, %v7787_v62  ;;  %v9721_v28 = vpack.c.b16 %v1487_v8, %v1487_v8  ;;  %v9727_v32 = vpack.c.b16 %v1488_v16, %v1488_v16  ;;  %4138 = vmatmul.bf16.vlgmr.msrb.gmra.mxu1 %v9729_v34  ;;  %v6384_v62 = vor.u32 %v8463_v51, %v6381_v54  ;;  %v8583_v7 = vld [vmem:[%s9543_s0 + $0x6c4] sm:$0xf] }
 0x1b0   : > { %4182 = vmatpush.bf16.msra.mxu1 %v6480_v19  ;;  %v6640_v63 = vor.u32 %v8527_v55, %v6637_v56  ;;  %v6896_v3 = vor.u32 %v8591_v57, %v6893_v58  ;;  %v6861_v8 = vld [vmem:[%s9543_s0 + $0x6e0] sm:$0xf0] }
 0x1b1   : > { %4163 = vmatpush.bf16.msrb.mxu3 %v7788_v17  ;;  %4151 = vmatmul.bf16.vlgmr.msrb.gmra.mxu2 %v9721_v28  ;;  %v8383_v14 = vld [vmem:[%s9543_s0 + $0x84] sm:$0xf]  ;;  %v6864_v17 = vor.u32 %v8583_v7, %v6861_v8 }
 0x1b2   : > { %4195 = vmatpush.bf16.msra.mxu2 %v6736_v20  ;;  %4170 = vmatpush.bf16.msra.mxu0 %v6192_v33  ;;  %v6061_v15 = vld [vmem:[%s9543_s0 + $0xa0] sm:$0xf0] }
 0x1b3   : > { %v8447_v16 = vld [vmem:[%s9543_s0 + $0x284] sm:$0xf]  ;;  %v6064_v22 = vor.u32 %v8383_v14, %v6061_v15 }
 0x1b4   : > { %4164 = vmatmul.bf16.vlgmr.msrb.gmra.mxu3 %v9727_v32  ;;  %4183 = vmatpush.bf16.msra.mxu1 %v6448_v35  ;;  %v6317_v18 = vld [vmem:[%s9543_s0 + $0x2a0] sm:$0xf0] }
 0x1b5   : > { %4208 = vmatpush.bf16.msra.mxu3 %v6992_v24  ;;  %v8511_v52 = vld [vmem:[%s9543_s0 + $0x484] sm:$0xf]  ;;  %v6320_v23 = vor.u32 %v8447_v16, %v6317_v18 }
 0x1b6   : > { %4196 = vmatpush.bf16.msra.mxu2 %v6704_v36  ;;  %4171 = vmatpush.bf16.msra.mxu0 %v6160_v46  ;;  %v6573_v19 = vld [vmem:[%s9543_s0 + $0x4a0] sm:$0xf0] }
 0x1b7   : > { %v8575_v20 = vld [vmem:[%s9543_s0 + $0x684] sm:$0xf]  ;;  %v6576_v24 = vor.u32 %v8511_v52, %v6573_v19 }
 0x1b8   : > { %4184 = vmatpush.bf16.msra.mxu1 %v6416_v47  ;;  %v6829_v21 = vld [vmem:[%s9543_s0 + $0x6a0] sm:$0xf0] }
 0x1b9   : > { %4209 = vmatpush.bf16.msra.mxu3 %v6960_v40  ;;  %v8375_v25 = vld [vmem:[%s9543_s0 + $0x44] sm:$0xf]  ;;  %v6832_v29 = vor.u32 %v8575_v20, %v6829_v21 }
 0x1ba   : > { %4197 = vmatpush.bf16.msra.mxu2 %v6672_v48  ;;  %4172 = vmatpush.bf16.msra.mxu0 %v6128_v60  ;;  %v6029_v26 = vld [vmem:[%s9543_s0 + $0x60] sm:$0xf0] }
 0x1bb   : > { %v8439_v27 = vld [vmem:[%s9543_s0 + $0x244] sm:$0xf]  ;;  %v6032_v38 = vor.u32 %v8375_v25, %v6029_v26 }
 0x1bc   : > { %4185 = vmatpush.bf16.msra.mxu1 %v6384_v62  ;;  %v6285_v30 = vld [vmem:[%s9543_s0 + $0x260] sm:$0xf0] }
 0x1bd   : > { %4210 = vmatpush.bf16.msra.mxu3 %v6928_v53  ;;  %v8503_v33 = vld [vmem:[%s9543_s0 + $0x444] sm:$0xf]  ;;  %v6288_v41 = vor.u32 %v8439_v27, %v6285_v30 }
 0x1be   : > { %4198 = vmatpush.bf16.msra.mxu2 %v6640_v63  ;;  %4173 = vmatpush.bf16.msra.mxu0 %v6096_v9  ;;  %v6541_v35 = vld [vmem:[%s9543_s0 + $0x460] sm:$0xf0] }
 0x1bf   : > { %v8567_v36 = vld [vmem:[%s9543_s0 + $0x644] sm:$0xf]  ;;  %v6544_v42 = vor.u32 %v8503_v33, %v6541_v35 }
 0x1c0   : > { %4186 = vmatpush.bf16.msra.mxu1 %v6352_v10  ;;  %v6797_v37 = vld [vmem:[%s9543_s0 + $0x660] sm:$0xf0] }
 0x1c1   : > { %4211 = vmatpush.bf16.msra.mxu3 %v6896_v3  ;;  %v8367_v39 = vld [vmem:[%s9543_s0 + $0x4] sm:$0xf]  ;;  %v6800_v46 = vor.u32 %v8567_v36, %v6797_v37 }
 0x1c2   : > { %4199 = vmatpush.bf16.msra.mxu2 %v6608_v13  ;;  %4174 = vmatpush.bf16.msra.mxu0 %v6064_v22  ;;  %v5997_v40 = vld [vmem:[%s9543_s0 + $0x20] sm:$0xf0] }
 0x1c3   : > { %v8431_v43 = vld [vmem:[%s9543_s0 + $0x204] sm:$0xf]  ;;  %v6000_v54 = vor.u32 %v8367_v39, %v5997_v40 }
 0x1c4   : > { %4187 = vmatpush.bf16.msra.mxu1 %v6320_v23  ;;  %v6253_v44 = vld [vmem:[%s9543_s0 + $0x220] sm:$0xf0] }
 0x1c5   : > { %4212 = vmatpush.bf16.msra.mxu3 %v6864_v17  ;;  %v8495_v45 = vld [vmem:[%s9543_s0 + $0x404] sm:$0xf]  ;;  %v6256_v58 = vor.u32 %v8431_v43, %v6253_v44 }
 0x1c6   : > { %4200 = vmatpush.bf16.msra.mxu2 %v6576_v24  ;;  %v6509_v47 = vld [vmem:[%s9543_s0 + $0x420] sm:$0xf0]  ;;  %4175 = vmatpush.bf16.msra.mxu0 %v6032_v38 }
 0x1c7   : > { %v8559_v48 = vld [vmem:[%s9543_s0 + $0x604] sm:$0xf]  ;;  %v6512_v60 = vor.u32 %v8495_v45, %v6509_v47 }
 0x1c8   : > { %v6765_v49 = vld [vmem:[%s9543_s0 + $0x620] sm:$0xf0]  ;;  %4188 = vmatpush.bf16.msra.mxu1 %v6288_v41 }
 0x1c9   : > { %4213 = vmatpush.bf16.msra.mxu3 %v6832_v29  ;;  %v8679_v50 = vld [vmem:[%s9543_s0 + $0x9c4] sm:$0xf]  ;;  %v6768_v0 = vor.u32 %v8559_v48, %v6765_v49 }
 0x1ca   : > { %v7245_v51 = vld [vmem:[%s9543_s0 + $0x9e0] sm:$0xf0]  ;;  %4201 = vmatpush.bf16.msra.mxu2 %v6544_v42  ;;  %4176 = vmatpush.bf16.msra.mxu0 %v6000_v54 }
 0x1cb   : > { %v8743_v53 = vld [vmem:[%s9543_s0 + $0xbc4] sm:$0xf]  ;;  %v7248_v1 = vor.u32 %v8679_v50, %v7245_v51 }
 0x1cc   : > { %v7501_v55 = vld [vmem:[%s9543_s0 + $0xbe0] sm:$0xf0]  ;;  %4189 = vmatpush.bf16.msra.mxu1 %v6256_v58 }
 0x1cd   : > { %v8807_v56 = vld [vmem:[%s9543_s0 + $0xdc4] sm:$0xf]  ;;  %4214 = vmatpush.bf16.msra.mxu3 %v6800_v46  ;;  %v7504_v2 = vor.u32 %v8743_v53, %v7501_v55  ;;  %4177 = vmatmul.bf16.vlgmr.msra.gmra.mxu0 %v9668_v11 }
 0x1ce   : > { %v7757_v57 = vld [vmem:[%s9543_s0 + $0xde0] sm:$0xf0]  ;;  %4202 = vmatpush.bf16.msra.mxu2 %v6512_v60  ;;  %4221 = vmatpush.bf16.msrb.mxu0 %v7248_v1 }
 0x1cf   : > { %v8871_v62 = vld [vmem:[%s9543_s0 + $0xfc4] sm:$0xf]  ;;  %v7760_v3 = vor.u32 %v8807_v56, %v7757_v57  ;;  %4190 = vmatmul.bf16.vlgmr.msra.gmra.mxu1 %v9671_v12 }
 0x1d0   : > { %v8013_v63 = vld [vmem:[%s9543_s0 + $0xfe0] sm:$0xf0]  ;;  %4234 = vmatpush.bf16.msrb.mxu1 %v7504_v2 }
 0x1d1   : > { %v8671_v4 = vld [vmem:[%s9543_s0 + $0x984] sm:$0xf]  ;;  %v8016_v7 = vor.u32 %v8871_v62, %v8013_v63  ;;  %4215 = vmatpush.bf16.msra.mxu3 %v6768_v0  ;;  %4203 = vmatmul.bf16.vlgmr.msra.gmra.mxu2 %v9655_v59 }
 0x1d2   : > { %v7213_v5 = vld [vmem:[%s9543_s0 + $0x9a0] sm:$0xf0]  ;;  %4247 = vmatpush.bf16.msrb.mxu2 %v7760_v3 }
 0x1d3   : > { %v8735_v6 = vld [vmem:[%s9543_s0 + $0xb84] sm:$0xf]  ;;  %v7216_v15 = vor.u32 %v8671_v4, %v7213_v5 }
 0x1d4   : > { %v7469_v8 = vld [vmem:[%s9543_s0 + $0xba0] sm:$0xf0]  ;;  %4216 = vmatmul.bf16.vlgmr.msra.gmra.mxu3 %v9657_v61 }
 0x1d5   : > { %v8799_v9 = vld [vmem:[%s9543_s0 + $0xd84] sm:$0xf]  ;;  %v7472_v16 = vor.u32 %v8735_v6, %v7469_v8  ;;  %4260 = vmatpush.bf16.msrb.mxu3 %v8016_v7  ;;  %4222 = vmatpush.bf16.msrb.mxu0 %v7216_v15 }
 0x1d6   : > { %v7725_v10 = vld [vmem:[%s9543_s0 + $0xda0] sm:$0xf0] }
 0x1d7   : > { %v8863_v13 = vld [vmem:[%s9543_s0 + $0xf84] sm:$0xf]  ;;  %v7728_v17 = vor.u32 %v8799_v9, %v7725_v10  ;;  %4235 = vmatpush.bf16.msrb.mxu1 %v7472_v16 }
 0x1d8   : > { %v7981_v14 = vld [vmem:[%s9543_s0 + $0xfa0] sm:$0xf0] }
 0x1d9   : > { %v8663_v18 = vld [vmem:[%s9543_s0 + $0x944] sm:$0xf]  ;;  %v7984_v20 = vor.u32 %v8863_v13, %v7981_v14  ;;  %4248 = vmatpush.bf16.msrb.mxu2 %v7728_v17 }
 0x1da   : > { %v7181_v52 = vld [vmem:[%s9543_s0 + $0x960] sm:$0xf0] }
 0x1db   : > { %v8727_v19 = vld [vmem:[%s9543_s0 + $0xb44] sm:$0xf]  ;;  %v7184_v26 = vor.u32 %v8663_v18, %v7181_v52  ;;  %4261 = vmatpush.bf16.msrb.mxu3 %v7984_v20 }
 0x1dc   : > { %v7437_v21 = vld [vmem:[%s9543_s0 + $0xb60] sm:$0xf0] }
 0x1dd   : > { %v8791_v22 = vld [vmem:[%s9543_s0 + $0xd44] sm:$0xf]  ;;  %v7440_v27 = vor.u32 %v8727_v19, %v7437_v21  ;;  %4223 = vmatpush.bf16.msrb.mxu0 %v7184_v26 }
 0x1de   : > { %v7693_v23 = vld [vmem:[%s9543_s0 + $0xd60] sm:$0xf0] }
 0x1df   : > { %v8855_v24 = vld [vmem:[%s9543_s0 + $0xf44] sm:$0xf]  ;;  %v7696_v29 = vor.u32 %v8791_v22, %v7693_v23  ;;  %4236 = vmatpush.bf16.msrb.mxu1 %v7440_v27 }
 0x1e0   : > { %v7949_v25 = vld [vmem:[%s9543_s0 + $0xf60] sm:$0xf0] }
 0x1e1   : > { %v8655_v30 = vld [vmem:[%s9543_s0 + $0x904] sm:$0xf]  ;;  %v7952_v36 = vor.u32 %v8855_v24, %v7949_v25  ;;  %4249 = vmatpush.bf16.msrb.mxu2 %v7696_v29 }
 0x1e2   : > { %v7149_v33 = vld [vmem:[%s9543_s0 + $0x920] sm:$0xf0] }
 0x1e3   : > { %v8719_v35 = vld [vmem:[%s9543_s0 + $0xb04] sm:$0xf]  ;;  %v7152_v42 = vor.u32 %v8655_v30, %v7149_v33  ;;  %4262 = vmatpush.bf16.msrb.mxu3 %v7952_v36  ;;  %v6227_v33 = vld [vmem:[%s9543_s0 + $0x1c8] sm:$0xf] }
 0x1e4   : > { %v7405_v37 = vld [vmem:[%s9543_s0 + $0xb20] sm:$0xf0]  ;;  %v6483_v36 = vld [vmem:[%s9543_s0 + $0x3c8] sm:$0xf] }
 0x1e5   : > { %v8783_v38 = vld [vmem:[%s9543_s0 + $0xd04] sm:$0xf]  ;;  %v7408_v43 = vor.u32 %v8719_v35, %v7405_v37  ;;  %4224 = vmatpush.bf16.msrb.mxu0 %v7152_v42  ;;  %v8428_v35 = vld [vmem:[%s9543_s0 + $0x1e4] sm:$0xf0] }
 0x1e6   : > { %v7661_v39 = vld [vmem:[%s9543_s0 + $0xd20] sm:$0xf0] }
 0x1e7   : > { %v8847_v40 = vld [vmem:[%s9543_s0 + $0xf04] sm:$0xf]  ;;  %v7664_v44 = vor.u32 %v8783_v38, %v7661_v39  ;;  %4237 = vmatpush.bf16.msrb.mxu1 %v7408_v43  ;;  %v8492_v38 = vld [vmem:[%s9543_s0 + $0x3e4] sm:$0xf0] }
 0x1e8   : > { %v7917_v41 = vld [vmem:[%s9543_s0 + $0xf20] sm:$0xf0]  ;;  %v6739_v39 = vld [vmem:[%s9543_s0 + $0x5c8] sm:$0xf] }
 0x1e9   : > { %v8647_v45 = vld [vmem:[%s9543_s0 + $0x8c4] sm:$0xf]  ;;  %v7920_v48 = vor.u32 %v8847_v40, %v7917_v41  ;;  %4250 = vmatpush.bf16.msrb.mxu2 %v7664_v44  ;;  %v8556_v40 = vld [vmem:[%s9543_s0 + $0x5e4] sm:$0xf0] }
 0x1ea   : > { %v7117_v46 = vld [vmem:[%s9543_s0 + $0x8e0] sm:$0xf0]  ;;  %v6995_v43 = vld [vmem:[%s9543_s0 + $0x7c8] sm:$0xf] }
 0x1eb   : > { %v8711_v47 = vld [vmem:[%s9543_s0 + $0xac4] sm:$0xf]  ;;  %v7120_v55 = vor.u32 %v8647_v45, %v7117_v46  ;;  %4263 = vmatpush.bf16.msrb.mxu3 %v7920_v48  ;;  %v8620_v44 = vld [vmem:[%s9543_s0 + $0x7e4] sm:$0xf0]  ;;  %v6228_v46 = vor.u32 %v8428_v35, %v6227_v33  ;;  %v6740_v48 = vor.u32 %v8556_v40, %v6739_v39 }
 0x1ec   : > { %v7373_v49 = vld [vmem:[%s9543_s0 + $0xae0] sm:$0xf0]  ;;  %v6611_v33 = vld [vmem:[%s9543_s0 + $0x4c8] sm:$0xf] }
 0x1ed   : > { %v8775_v50 = vld [vmem:[%s9543_s0 + $0xcc4] sm:$0xf]  ;;  %v7376_v56 = vor.u32 %v8711_v47, %v7373_v49  ;;  %4225 = vmatpush.bf16.msrb.mxu0 %v7120_v55  ;;  %v6484_v47 = vor.u32 %v8492_v38, %v6483_v36  ;;  %v6195_v49 = vld [vmem:[%s9543_s0 + $0x188] sm:$0xf] }
 0x1ee   : > { %v7629_v51 = vld [vmem:[%s9543_s0 + $0xce0] sm:$0xf0]  ;;  %v6707_v55 = vld [vmem:[%s9543_s0 + $0x588] sm:$0xf] }
 0x1ef   : > { %v8839_v53 = vld [vmem:[%s9543_s0 + $0xec4] sm:$0xf]  ;;  %v7632_v57 = vor.u32 %v8775_v50, %v7629_v51  ;;  %4238 = vmatpush.bf16.msrb.mxu1 %v7376_v56  ;;  %v8420_v50 = vld [vmem:[%s9543_s0 + $0x1a4] sm:$0xf0] }
 0x1f0   : > { %v7885_v54 = vld [vmem:[%s9543_s0 + $0xee0] sm:$0xf0]  ;;  %v6451_v51 = vld [vmem:[%s9543_s0 + $0x388] sm:$0xf] }
 0x1f1   : > { %v8639_v58 = vld [vmem:[%s9543_s0 + $0x884] sm:$0xf]  ;;  %v7888_v63 = vor.u32 %v8839_v53, %v7885_v54  ;;  %4251 = vmatpush.bf16.msrb.mxu2 %v7632_v57  ;;  %v6996_v53 = vor.u32 %v8620_v44, %v6995_v43  ;;  %v8484_v54 = vld [vmem:[%s9543_s0 + $0x3a4] sm:$0xf0] }
 0x1f2   : > { %v7085_v60 = vld [vmem:[%s9543_s0 + $0x8a0] sm:$0xf0]  ;;  %v8548_v56 = vld [vmem:[%s9543_s0 + $0x5a4] sm:$0xf0] }
 0x1f3   : > { %v8703_v62 = vld [vmem:[%s9543_s0 + $0xa84] sm:$0xf]  ;;  %v7088_v5 = vor.u32 %v8639_v58, %v7085_v60  ;;  %4264 = vmatpush.bf16.msrb.mxu3 %v7888_v63  ;;  %v6963_v57 = vld [vmem:[%s9543_s0 + $0x788] sm:$0xf]  ;;  %v6196_v60 = vor.u32 %v8420_v50, %v6195_v49  ;;  %v6708_v63 = vor.u32 %v8548_v56, %v6707_v55 }
 0x1f4   : > { %v7341_v0 = vld [vmem:[%s9543_s0 + $0xaa0] sm:$0xf0]  ;;  %v8612_v58 = vld [vmem:[%s9543_s0 + $0x7a4] sm:$0xf0] }
 0x1f5   : > { %v8767_v1 = vld [vmem:[%s9543_s0 + $0xc84] sm:$0xf]  ;;  %v7344_v6 = vor.u32 %v8703_v62, %v7341_v0  ;;  %4226 = vmatpush.bf16.msrb.mxu0 %v7088_v5  ;;  %v6452_v62 = vor.u32 %v8484_v54, %v6451_v51  ;;  %v6163_v0 = vld [vmem:[%s9543_s0 + $0x148] sm:$0xf] }
 0x1f6   : > { %v7597_v2 = vld [vmem:[%s9543_s0 + $0xca0] sm:$0xf0]  ;;  %v6675_v5 = vld [vmem:[%s9543_s0 + $0x548] sm:$0xf] }
 0x1f7   : > { %v8831_v3 = vld [vmem:[%s9543_s0 + $0xe84] sm:$0xf]  ;;  %v7600_v7 = vor.u32 %v8767_v1, %v7597_v2  ;;  %4239 = vmatpush.bf16.msrb.mxu1 %v7344_v6  ;;  %v8412_v1 = vld [vmem:[%s9543_s0 + $0x164] sm:$0xf0] }
 0x1f8   : > { %v7853_v4 = vld [vmem:[%s9543_s0 + $0xea0] sm:$0xf0]  ;;  %v6419_v2 = vld [vmem:[%s9543_s0 + $0x348] sm:$0xf] }
 0x1f9   : > { %v8631_v8 = vld [vmem:[%s9543_s0 + $0x844] sm:$0xf]  ;;  %v7856_v13 = vor.u32 %v8831_v3, %v7853_v4  ;;  %4252 = vmatpush.bf16.msrb.mxu2 %v7600_v7  ;;  %v6964_v3 = vor.u32 %v8612_v58, %v6963_v57  ;;  %v8476_v4 = vld [vmem:[%s9543_s0 + $0x364] sm:$0xf0] }
 0x1fa   : > { %v7053_v9 = vld [vmem:[%s9543_s0 + $0x860] sm:$0xf0]  ;;  %v8540_v6 = vld [vmem:[%s9543_s0 + $0x564] sm:$0xf0] }
 0x1fb   : > { %v8695_v10 = vld [vmem:[%s9543_s0 + $0xa44] sm:$0xf]  ;;  %v7056_v52 = vor.u32 %v8631_v8, %v7053_v9  ;;  %4265 = vmatpush.bf16.msrb.mxu3 %v7856_v13  ;;  %v6931_v7 = vld [vmem:[%s9543_s0 + $0x748] sm:$0xf]  ;;  %v6164_v9 = vor.u32 %v8412_v1, %v6163_v0  ;;  %v6676_v13 = vor.u32 %v8540_v6, %v6675_v5 }
 0x1fc   : > { %v7309_v14 = vld [vmem:[%s9543_s0 + $0xa60] sm:$0xf0]  ;;  %v8604_v8 = vld [vmem:[%s9543_s0 + $0x764] sm:$0xf0] }
 0x1fd   : > { %v8759_v15 = vld [vmem:[%s9543_s0 + $0xc44] sm:$0xf]  ;;  %v7312_v21 = vor.u32 %v8695_v10, %v7309_v14  ;;  %4227 = vmatpush.bf16.msrb.mxu0 %v7056_v52  ;;  %v6420_v10 = vor.u32 %v8476_v4, %v6419_v2  ;;  %v6131_v14 = vld [vmem:[%s9543_s0 + $0x108] sm:$0xf] }
 0x1fe   : > { %v7565_v16 = vld [vmem:[%s9543_s0 + $0xc60] sm:$0xf0]  ;;  %v6643_v52 = vld [vmem:[%s9543_s0 + $0x508] sm:$0xf] }
 0x1ff   : > { %v8823_v17 = vld [vmem:[%s9543_s0 + $0xe44] sm:$0xf]  ;;  %v7568_v22 = vor.u32 %v8759_v15, %v7565_v16  ;;  %4240 = vmatpush.bf16.msrb.mxu1 %v7312_v21  ;;  %v8404_v15 = vld [vmem:[%s9543_s0 + $0x124] sm:$0xf0] }
 0x200   : > { %v7821_v18 = vld [vmem:[%s9543_s0 + $0xe60] sm:$0xf0]  ;;  %v6387_v16 = vld [vmem:[%s9543_s0 + $0x308] sm:$0xf] }
 0x201   : > { %v8623_v19 = vld [vmem:[%s9543_s0 + $0x804] sm:$0xf]  ;;  %v7824_v26 = vor.u32 %v8823_v17, %v7821_v18  ;;  %4253 = vmatpush.bf16.msrb.mxu2 %v7568_v22  ;;  %v6932_v17 = vor.u32 %v8604_v8, %v6931_v7  ;;  %v8468_v18 = vld [vmem:[%s9543_s0 + $0x324] sm:$0xf0]  ;;  %v6132_v22 = vor.u32 %v8404_v15, %v6131_v14 }
 0x202   : > { %v7021_v20 = vld [vmem:[%s9543_s0 + $0x820] sm:$0xf0]  ;;  %v8596_v21 = vld [vmem:[%s9543_s0 + $0x724] sm:$0xf0] }
 0x203   : > { %v8687_v23 = vld [vmem:[%s9543_s0 + $0xa04] sm:$0xf]  ;;  %v7024_v37 = vor.u32 %v8623_v19, %v7021_v20  ;;  %4266 = vmatpush.bf16.msrb.mxu3 %v7824_v26  ;;  %v8532_v19 = vld [vmem:[%s9543_s0 + $0x524] sm:$0xf0] }
 0x204   : > { %v7277_v24 = vld [vmem:[%s9543_s0 + $0xa20] sm:$0xf0]  ;;  %v6899_v20 = vld [vmem:[%s9543_s0 + $0x708] sm:$0xf] }
 0x205   : > { %v8751_v25 = vld [vmem:[%s9543_s0 + $0xc04] sm:$0xf]  ;;  %v7280_v41 = vor.u32 %v8687_v23, %v7277_v24  ;;  %4228 = vmatpush.bf16.msrb.mxu0 %v7024_v37  ;;  %v6388_v23 = vor.u32 %v8468_v18, %v6387_v16  ;;  %v6644_v24 = vor.u32 %v8532_v19, %v6643_v52  ;;  %v8396_v26 = vld [vmem:[%s9543_s0 + $0xe4] sm:$0xf0] }
 0x206   : > { %v7533_v27 = vld [vmem:[%s9543_s0 + $0xc20] sm:$0xf0]  ;;  %v8524_v35 = vld [vmem:[%s9543_s0 + $0x4e4] sm:$0xf0] }
 0x207   : > { %v8815_v29 = vld [vmem:[%s9543_s0 + $0xe04] sm:$0xf]  ;;  %v7536_v42 = vor.u32 %v8751_v25, %v7533_v27  ;;  %4241 = vmatpush.bf16.msrb.mxu1 %v7280_v41  ;;  %v6099_v25 = vld [vmem:[%s9543_s0 + $0xc8] sm:$0xf]  ;;  %v6612_v40 = vor.u32 %v8524_v35, %v6611_v33 }
 0x208   : > { %v7789_v30 = vld [vmem:[%s9543_s0 + $0xe20] sm:$0xf0]  ;;  %4229 = vmatmul.bf16.vlgmr.msrb.gmra.mxu0 %v9725_v31  ;;  %v6355_v27 = vld [vmem:[%s9543_s0 + $0x2c8] sm:$0xf]  ;;  %v6100_v38 = vor.u32 %v8396_v26, %v6099_v25 }
 0x209   : > { %v7792_v45 = vor.u32 %v8815_v29, %v7789_v30  ;;  %4254 = vmatpush.bf16.msrb.mxu2 %v7536_v42  ;;  %4273 = vmatpush.bf16.msra.mxu0 %v6228_v46  ;;  %v6900_v29 = vor.u32 %v8596_v21, %v6899_v20  ;;  %v8460_v30 = vld [vmem:[%s9543_s0 + $0x2e4] sm:$0xf0] }
 0x20a   : > { %4242 = vmatmul.bf16.vlgmr.msrb.gmra.mxu1 %v9729_v34  ;;  %v6867_v36 = vld [vmem:[%s9543_s0 + $0x6c8] sm:$0xf]  ;;  %v6356_v39 = vor.u32 %v8460_v30, %v6355_v27 }
 0x20b   : > { %4267 = vmatpush.bf16.msrb.mxu3 %v7792_v45  ;;  %4286 = vmatpush.bf16.msra.mxu1 %v6484_v47  ;;  %v8588_v37 = vld [vmem:[%s9543_s0 + $0x6e4] sm:$0xf0] }
 0x20c   : > { %4255 = vmatmul.bf16.vlgmr.msrb.gmra.mxu2 %v9721_v28  ;;  %v6067_v41 = vld [vmem:[%s9543_s0 + $0x88] sm:$0xf]  ;;  %v6868_v44 = vor.u32 %v8588_v37, %v6867_v36 }
 0x20d   : > { %4299 = vmatpush.bf16.msra.mxu2 %v6740_v48  ;;  %4274 = vmatpush.bf16.msra.mxu0 %v6196_v60  ;;  %v8388_v42 = vld [vmem:[%s9543_s0 + $0xa4] sm:$0xf0] }
 0x20e   : > { %4268 = vmatmul.bf16.vlgmr.msrb.gmra.mxu3 %v9727_v32  ;;  %v6323_v43 = vld [vmem:[%s9543_s0 + $0x288] sm:$0xf]  ;;  %v6068_v50 = vor.u32 %v8388_v42, %v6067_v41 }
 0x20f   : > { %4312 = vmatpush.bf16.msra.mxu3 %v6996_v53  ;;  %4287 = vmatpush.bf16.msra.mxu1 %v6452_v62  ;;  %v8452_v45 = vld [vmem:[%s9543_s0 + $0x2a4] sm:$0xf0] }
 0x210   : > { %v6579_v46 = vld [vmem:[%s9543_s0 + $0x488] sm:$0xf]  ;;  %v6324_v51 = vor.u32 %v8452_v45, %v6323_v43 }
 0x211   : > { %4300 = vmatpush.bf16.msra.mxu2 %v6708_v63  ;;  %4275 = vmatpush.bf16.msra.mxu0 %v6164_v9  ;;  %v8516_v47 = vld [vmem:[%s9543_s0 + $0x4a4] sm:$0xf0] }
 0x212   : > { %v6835_v48 = vld [vmem:[%s9543_s0 + $0x688] sm:$0xf]  ;;  %v6580_v53 = vor.u32 %v8516_v47, %v6579_v46 }
 0x213   : > { %4313 = vmatpush.bf16.msra.mxu3 %v6964_v3  ;;  %4288 = vmatpush.bf16.msra.mxu1 %v6420_v10  ;;  %v8580_v49 = vld [vmem:[%s9543_s0 + $0x6a4] sm:$0xf0] }
 0x214   : > { %v6035_v54 = vld [vmem:[%s9543_s0 + $0x48] sm:$0xf]  ;;  %v6836_v57 = vor.u32 %v8580_v49, %v6835_v48 }
 0x215   : > { %4301 = vmatpush.bf16.msra.mxu2 %v6676_v13  ;;  %4276 = vmatpush.bf16.msra.mxu0 %v6132_v22  ;;  %v8380_v55 = vld [vmem:[%s9543_s0 + $0x64] sm:$0xf0] }
 0x216   : > { %v6291_v56 = vld [vmem:[%s9543_s0 + $0x248] sm:$0xf]  ;;  %v6036_v1 = vor.u32 %v8380_v55, %v6035_v54 }
 0x217   : > { %4314 = vmatpush.bf16.msra.mxu3 %v6932_v17  ;;  %4289 = vmatpush.bf16.msra.mxu1 %v6388_v23  ;;  %v8444_v58 = vld [vmem:[%s9543_s0 + $0x264] sm:$0xf0] }
 0x218   : > { %v6547_v60 = vld [vmem:[%s9543_s0 + $0x448] sm:$0xf]  ;;  %v6292_v4 = vor.u32 %v8444_v58, %v6291_v56 }
 0x219   : > { %4302 = vmatpush.bf16.msra.mxu2 %v6644_v24  ;;  %4277 = vmatpush.bf16.msra.mxu0 %v6100_v38  ;;  %v8508_v62 = vld [vmem:[%s9543_s0 + $0x464] sm:$0xf0] }
 0x21a   : > { %v6803_v63 = vld [vmem:[%s9543_s0 + $0x648] sm:$0xf]  ;;  %v6548_v5 = vor.u32 %v8508_v62, %v6547_v60 }
 0x21b   : > { %4315 = vmatpush.bf16.msra.mxu3 %v6900_v29  ;;  %4290 = vmatpush.bf16.msra.mxu1 %v6356_v39  ;;  %v8572_v0 = vld [vmem:[%s9543_s0 + $0x664] sm:$0xf0] }
 0x21c   : > { %v6003_v2 = vld [vmem:[%s9543_s0 + $0x8] sm:$0xf]  ;;  %v6804_v9 = vor.u32 %v8572_v0, %v6803_v63 }
 0x21d   : > { %4303 = vmatpush.bf16.msra.mxu2 %v6612_v40  ;;  %4278 = vmatpush.bf16.msra.mxu0 %v6068_v50  ;;  %v8372_v3 = vld [vmem:[%s9543_s0 + $0x24] sm:$0xf0] }
 0x21e   : > { %v6259_v6 = vld [vmem:[%s9543_s0 + $0x208] sm:$0xf]  ;;  %v6004_v18 = vor.u32 %v8372_v3, %v6003_v2 }
 0x21f   : > { %4316 = vmatpush.bf16.msra.mxu3 %v6868_v44  ;;  %4291 = vmatpush.bf16.msra.mxu1 %v6324_v51  ;;  %v8436_v7 = vld [vmem:[%s9543_s0 + $0x224] sm:$0xf0] }
 0x220   : > { %v6515_v8 = vld [vmem:[%s9543_s0 + $0x408] sm:$0xf]  ;;  %v6260_v21 = vor.u32 %v8436_v7, %v6259_v6 }
 0x221   : > { %4304 = vmatpush.bf16.msra.mxu2 %v6580_v53  ;;  %v8500_v10 = vld [vmem:[%s9543_s0 + $0x424] sm:$0xf0]  ;;  %4279 = vmatpush.bf16.msra.mxu0 %v6036_v1 }
 0x222   : > { %v6771_v13 = vld [vmem:[%s9543_s0 + $0x608] sm:$0xf]  ;;  %v6516_v22 = vor.u32 %v8500_v10, %v6515_v8 }
 0x223   : > { %4317 = vmatpush.bf16.msra.mxu3 %v6836_v57  ;;  %v8564_v14 = vld [vmem:[%s9543_s0 + $0x624] sm:$0xf0]  ;;  %4292 = vmatpush.bf16.msra.mxu1 %v6292_v4 }
 0x224   : > { %v7251_v15 = vld [vmem:[%s9543_s0 + $0x9c8] sm:$0xf]  ;;  %v6772_v25 = vor.u32 %v8564_v14, %v6771_v13 }
 0x225   : > { %v8684_v16 = vld [vmem:[%s9543_s0 + $0x9e4] sm:$0xf0]  ;;  %4305 = vmatpush.bf16.msra.mxu2 %v6548_v5  ;;  %4280 = vmatpush.bf16.msra.mxu0 %v6004_v18 }
 0x226   : > { %v7507_v17 = vld [vmem:[%s9543_s0 + $0xbc8] sm:$0xf]  ;;  %v7252_v26 = vor.u32 %v8684_v16, %v7251_v15 }
 0x227   : > { %v8748_v52 = vld [vmem:[%s9543_s0 + $0xbe4] sm:$0xf0]  ;;  %4318 = vmatpush.bf16.msra.mxu3 %v6804_v9  ;;  %4293 = vmatpush.bf16.msra.mxu1 %v6260_v21 }
 0x228   : > { %v7763_v19 = vld [vmem:[%s9543_s0 + $0xdc8] sm:$0xf]  ;;  %v7508_v27 = vor.u32 %v8748_v52, %v7507_v17  ;;  %4281 = vmatmul.bf16.vlgmr.msra.gmra.mxu0 %v9668_v11 }
 0x229   : > { %v8812_v20 = vld [vmem:[%s9543_s0 + $0xde4] sm:$0xf0]  ;;  %4306 = vmatpush.bf16.msra.mxu2 %v6516_v22  ;;  %4325 = vmatpush.bf16.msrb.mxu0 %v7252_v26 }
 0x22a   : > { %v8019_v23 = vld [vmem:[%s9543_s0 + $0xfc8] sm:$0xf]  ;;  %v7764_v29 = vor.u32 %v8812_v20, %v7763_v19  ;;  %4294 = vmatmul.bf16.vlgmr.msra.gmra.mxu1 %v9671_v12 }
 0x22b   : > { %v8876_v24 = vld [vmem:[%s9543_s0 + $0xfe4] sm:$0xf0]  ;;  %4319 = vmatpush.bf16.msra.mxu3 %v6772_v25  ;;  %4338 = vmatpush.bf16.msrb.mxu1 %v7508_v27 }
 0x22c   : > { %v7219_v30 = vld [vmem:[%s9543_s0 + $0x988] sm:$0xf]  ;;  %v8020_v36 = vor.u32 %v8876_v24, %v8019_v23  ;;  %4307 = vmatmul.bf16.vlgmr.msra.gmra.mxu2 %v9655_v59 }
 0x22d   : > { %v8676_v33 = vld [vmem:[%s9543_s0 + $0x9a4] sm:$0xf0]  ;;  %4351 = vmatpush.bf16.msrb.mxu2 %v7764_v29 }
 0x22e   : > { %v7475_v35 = vld [vmem:[%s9543_s0 + $0xb88] sm:$0xf]  ;;  %v7220_v42 = vor.u32 %v8676_v33, %v7219_v30  ;;  %4320 = vmatmul.bf16.vlgmr.msra.gmra.mxu3 %v9657_v61 }
 0x22f   : > { %v8740_v37 = vld [vmem:[%s9543_s0 + $0xba4] sm:$0xf0]  ;;  %4364 = vmatpush.bf16.msrb.mxu3 %v8020_v36  ;;  %v4074_v36 = vpop.f32.mrf.mxu0 }
 0x230   : > { %v7731_v38 = vld [vmem:[%s9543_s0 + $0xd88] sm:$0xf]  ;;  %v7476_v43 = vor.u32 %v8740_v37, %v7475_v35  ;;  %4326 = vmatpush.bf16.msrb.mxu0 %v7220_v42 }
 0x231   : > { %v8804_v39 = vld [vmem:[%s9543_s0 + $0xda4] sm:$0xf0] }
 0x232   : > { %v7987_v40 = vld [vmem:[%s9543_s0 + $0xf88] sm:$0xf]  ;;  %v7732_v44 = vor.u32 %v8804_v39, %v7731_v38  ;;  %4339 = vmatpush.bf16.msrb.mxu1 %v7476_v43  ;;  %v4087_v39 = vpop.f32.mrf.mxu1 }
 0x233   : > { %v8868_v41 = vld [vmem:[%s9543_s0 + $0xfa4] sm:$0xf0] }
 0x234   : > { %v7187_v45 = vld [vmem:[%s9543_s0 + $0x948] sm:$0xf]  ;;  %v7988_v48 = vor.u32 %v8868_v41, %v7987_v40  ;;  %4352 = vmatpush.bf16.msrb.mxu2 %v7732_v44 }
 0x235   : > { %v8668_v46 = vld [vmem:[%s9543_s0 + $0x964] sm:$0xf0] }
 0x236   : > { %v7443_v47 = vld [vmem:[%s9543_s0 + $0xb48] sm:$0xf]  ;;  %v7188_v55 = vor.u32 %v8668_v46, %v7187_v45  ;;  %4365 = vmatpush.bf16.msrb.mxu3 %v7988_v48  ;;  %v4100_v45 = vpop.f32.mrf.mxu2 }
 0x237   : > { %v8732_v49 = vld [vmem:[%s9543_s0 + $0xb64] sm:$0xf0] }
 0x238   : > { %v7699_v50 = vld [vmem:[%s9543_s0 + $0xd48] sm:$0xf]  ;;  %v7444_v56 = vor.u32 %v8732_v49, %v7443_v47  ;;  %4327 = vmatpush.bf16.msrb.mxu0 %v7188_v55 }
 0x239   : > { %v8796_v51 = vld [vmem:[%s9543_s0 + $0xd64] sm:$0xf0] }
 0x23a   : > { %v7955_v53 = vld [vmem:[%s9543_s0 + $0xf48] sm:$0xf]  ;;  %v7700_v57 = vor.u32 %v8796_v51, %v7699_v50  ;;  %4340 = vmatpush.bf16.msrb.mxu1 %v7444_v56  ;;  %v4113_v51 = vpop.f32.mrf.mxu3 }
 0x23b   : > { %v8860_v54 = vld [vmem:[%s9543_s0 + $0xf64] sm:$0xf0] }
 0x23c   : > { %v7155_v58 = vld [vmem:[%s9543_s0 + $0x908] sm:$0xf]  ;;  %v7956_v63 = vor.u32 %v8860_v54, %v7955_v53  ;;  %4353 = vmatpush.bf16.msrb.mxu2 %v7700_v57 }
 0x23d   : > { %v8660_v60 = vld [vmem:[%s9543_s0 + $0x924] sm:$0xf0] }
 0x23e   : > { %v7411_v62 = vld [vmem:[%s9543_s0 + $0xb08] sm:$0xf]  ;;  %v7156_v5 = vor.u32 %v8660_v60, %v7155_v58  ;;  %4366 = vmatpush.bf16.msrb.mxu3 %v7956_v63 }
 0x23f   : > { %v8724_v0 = vld [vmem:[%s9543_s0 + $0xb24] sm:$0xf0] }
 0x240   : > { %v7667_v1 = vld [vmem:[%s9543_s0 + $0xd08] sm:$0xf]  ;;  %v7412_v7 = vor.u32 %v8724_v0, %v7411_v62  ;;  %4328 = vmatpush.bf16.msrb.mxu0 %v7156_v5 }
 0x241   : > { %v8788_v2 = vld [vmem:[%s9543_s0 + $0xd24] sm:$0xf0] }
 0x242   : > { %v7923_v3 = vld [vmem:[%s9543_s0 + $0xf08] sm:$0xf]  ;;  %v7668_v8 = vor.u32 %v8788_v2, %v7667_v1  ;;  %4341 = vmatpush.bf16.msrb.mxu1 %v7412_v7  ;;  %v8424_v7 = vld [vmem:[%s9543_s0 + $0x1cc] sm:$0xf] }
 0x243   : > { %v8852_v4 = vld [vmem:[%s9543_s0 + $0xf24] sm:$0xf0] }
 0x244   : > { %v7123_v6 = vld [vmem:[%s9543_s0 + $0x8c8] sm:$0xf]  ;;  %v7924_v14 = vor.u32 %v8852_v4, %v7923_v3  ;;  %4354 = vmatpush.bf16.msrb.mxu2 %v7668_v8  ;;  %v6229_v8 = vld [vmem:[%s9543_s0 + $0x1e8] sm:$0xf0] }
 0x245   : > { %v8652_v9 = vld [vmem:[%s9543_s0 + $0x8e4] sm:$0xf0] }
 0x246   : > { %v7379_v10 = vld [vmem:[%s9543_s0 + $0xac8] sm:$0xf]  ;;  %v7124_v19 = vor.u32 %v8652_v9, %v7123_v6  ;;  %4367 = vmatpush.bf16.msrb.mxu3 %v7924_v14  ;;  %v8488_v9 = vld [vmem:[%s9543_s0 + $0x3cc] sm:$0xf] }
 0x247   : > { %v9959_v13 = vld [vmem:[%s9549_s28] sm:$0xff] }
 0x248   : > { %v8716_v15 = vld [vmem:[%s9543_s0 + $0xae4] sm:$0xf0]  ;;  %v1461_v20 = vperm.slane %v9959_v13, 0  ;;  %4329 = vmatpush.bf16.msrb.mxu0 %v7124_v19 }
 0x249   : > { %v7635_v16 = vld [vmem:[%s9543_s0 + $0xcc8] sm:$0xf]  ;;  %v7380_v21 = vor.u32 %v8716_v15, %v7379_v10  ;;  %v4076_v10 = vpop.f32.mrf.mxu0  ;;  %v6485_v15 = vld [vmem:[%s9543_s0 + $0x3e8] sm:$0xf0] }
 0x24a   : > { %v8780_v17 = vld [vmem:[%s9543_s0 + $0xce4] sm:$0xf0]  ;;  %v4075_v38 = vadd.f32 %v4074_v36, %v1461_v20  ;;  %v8616_v20 = vld [vmem:[%s9543_s0 + $0x7cc] sm:$0xf] }
 0x24b   : > { %v7891_v18 = vld [vmem:[%s9543_s0 + $0xec8] sm:$0xf]  ;;  %v7636_v22 = vor.u32 %v8780_v17, %v7635_v16  ;;  %4342 = vmatpush.bf16.msrb.mxu1 %v7380_v21  ;;  %v8552_v16 = vld [vmem:[%s9543_s0 + $0x5cc] sm:$0xf] }
 0x24c   : > { %v8844_v52 = vld [vmem:[%s9543_s0 + $0xee4] sm:$0xf0]  ;;  %v4088_v50 = vadd.f32 %v4087_v39, %v4075_v38  ;;  %v6741_v17 = vld [vmem:[%s9543_s0 + $0x5e8] sm:$0xf0] }
 0x24d   : > { %v7091_v23 = vld [vmem:[%s9543_s0 + $0x888] sm:$0xf]  ;;  %v7892_v26 = vor.u32 %v8844_v52, %v7891_v18  ;;  %4355 = vmatpush.bf16.msrb.mxu2 %v7636_v22  ;;  %v4089_v18 = vpop.f32.mrf.mxu1  ;;  %v6997_v21 = vld [vmem:[%s9543_s0 + $0x7e8] sm:$0xf0]  ;;  %v4102_v22 = vpop.f32.mrf.mxu2 }
 0x24e   : > { %v8644_v24 = vld [vmem:[%s9543_s0 + $0x8a4] sm:$0xf0]  ;;  %v4101_v58 = vadd.f32 %v4100_v45, %v4088_v50  ;;  %v6453_v36 = vld [vmem:[%s9543_s0 + $0x3a8] sm:$0xf0] }
 0x24f   : > { %v7347_v25 = vld [vmem:[%s9543_s0 + $0xa88] sm:$0xf]  ;;  %v7092_v37 = vor.u32 %v8644_v24, %v7091_v23  ;;  %4368 = vmatpush.bf16.msrb.mxu3 %v7892_v26  ;;  %v6232_v24 = vor.u32 %v8424_v7, %v6229_v8  ;;  %v6488_v26 = vor.u32 %v8488_v9, %v6485_v15  ;;  %v6709_v38 = vld [vmem:[%s9543_s0 + $0x5a8] sm:$0xf0] }
 0x250   : > { %v8708_v27 = vld [vmem:[%s9543_s0 + $0xaa4] sm:$0xf0]  ;;  %v9991_v6 = vadd.f32 %v4113_v51, %v4101_v58  ;;  %v8608_v39 = vld [vmem:[%s9543_s0 + $0x78c] sm:$0xf] }
 0x251   : > { %v7603_v29 = vld [vmem:[%s9543_s0 + $0xc88] sm:$0xf]  ;;  %v7348_v40 = vor.u32 %v8708_v27, %v7347_v25  ;;  %4330 = vmatpush.bf16.msrb.mxu0 %v7092_v37  ;;  %v4115_v25 = vpop.f32.mrf.mxu3  ;;  %v6744_v27 = vor.u32 %v8552_v16, %v6741_v17  ;;  %v8544_v37 = vld [vmem:[%s9543_s0 + $0x58c] sm:$0xf] }
 0x252   : > { %v8772_v30 = vld [vmem:[%s9543_s0 + $0xca4] sm:$0xf0]  ;;  %v6165_v45 = vld [vmem:[%s9543_s0 + $0x168] sm:$0xf0] }
 0x253   : > { %v7859_v33 = vld [vmem:[%s9543_s0 + $0xe88] sm:$0xf]  ;;  %v7604_v41 = vor.u32 %v8772_v30, %v7603_v29  ;;  %4343 = vmatpush.bf16.msrb.mxu1 %v7348_v40  ;;  %v8416_v29 = vld [vmem:[%s9543_s0 + $0x18c] sm:$0xf] }
 0x254   : > { %v8836_v35 = vld [vmem:[%s9543_s0 + $0xea4] sm:$0xf0]  ;;  %v6197_v30 = vld [vmem:[%s9543_s0 + $0x1a8] sm:$0xf0] }
 0x255   : > { %v7059_v42 = vld [vmem:[%s9543_s0 + $0x848] sm:$0xf]  ;;  %v7860_v46 = vor.u32 %v8836_v35, %v7859_v33  ;;  %4356 = vmatpush.bf16.msrb.mxu2 %v7604_v41  ;;  %v8480_v33 = vld [vmem:[%s9543_s0 + $0x38c] sm:$0xf]  ;;  %v7000_v35 = vor.u32 %v8616_v20, %v6997_v21  ;;  %v6200_v41 = vor.u32 %v8416_v29, %v6197_v30  ;;  %v10034_v15 = vpop.f32.mrf.mxu1 }
 0x256   : > { %v8636_v43 = vld [vmem:[%s9543_s0 + $0x864] sm:$0xf0]  ;;  %v6965_v40 = vld [vmem:[%s9543_s0 + $0x7a8] sm:$0xf0] }
 0x257   : > { %v7315_v44 = vld [vmem:[%s9543_s0 + $0xa48] sm:$0xf]  ;;  %v7060_v55 = vor.u32 %v8636_v43, %v7059_v42  ;;  %4369 = vmatpush.bf16.msrb.mxu3 %v7860_v46  ;;  %v6456_v42 = vor.u32 %v8480_v33, %v6453_v36  ;;  %v6712_v43 = vor.u32 %v8544_v37, %v6709_v38  ;;  %v8472_v46 = vld [vmem:[%s9543_s0 + $0x34c] sm:$0xf] }
 0x258   : > { %v8700_v47 = vld [vmem:[%s9543_s0 + $0xa64] sm:$0xf0]  ;;  %v6677_v50 = vld [vmem:[%s9543_s0 + $0x568] sm:$0xf0] }
 0x259   : > { %v7571_v48 = vld [vmem:[%s9543_s0 + $0xc48] sm:$0xf]  ;;  %v7316_v60 = vor.u32 %v8700_v47, %v7315_v44  ;;  %4331 = vmatpush.bf16.msrb.mxu0 %v7060_v55  ;;  %v8408_v44 = vld [vmem:[%s9543_s0 + $0x14c] sm:$0xf]  ;;  %v6968_v47 = vor.u32 %v8608_v39, %v6965_v40  ;;  %v10049_v36 = vpop.f32.mrf.mxu3 }
 0x25a   : > { %v8764_v49 = vld [vmem:[%s9543_s0 + $0xc64] sm:$0xf0]  ;;  %v8600_v51 = vld [vmem:[%s9543_s0 + $0x74c] sm:$0xf] }
 0x25b   : > { %v7827_v53 = vld [vmem:[%s9543_s0 + $0xe48] sm:$0xf]  ;;  %v7572_v62 = vor.u32 %v8764_v49, %v7571_v48  ;;  %4344 = vmatpush.bf16.msrb.mxu1 %v7316_v60  ;;  %v6421_v48 = vld [vmem:[%s9543_s0 + $0x368] sm:$0xf0] }
 0x25c   : > { %v8828_v54 = vld [vmem:[%s9543_s0 + $0xe64] sm:$0xf0]  ;;  %v8536_v49 = vld [vmem:[%s9543_s0 + $0x54c] sm:$0xf]  ;;  %v6424_v55 = vor.u32 %v8472_v46, %v6421_v48 }
 0x25d   : > { %v7027_v56 = vld [vmem:[%s9543_s0 + $0x808] sm:$0xf]  ;;  %v7828_v2 = vor.u32 %v8828_v54, %v7827_v53  ;;  %4357 = vmatpush.bf16.msrb.mxu2 %v7572_v62  ;;  %v6933_v53 = vld [vmem:[%s9543_s0 + $0x768] sm:$0xf0]  ;;  %v6168_v54 = vor.u32 %v8408_v44, %v6165_v45  ;;  %v4141_v46 = vpop.f32.mrf.mxu1 }
 0x25e   : > { %v8628_v57 = vld [vmem:[%s9543_s0 + $0x824] sm:$0xf0]  ;;  %v6133_v58 = vld [vmem:[%s9543_s0 + $0x128] sm:$0xf0]  ;;  %v6936_v62 = vor.u32 %v8600_v51, %v6933_v53 }
 0x25f   : > { %v7283_v63 = vld [vmem:[%s9543_s0 + $0xa08] sm:$0xf]  ;;  %v7028_v14 = vor.u32 %v8628_v57, %v7027_v56  ;;  %4370 = vmatpush.bf16.msrb.mxu3 %v7828_v2  ;;  %v6680_v56 = vor.u32 %v8536_v49, %v6677_v50  ;;  %v8400_v57 = vld [vmem:[%s9543_s0 + $0x10c] sm:$0xf] }
 0x260   : > { %v8692_v0 = vld [vmem:[%s9543_s0 + $0xa24] sm:$0xf0]  ;;  %v8464_v60 = vld [vmem:[%s9543_s0 + $0x30c] sm:$0xf] }
 0x261   : > { %v7539_v1 = vld [vmem:[%s9543_s0 + $0xc08] sm:$0xf]  ;;  %v7284_v52 = vor.u32 %v8692_v0, %v7283_v63  ;;  %4332 = vmatpush.bf16.msrb.mxu0 %v7028_v14  ;;  %v6389_v63 = vld [vmem:[%s9543_s0 + $0x328] sm:$0xf0] }
 0x262   : > { %v8756_v3 = vld [vmem:[%s9543_s0 + $0xc24] sm:$0xf0]  ;;  %v8528_v0 = vld [vmem:[%s9543_s0 + $0x50c] sm:$0xf]  ;;  %v6392_v7 = vor.u32 %v8464_v60, %v6389_v63 }
 0x263   : > { %v7795_v4 = vld [vmem:[%s9543_s0 + $0xe08] sm:$0xf]  ;;  %v7540_v19 = vor.u32 %v8756_v3, %v7539_v1  ;;  %4345 = vmatpush.bf16.msrb.mxu1 %v7284_v52  ;;  %v6645_v1 = vld [vmem:[%s9543_s0 + $0x528] sm:$0xf0] }
 0x264   : > { %v8820_v5 = vld [vmem:[%s9543_s0 + $0xe24] sm:$0xf0]  ;;  %4333 = vmatmul.bf16.vlgmr.msrb.gmra.mxu0 %v9725_v31  ;;  %v8592_v2 = vld [vmem:[%s9543_s0 + $0x70c] sm:$0xf]  ;;  %v6648_v8 = vor.u32 %v8528_v0, %v6645_v1 }
 0x265   : > { %v7796_v23 = vor.u32 %v8820_v5, %v7795_v4  ;;  %4358 = vmatpush.bf16.msrb.mxu2 %v7540_v19  ;;  %4377 = vmatpush.bf16.msra.mxu0 %v6232_v24  ;;  %v6901_v3 = vld [vmem:[%s9543_s0 + $0x728] sm:$0xf0]  ;;  %v6136_v4 = vor.u32 %v8400_v57, %v6133_v58  ;;  %v10029_v5 = vpop.f32.mrf.mxu0 }
 0x266   : > { %4346 = vmatmul.bf16.vlgmr.msrb.gmra.mxu1 %v9729_v34  ;;  %v8392_v9 = vld [vmem:[%s9543_s0 + $0xcc] sm:$0xf]  ;;  %v6904_v16 = vor.u32 %v8592_v2, %v6901_v3 }
 0x267   : > { %4371 = vmatpush.bf16.msrb.mxu3 %v7796_v23  ;;  %4390 = vmatpush.bf16.msra.mxu1 %v6488_v26  ;;  %v6101_v10 = vld [vmem:[%s9543_s0 + $0xe8] sm:$0xf0] }
 0x268   : > { %4359 = vmatmul.bf16.vlgmr.msrb.gmra.mxu2 %v9721_v28  ;;  %v8456_v14 = vld [vmem:[%s9543_s0 + $0x2cc] sm:$0xf]  ;;  %v6104_v21 = vor.u32 %v8392_v9, %v6101_v10 }
 0x269   : > { %4403 = vmatpush.bf16.msra.mxu2 %v6744_v27  ;;  %4378 = vmatpush.bf16.msra.mxu0 %v6200_v41  ;;  %v6357_v17 = vld [vmem:[%s9543_s0 + $0x2e8] sm:$0xf0]  ;;  %v10044_v27 = vpop.f32.mrf.mxu2 }
 0x26a   : > { %4372 = vmatmul.bf16.vlgmr.msrb.gmra.mxu3 %v9727_v32  ;;  %v8520_v18 = vld [vmem:[%s9543_s0 + $0x4cc] sm:$0xf]  ;;  %v6360_v22 = vor.u32 %v8456_v14, %v6357_v17 }
 0x26b   : > { %4416 = vmatpush.bf16.msra.mxu3 %v7000_v35  ;;  %4391 = vmatpush.bf16.msra.mxu1 %v6456_v42  ;;  %v6613_v52 = vld [vmem:[%s9543_s0 + $0x4e8] sm:$0xf0] }
 0x26c   : > { %v8584_v19 = vld [vmem:[%s9543_s0 + $0x6cc] sm:$0xf]  ;;  %v6616_v23 = vor.u32 %v8520_v18, %v6613_v52 }
 0x26d   : > { %4404 = vmatpush.bf16.msra.mxu2 %v6712_v43  ;;  %4379 = vmatpush.bf16.msra.mxu0 %v6168_v54  ;;  %v6869_v20 = vld [vmem:[%s9543_s0 + $0x6e8] sm:$0xf0]  ;;  %v4128_v40 = vpop.f32.mrf.mxu0 }
 0x26e   : > { %v8384_v24 = vld [vmem:[%s9543_s0 + $0x8c] sm:$0xf]  ;;  %v6872_v29 = vor.u32 %v8584_v19, %v6869_v20 }
 0x26f   : > { %4417 = vmatpush.bf16.msra.mxu3 %v6968_v47  ;;  %4392 = vmatpush.bf16.msra.mxu1 %v6424_v55  ;;  %v6069_v25 = vld [vmem:[%s9543_s0 + $0xa8] sm:$0xf0] }
 0x270   : > { %v8448_v26 = vld [vmem:[%s9543_s0 + $0x28c] sm:$0xf]  ;;  %v6072_v39 = vor.u32 %v8384_v24, %v6069_v25 }
 0x271   : > { %4405 = vmatpush.bf16.msra.mxu2 %v6680_v56  ;;  %4380 = vmatpush.bf16.msra.mxu0 %v6136_v4  ;;  %v6325_v30 = vld [vmem:[%s9543_s0 + $0x2a8] sm:$0xf0]  ;;  %v4154_v0 = vpop.f32.mrf.mxu2 }
 0x272   : > { %v8512_v33 = vld [vmem:[%s9543_s0 + $0x48c] sm:$0xf]  ;;  %v6328_v41 = vor.u32 %v8448_v26, %v6325_v30 }
 0x273   : > { %4418 = vmatpush.bf16.msra.mxu3 %v6936_v62  ;;  %4393 = vmatpush.bf16.msra.mxu1 %v6392_v7  ;;  %v6581_v35 = vld [vmem:[%s9543_s0 + $0x4a8] sm:$0xf0]  ;;  %v4167_v7 = vpop.f32.mrf.mxu3 }
 0x274   : > { %v8576_v37 = vld [vmem:[%s9543_s0 + $0x68c] sm:$0xf]  ;;  %v6584_v42 = vor.u32 %v8512_v33, %v6581_v35 }
 0x275   : > { %4406 = vmatpush.bf16.msra.mxu2 %v6648_v8  ;;  %v6837_v38 = vld [vmem:[%s9543_s0 + $0x6a8] sm:$0xf0]  ;;  %4381 = vmatpush.bf16.msra.mxu0 %v6104_v21  ;;  %v10105_v7 = vpop.f32.mrf.mxu0 }
 0x276   : > { %v8376_v43 = vld [vmem:[%s9543_s0 + $0x4c] sm:$0xf]  ;;  %v6840_v47 = vor.u32 %v8576_v37, %v6837_v38 }
 0x277   : > { %4419 = vmatpush.bf16.msra.mxu3 %v6904_v16  ;;  %4394 = vmatpush.bf16.msra.mxu1 %v6360_v22  ;;  %v6037_v44 = vld [vmem:[%s9543_s0 + $0x68] sm:$0xf0] }
 0x278   : > { %v8440_v45 = vld [vmem:[%s9543_s0 + $0x24c] sm:$0xf]  ;;  %v6040_v54 = vor.u32 %v8376_v43, %v6037_v44 }
 0x279   : > { %4407 = vmatpush.bf16.msra.mxu2 %v6616_v23  ;;  %v6293_v48 = vld [vmem:[%s9543_s0 + $0x268] sm:$0xf0]  ;;  %4382 = vmatpush.bf16.msra.mxu0 %v6072_v39 }
 0x27a   : > { %v8504_v49 = vld [vmem:[%s9543_s0 + $0x44c] sm:$0xf]  ;;  %v6296_v57 = vor.u32 %v8440_v45, %v6293_v48 }
 0x27b   : > { %4420 = vmatpush.bf16.msra.mxu3 %v6872_v29  ;;  %v6549_v50 = vld [vmem:[%s9543_s0 + $0x468] sm:$0xf0]  ;;  %4395 = vmatpush.bf16.msra.mxu1 %v6328_v41 }
 0x27c   : > { %v8568_v51 = vld [vmem:[%s9543_s0 + $0x64c] sm:$0xf]  ;;  %v6552_v58 = vor.u32 %v8504_v49, %v6549_v50 }
 0x27d   : > { %v6805_v53 = vld [vmem:[%s9543_s0 + $0x668] sm:$0xf0]  ;;  %4408 = vmatpush.bf16.msra.mxu2 %v6584_v42  ;;  %4383 = vmatpush.bf16.msra.mxu0 %v6040_v54 }
 0x27e   : > { %v8368_v55 = vld [vmem:[%s9543_s0 + $0xc] sm:$0xf]  ;;  %v6808_v1 = vor.u32 %v8568_v51, %v6805_v53 }
 0x27f   : > { %v6005_v56 = vld [vmem:[%s9543_s0 + $0x28] sm:$0xf0]  ;;  %4421 = vmatpush.bf16.msra.mxu3 %v6840_v47  ;;  %4396 = vmatpush.bf16.msra.mxu1 %v6296_v57 }
 0x280   : > { %v8432_v60 = vld [vmem:[%s9543_s0 + $0x20c] sm:$0xf]  ;;  %v6008_v14 = vor.u32 %v8368_v55, %v6005_v56 }
 0x281   : > { %v6261_v62 = vld [vmem:[%s9543_s0 + $0x228] sm:$0xf0]  ;;  %4409 = vmatpush.bf16.msra.mxu2 %v6552_v58 }
 0x282   : > { %v8496_v63 = vld [vmem:[%s9543_s0 + $0x40c] sm:$0xf]  ;;  %v6264_v52 = vor.u32 %v8432_v60, %v6261_v62  ;;  %4384 = vmatpush.bf16.msra.mxu0 %v6008_v14 }
 0x283   : > { %v6517_v2 = vld [vmem:[%s9543_s0 + $0x428] sm:$0xf0]  ;;  %4422 = vmatpush.bf16.msra.mxu3 %v6808_v1 }
 0x284   : > { %v8560_v3 = vld [vmem:[%s9543_s0 + $0x60c] sm:$0xf]  ;;  %v6520_v19 = vor.u32 %v8496_v63, %v6517_v2  ;;  %4397 = vmatpush.bf16.msra.mxu1 %v6264_v52 }
 0x285   : > { %v6773_v4 = vld [vmem:[%s9543_s0 + $0x628] sm:$0xf0]  ;;  %4385 = vmatmul.bf16.vlgmr.msra.gmra.mxu0 %v9668_v11 }
 0x286   : > { %v8680_v8 = vld [vmem:[%s9543_s0 + $0x9cc] sm:$0xf]  ;;  %v6776_v22 = vor.u32 %v8560_v3, %v6773_v4  ;;  %4410 = vmatpush.bf16.msra.mxu2 %v6520_v19 }
 0x287   : > { %v7253_v9 = vld [vmem:[%s9543_s0 + $0x9e8] sm:$0xf0]  ;;  %4398 = vmatmul.bf16.vlgmr.msra.gmra.mxu1 %v9671_v12 }
 0x288   : > { %v8744_v10 = vld [vmem:[%s9543_s0 + $0xbcc] sm:$0xf]  ;;  %v7256_v23 = vor.u32 %v8680_v8, %v7253_v9  ;;  %4423 = vmatpush.bf16.msra.mxu3 %v6776_v22 }
 0x289   : > { %v7509_v16 = vld [vmem:[%s9543_s0 + $0xbe8] sm:$0xf0]  ;;  %4411 = vmatmul.bf16.vlgmr.msra.gmra.mxu2 %v9655_v59 }
 0x28a   : > { %v8808_v17 = vld [vmem:[%s9543_s0 + $0xdcc] sm:$0xf]  ;;  %v7512_v24 = vor.u32 %v8744_v10, %v7509_v16  ;;  %4429 = vmatpush.bf16.msrb.mxu0 %v7256_v23 }
 0x28b   : > { %v7765_v18 = vld [vmem:[%s9543_s0 + $0xde8] sm:$0xf0]  ;;  %4424 = vmatmul.bf16.vlgmr.msra.gmra.mxu3 %v9657_v61 }
 0x28c   : > { %v8872_v20 = vld [vmem:[%s9543_s0 + $0xfcc] sm:$0xf]  ;;  %v7768_v25 = vor.u32 %v8808_v17, %v7765_v18  ;;  %4442 = vmatpush.bf16.msrb.mxu1 %v7512_v24  ;;  %v10110_v17 = vpop.f32.mrf.mxu1 }
 0x28d   : > { %v8021_v21 = vld [vmem:[%s9543_s0 + $0xfe8] sm:$0xf0] }
 0x28e   : > { %v8672_v26 = vld [vmem:[%s9543_s0 + $0x98c] sm:$0xf]  ;;  %v8024_v33 = vor.u32 %v8872_v20, %v8021_v21  ;;  %4455 = vmatpush.bf16.msrb.mxu2 %v7768_v25 }
 0x28f   : > { %v7221_v29 = vld [vmem:[%s9543_s0 + $0x9a8] sm:$0xf0] }
 0x290   : > { %v8736_v30 = vld [vmem:[%s9543_s0 + $0xb8c] sm:$0xf]  ;;  %v7224_v41 = vor.u32 %v8672_v26, %v7221_v29  ;;  %4468 = vmatpush.bf16.msrb.mxu3 %v8024_v33  ;;  %v10120_v33 = vpop.f32.mrf.mxu2 }
 0x291   : > { %v7477_v35 = vld [vmem:[%s9543_s0 + $0xba8] sm:$0xf0] }
 0x292   : > { %v8800_v37 = vld [vmem:[%s9543_s0 + $0xd8c] sm:$0xf]  ;;  %v7480_v42 = vor.u32 %v8736_v30, %v7477_v35  ;;  %4430 = vmatpush.bf16.msrb.mxu0 %v7224_v41 }
 0x293   : > { %v7733_v38 = vld [vmem:[%s9543_s0 + $0xda8] sm:$0xf0] }
 0x294   : > { %v8864_v39 = vld [vmem:[%s9543_s0 + $0xf8c] sm:$0xf]  ;;  %v7736_v43 = vor.u32 %v8800_v37, %v7733_v38  ;;  %4443 = vmatpush.bf16.msrb.mxu1 %v7480_v42 }
 0x295   : > { %v7989_v40 = vld [vmem:[%s9543_s0 + $0xfa8] sm:$0xf0] }
 0x296   : > { %v8664_v44 = vld [vmem:[%s9543_s0 + $0x94c] sm:$0xf]  ;;  %v7992_v47 = vor.u32 %v8864_v39, %v7989_v40  ;;  %4456 = vmatpush.bf16.msrb.mxu2 %v7736_v43  ;;  %v10125_v40 = vpop.f32.mrf.mxu3 }
 0x297   : > { %v7189_v45 = vld [vmem:[%s9543_s0 + $0x968] sm:$0xf0] }
 0x298   : > { %v8728_v46 = vld [vmem:[%s9543_s0 + $0xb4c] sm:$0xf]  ;;  %v7192_v54 = vor.u32 %v8664_v44, %v7189_v45  ;;  %4469 = vmatpush.bf16.msrb.mxu3 %v7992_v47  ;;  %v4180_v44 = vpop.f32.mrf.mxu0 }
 0x299   : > { %v7445_v48 = vld [vmem:[%s9543_s0 + $0xb68] sm:$0xf0] }
 0x29a   : > { %v8792_v49 = vld [vmem:[%s9543_s0 + $0xd4c] sm:$0xf]  ;;  %v7448_v55 = vor.u32 %v8728_v46, %v7445_v48  ;;  %4431 = vmatpush.bf16.msrb.mxu0 %v7192_v54 }
 0x29b   : > { %v7701_v50 = vld [vmem:[%s9543_s0 + $0xd68] sm:$0xf0] }
 0x29c   : > { %v8856_v51 = vld [vmem:[%s9543_s0 + $0xf4c] sm:$0xf]  ;;  %v7704_v56 = vor.u32 %v8792_v49, %v7701_v50  ;;  %4444 = vmatpush.bf16.msrb.mxu1 %v7448_v55  ;;  %v4193_v50 = vpop.f32.mrf.mxu1 }
 0x29d   : > { %v7957_v53 = vld [vmem:[%s9543_s0 + $0xf68] sm:$0xf0] }
 0x29e   : > { %v8656_v57 = vld [vmem:[%s9543_s0 + $0x90c] sm:$0xf]  ;;  %v7960_v62 = vor.u32 %v8856_v51, %v7957_v53  ;;  %4457 = vmatpush.bf16.msrb.mxu2 %v7704_v56 }
 0x29f   : > { %v7157_v58 = vld [vmem:[%s9543_s0 + $0x928] sm:$0xf0] }
 0x2a0   : > { %v8720_v60 = vld [vmem:[%s9543_s0 + $0xb0c] sm:$0xf]  ;;  %v7160_v4 = vor.u32 %v8656_v57, %v7157_v58  ;;  %4470 = vmatpush.bf16.msrb.mxu3 %v7960_v62  ;;  %v1462_v58 = vperm.slane %v9959_v13, 1  ;;  %v4206_v13 = vpop.f32.mrf.mxu2 }
 0x2a1   : > { %v7413_v63 = vld [vmem:[%s9543_s0 + $0xb28] sm:$0xf0]  ;;  %v6395_v13 = vld [vmem:[%s9543_s0 + $0x310] sm:$0xf] }
 0x2a2   : > { %v8784_v0 = vld [vmem:[%s9543_s0 + $0xd0c] sm:$0xf]  ;;  %v7416_v8 = vor.u32 %v8720_v60, %v7413_v63  ;;  %4432 = vmatpush.bf16.msrb.mxu0 %v7160_v4 }
 0x2a3   : > { %v7669_v1 = vld [vmem:[%s9543_s0 + $0xd28] sm:$0xf0] }
 0x2a4   : > { %v8848_v2 = vld [vmem:[%s9543_s0 + $0xf0c] sm:$0xf]  ;;  %v7672_v9 = vor.u32 %v8784_v0, %v7669_v1  ;;  %4445 = vmatpush.bf16.msrb.mxu1 %v7416_v8 }
 0x2a5   : > { %v7925_v3 = vld [vmem:[%s9543_s0 + $0xf28] sm:$0xf0] }
 0x2a6   : > { %v8648_v10 = vld [vmem:[%s9543_s0 + $0x8cc] sm:$0xf]  ;;  %v7928_v18 = vor.u32 %v8848_v2, %v7925_v3  ;;  %4458 = vmatpush.bf16.msrb.mxu2 %v7672_v9 }
 0x2a7   : > { %v7125_v14 = vld [vmem:[%s9543_s0 + $0x8e8] sm:$0xf0] }
 0x2a8   : > { %v8712_v16 = vld [vmem:[%s9543_s0 + $0xacc] sm:$0xf]  ;;  %v7128_v23 = vor.u32 %v8648_v10, %v7125_v14  ;;  %4471 = vmatpush.bf16.msrb.mxu3 %v7928_v18  ;;  %v4179_v18 = vadd.f32 %v10105_v7, %v1462_v58  ;;  %v8621_v7 = vld [vmem:[%s9543_s0 + $0x7ec] sm:$0xf0] }
 0x2a9   : > { %v7381_v52 = vld [vmem:[%s9543_s0 + $0xae8] sm:$0xf0]  ;;  %v6683_v58 = vld [vmem:[%s9543_s0 + $0x550] sm:$0xf] }
 0x2aa   : > { %v8776_v19 = vld [vmem:[%s9543_s0 + $0xccc] sm:$0xf]  ;;  %v7384_v24 = vor.u32 %v8712_v16, %v7381_v52  ;;  %4433 = vmatpush.bf16.msrb.mxu0 %v7128_v23  ;;  %v4219_v16 = vpop.f32.mrf.mxu3  ;;  %v6235_v52 = vld [vmem:[%s9543_s0 + $0x1d0] sm:$0xf] }
 0x2ab   : > { %v7637_v20 = vld [vmem:[%s9543_s0 + $0xce8] sm:$0xf0]  ;;  %v6747_v23 = vld [vmem:[%s9543_s0 + $0x5d0] sm:$0xf] }
 0x2ac   : > { %v8840_v21 = vld [vmem:[%s9543_s0 + $0xecc] sm:$0xf]  ;;  %v7640_v25 = vor.u32 %v8776_v19, %v7637_v20  ;;  %4446 = vmatpush.bf16.msrb.mxu1 %v7384_v24  ;;  %v8429_v19 = vld [vmem:[%s9543_s0 + $0x1ec] sm:$0xf0] }
 0x2ad   : > { %v7893_v22 = vld [vmem:[%s9543_s0 + $0xee8] sm:$0xf0]  ;;  %v6491_v20 = vld [vmem:[%s9543_s0 + $0x3d0] sm:$0xf] }
 0x2ae   : > { %v8640_v26 = vld [vmem:[%s9543_s0 + $0x88c] sm:$0xf]  ;;  %v7896_v35 = vor.u32 %v8840_v21, %v7893_v22  ;;  %4459 = vmatpush.bf16.msrb.mxu2 %v7640_v25  ;;  %v8493_v22 = vld [vmem:[%s9543_s0 + $0x3ec] sm:$0xf0] }
 0x2af   : > { %v7093_v29 = vld [vmem:[%s9543_s0 + $0x8a8] sm:$0xf0]  ;;  %v8557_v24 = vld [vmem:[%s9543_s0 + $0x5ec] sm:$0xf0] }
 0x2b0   : > { %v8704_v30 = vld [vmem:[%s9543_s0 + $0xa8c] sm:$0xf]  ;;  %v7096_v43 = vor.u32 %v8640_v26, %v7093_v29  ;;  %4472 = vmatpush.bf16.msrb.mxu3 %v7896_v35  ;;  %v7003_v29 = vld [vmem:[%s9543_s0 + $0x7d0] sm:$0xf]  ;;  %v6236_v35 = vor.u32 %v8429_v19, %v6235_v52  ;;  %v4230_v19 = vpop.f32.mrf.mxu0 }
 0x2b1   : > { %v7349_v37 = vld [vmem:[%s9543_s0 + $0xaa8] sm:$0xf0]  ;;  %v7004_v44 = vor.u32 %v8621_v7, %v7003_v29  ;;  %v8461_v29 = vld [vmem:[%s9543_s0 + $0x2ec] sm:$0xf0] }
 0x2b2   : > { %v8768_v38 = vld [vmem:[%s9543_s0 + $0xc8c] sm:$0xf]  ;;  %v7352_v45 = vor.u32 %v8704_v30, %v7349_v37  ;;  %4434 = vmatpush.bf16.msrb.mxu0 %v7096_v43  ;;  %v4192_v37 = vadd.f32 %v10110_v17, %v4179_v18  ;;  %v6459_v43 = vld [vmem:[%s9543_s0 + $0x390] sm:$0xf] }
 0x2b3   : > { %v7605_v39 = vld [vmem:[%s9543_s0 + $0xca8] sm:$0xf0]  ;;  %v8613_v17 = vld [vmem:[%s9543_s0 + $0x7ac] sm:$0xf0] }
 0x2b4   : > { %v8832_v41 = vld [vmem:[%s9543_s0 + $0xe8c] sm:$0xf]  ;;  %v7608_v46 = vor.u32 %v8768_v38, %v7605_v39  ;;  %4447 = vmatpush.bf16.msrb.mxu1 %v7352_v45  ;;  %v6492_v38 = vor.u32 %v8493_v22, %v6491_v20  ;;  %v6748_v39 = vor.u32 %v8557_v24, %v6747_v23  ;;  %v8485_v45 = vld [vmem:[%s9543_s0 + $0x3ac] sm:$0xf0]  ;;  %v4243_v23 = vpop.f32.mrf.mxu1 }
 0x2b5   : > { %v7861_v42 = vld [vmem:[%s9543_s0 + $0xea8] sm:$0xf0]  ;;  %v6907_v18 = vld [vmem:[%s9543_s0 + $0x710] sm:$0xf] }
 0x2b6   : > { %v8632_v47 = vld [vmem:[%s9543_s0 + $0x84c] sm:$0xf]  ;;  %v7864_v51 = vor.u32 %v8832_v41, %v7861_v42  ;;  %4460 = vmatpush.bf16.msrb.mxu2 %v7608_v46  ;;  %v6203_v41 = vld [vmem:[%s9543_s0 + $0x190] sm:$0xf] }
 0x2b7   : > { %v7061_v48 = vld [vmem:[%s9543_s0 + $0x868] sm:$0xf0]  ;;  %v8421_v42 = vld [vmem:[%s9543_s0 + $0x1ac] sm:$0xf0] }
 0x2b8   : > { %v8696_v49 = vld [vmem:[%s9543_s0 + $0xa4c] sm:$0xf]  ;;  %v7064_v60 = vor.u32 %v8632_v47, %v7061_v48  ;;  %4473 = vmatpush.bf16.msrb.mxu3 %v7864_v51  ;;  %v6715_v46 = vld [vmem:[%s9543_s0 + $0x590] sm:$0xf]  ;;  %v4127_v48 = vadd.f32 %v10029_v5, %v9991_v6  ;;  %v6204_v50 = vor.u32 %v8421_v42, %v6203_v41  ;;  %v4205_v51 = vadd.f32 %v10120_v33, %v4192_v37 }
 0x2b9   : > { %v7317_v53 = vld [vmem:[%s9543_s0 + $0xa68] sm:$0xf0]  ;;  %v8549_v47 = vld [vmem:[%s9543_s0 + $0x5ac] sm:$0xf0] }
 0x2ba   : > { %v8760_v54 = vld [vmem:[%s9543_s0 + $0xc4c] sm:$0xf]  ;;  %v7320_v0 = vor.u32 %v8696_v49, %v7317_v53  ;;  %4435 = vmatpush.bf16.msrb.mxu0 %v7064_v60  ;;  %v6971_v49 = vld [vmem:[%s9543_s0 + $0x790] sm:$0xf]  ;;  %v6460_v53 = vor.u32 %v8485_v45, %v6459_v43 }
 0x2bb   : > { %v7573_v55 = vld [vmem:[%s9543_s0 + $0xc68] sm:$0xf0]  ;;  %v8413_v6 = vld [vmem:[%s9543_s0 + $0x16c] sm:$0xf0] }
 0x2bc   : > { %v8824_v56 = vld [vmem:[%s9543_s0 + $0xe4c] sm:$0xf]  ;;  %v7576_v1 = vor.u32 %v8760_v54, %v7573_v55  ;;  %4448 = vmatpush.bf16.msrb.mxu1 %v7320_v0  ;;  %v6716_v54 = vor.u32 %v8549_v47, %v6715_v46  ;;  %v6171_v55 = vld [vmem:[%s9543_s0 + $0x150] sm:$0xf] }
 0x2bd   : > { %v7829_v57 = vld [vmem:[%s9543_s0 + $0xe68] sm:$0xf0]  ;;  %v6427_v5 = vld [vmem:[%s9543_s0 + $0x350] sm:$0xf]  ;;  %v6172_v0 = vor.u32 %v8413_v6, %v6171_v55 }
 0x2be   : > { %v8624_v62 = vld [vmem:[%s9543_s0 + $0x80c] sm:$0xf]  ;;  %v7832_v8 = vor.u32 %v8824_v56, %v7829_v57  ;;  %4461 = vmatpush.bf16.msrb.mxu2 %v7576_v1  ;;  %v6972_v56 = vor.u32 %v8613_v17, %v6971_v49  ;;  %v8477_v57 = vld [vmem:[%s9543_s0 + $0x36c] sm:$0xf0]  ;;  %v4218_v1 = vadd.f32 %v10125_v40, %v4205_v51  ;;  %v4269_v49 = vpop.f32.mrf.mxu3 }
 0x2bf   : > { %v7029_v63 = vld [vmem:[%s9543_s0 + $0x828] sm:$0xf0]  ;;  %v8541_v60 = vld [vmem:[%s9543_s0 + $0x56c] sm:$0xf0] }
 0x2c0   : > { %v8688_v2 = vld [vmem:[%s9543_s0 + $0xa0c] sm:$0xf]  ;;  %v7032_v21 = vor.u32 %v8624_v62, %v7029_v63  ;;  %4474 = vmatpush.bf16.msrb.mxu3 %v7832_v8  ;;  %v4140_v62 = vadd.f32 %v10034_v15, %v4127_v48  ;;  %v6939_v33 = vld [vmem:[%s9543_s0 + $0x750] sm:$0xf]  ;;  %v6428_v15 = vor.u32 %v8477_v57, %v6427_v5  ;;  %v4231_v22 = vadd.f32 %v4230_v19, %v4218_v1  ;;  %v4245_v1 = vpop.f32.mrf.mxu1 }
 0x2c1   : > { %v7285_v3 = vld [vmem:[%s9543_s0 + $0xa28] sm:$0xf0]  ;;  %v8605_v63 = vld [vmem:[%s9543_s0 + $0x76c] sm:$0xf0] }
 0x2c2   : > { %v8752_v4 = vld [vmem:[%s9543_s0 + $0xc0c] sm:$0xf]  ;;  %v7288_v25 = vor.u32 %v8688_v2, %v7285_v3  ;;  %4436 = vmatpush.bf16.msrb.mxu0 %v7032_v21  ;;  %v6684_v2 = vor.u32 %v8541_v60, %v6683_v58  ;;  %v6139_v3 = vld [vmem:[%s9543_s0 + $0x110] sm:$0xf]  ;;  %v6940_v8 = vor.u32 %v8605_v63, %v6939_v33  ;;  %v4153_v16 = vadd.f32 %v10044_v27, %v4140_v62  ;;  %v4232_v58 = vpop.f32.mrf.mxu0 }
 0x2c3   : > { %v7541_v9 = vld [vmem:[%s9543_s0 + $0xc28] sm:$0xf0]  ;;  %v8597_v40 = vld [vmem:[%s9543_s0 + $0x72c] sm:$0xf0]  ;;  %v4244_v37 = vadd.f32 %v4243_v23, %v4231_v22 }
 0x2c4   : > { %v8816_v10 = vld [vmem:[%s9543_s0 + $0xe0c] sm:$0xf]  ;;  %v7544_v26 = vor.u32 %v8752_v4, %v7541_v9  ;;  %4449 = vmatpush.bf16.msrb.mxu1 %v7288_v25  ;;  %v8405_v4 = vld [vmem:[%s9543_s0 + $0x12c] sm:$0xf0]  ;;  %v6908_v27 = vor.u32 %v8597_v40, %v6907_v18 }
 0x2c5   : > { %v7797_v14 = vld [vmem:[%s9543_s0 + $0xe28] sm:$0xf0]  ;;  %4437 = vmatmul.bf16.vlgmr.msrb.gmra.mxu0 %v9725_v31  ;;  %v8469_v9 = vld [vmem:[%s9543_s0 + $0x32c] sm:$0xf0]  ;;  %v6140_v52 = vor.u32 %v8405_v4, %v6139_v3 }
 0x2c6   : > { %v7800_v30 = vor.u32 %v8816_v10, %v7797_v14  ;;  %4462 = vmatpush.bf16.msrb.mxu2 %v7544_v26  ;;  %4481 = vmatpush.bf16.msra.mxu0 %v6236_v35  ;;  %v6651_v10 = vld [vmem:[%s9543_s0 + $0x510] sm:$0xf]  ;;  %v6396_v20 = vor.u32 %v8469_v9, %v6395_v13  ;;  %v4166_v35 = vadd.f32 %v10049_v36, %v4153_v16 }
 0x2c7   : > { %4450 = vmatmul.bf16.vlgmr.msrb.gmra.mxu1 %v9729_v34  ;;  %v8533_v14 = vld [vmem:[%s9543_s0 + $0x52c] sm:$0xf0] }
 0x2c8   : > { %4475 = vmatpush.bf16.msrb.mxu3 %v7800_v30  ;;  %4494 = vmatpush.bf16.msra.mxu1 %v6492_v38  ;;  %v6652_v21 = vor.u32 %v8533_v14, %v6651_v10  ;;  %v6107_v24 = vld [vmem:[%s9543_s0 + $0xd0] sm:$0xf]  ;;  %vm4897_vm8 = vcmp.gt.f32.partialorder %v4166_v35, 0.0  ;;  %v4905_v55 = vmul.f32 0.2, %v4166_v35 }
 0x2c9   : > { %4463 = vmatmul.bf16.vlgmr.msrb.gmra.mxu2 %v9721_v28  ;;  %v8397_v25 = vld [vmem:[%s9543_s0 + $0xec] sm:$0xf0] }
 0x2ca   : > { %4507 = vmatpush.bf16.msra.mxu2 %v6748_v39  ;;  %4482 = vmatpush.bf16.msra.mxu0 %v6204_v50  ;;  %v6363_v26 = vld [vmem:[%s9543_s0 + $0x2d0] sm:$0xf]  ;;  %v6108_v41 = vor.u32 %v8397_v25, %v6107_v24 }
 0x2cb   : > { %4476 = vmatmul.bf16.vlgmr.msrb.gmra.mxu3 %v9727_v32  ;;  %v6619_v7 = vld [vmem:[%s9543_s0 + $0x4d0] sm:$0xf]  ;;  %v6364_v42 = vor.u32 %v8461_v29, %v6363_v26  ;;  %v4271_v29 = vpop.f32.mrf.mxu3 }
 0x2cc   : > { %4520 = vmatpush.bf16.msra.mxu3 %v7004_v44  ;;  %4495 = vmatpush.bf16.msra.mxu1 %v6460_v53  ;;  %v8525_v30 = vld [vmem:[%s9543_s0 + $0x4ec] sm:$0xf0]  ;;  %v4256_v44 = vpop.f32.mrf.mxu2 }
 0x2cd   : > { %v6875_v38 = vld [vmem:[%s9543_s0 + $0x6d0] sm:$0xf]  ;;  %v6620_v43 = vor.u32 %v8525_v30, %v6619_v7  ;;  %v4257_v48 = vadd.f32 %v4256_v44, %v4244_v37 }
 0x2ce   : > { %4508 = vmatpush.bf16.msra.mxu2 %v6716_v54  ;;  %4483 = vmatpush.bf16.msra.mxu0 %v6172_v0  ;;  %v8589_v39 = vld [vmem:[%s9543_s0 + $0x6ec] sm:$0xf0] }
 0x2cf   : > { %v6075_v45 = vld [vmem:[%s9543_s0 + $0x90] sm:$0xf]  ;;  %v6876_v36 = vor.u32 %v8589_v39, %v6875_v38  ;;  %v4270_v6 = vadd.f32 %v4269_v49, %v4257_v48 }
 0x2d0   : > { %4521 = vmatpush.bf16.msra.mxu3 %v6972_v56  ;;  %4496 = vmatpush.bf16.msra.mxu1 %v6428_v15  ;;  %v8389_v46 = vld [vmem:[%s9543_s0 + $0xac] sm:$0xf0] }
 0x2d1   : > { %v6331_v47 = vld [vmem:[%s9543_s0 + $0x290] sm:$0xf]  ;;  %v6076_v5 = vor.u32 %v8389_v46, %v6075_v45  ;;  %vm4898_vm9 = vcmp.gt.f32.partialorder %v4270_v6, 0.0  ;;  %v4906_v15 = vmul.f32 0.2, %v4270_v6 }
 0x2d2   : > { %4509 = vmatpush.bf16.msra.mxu2 %v6684_v2  ;;  %4484 = vmatpush.bf16.msra.mxu0 %v6140_v52  ;;  %v8453_v17 = vld [vmem:[%s9543_s0 + $0x2ac] sm:$0xf0] }
 0x2d3   : > { %v6587_v50 = vld [vmem:[%s9543_s0 + $0x490] sm:$0xf]  ;;  %v6332_v60 = vor.u32 %v8453_v17, %v6331_v47  ;;  %v4914_v9 = vsel %vm4898_vm9, %v4270_v6, %v4906_v15 }
 0x2d4   : > { %4522 = vmatpush.bf16.msra.mxu3 %v6940_v8  ;;  %4497 = vmatpush.bf16.msra.mxu1 %v6396_v20  ;;  %v8517_v51 = vld [vmem:[%s9543_s0 + $0x4ac] sm:$0xf0]  ;;  %v4913_v8 = vsel %vm4897_vm8, %v4166_v35, %v4905_v55  ;;  %v4258_v23 = vpop.f32.mrf.mxu2 }
 0x2d5   : > { %v6843_v53 = vld [vmem:[%s9543_s0 + $0x690] sm:$0xf]  ;;  %v6588_v62 = vor.u32 %v8517_v51, %v6587_v50  ;;  %v4921_v40 = vpack.c.bf16 %v4914_v9, %v4913_v8  ;;  %v4282_v23 = vpop.f32.mrf.mxu0 }
 0x2d6   : > { %4510 = vmatpush.bf16.msra.mxu2 %v6652_v21  ;;  %v8581_v54 = vld [vmem:[%s9543_s0 + $0x6ac] sm:$0xf0]  ;;  %4485 = vmatpush.bf16.msra.mxu0 %v6108_v41 }
 0x2d7   : > { %v6043_v56 = vld [vmem:[%s9543_s0 + $0x50] sm:$0xf]  ;;  %v6844_v2 = vor.u32 %v8581_v54, %v6843_v53  ;;  %4925 = vst [vmem:[#allocation2 + $0x10] sm:$0xff] %v4921_v40 }
 0x2d8   : > { %4523 = vmatpush.bf16.msra.mxu3 %v6908_v27  ;;  %v8381_v57 = vld [vmem:[%s9543_s0 + $0x6c] sm:$0xf0]  ;;  %4498 = vmatpush.bf16.msra.mxu1 %v6364_v42 }
 0x2d9   : > { %v6299_v33 = vld [vmem:[%s9543_s0 + $0x250] sm:$0xf]  ;;  %v6044_v10 = vor.u32 %v8381_v57, %v6043_v56 }
 0x2da   : > { %4511 = vmatpush.bf16.msra.mxu2 %v6620_v43  ;;  %v8445_v63 = vld [vmem:[%s9543_s0 + $0x26c] sm:$0xf0]  ;;  %4486 = vmatpush.bf16.msra.mxu0 %v6076_v5 }
 0x2db   : > { %v6555_v0 = vld [vmem:[%s9543_s0 + $0x450] sm:$0xf]  ;;  %v6300_v52 = vor.u32 %v8445_v63, %v6299_v33 }
 0x2dc   : > { %4524 = vmatpush.bf16.msra.mxu3 %v6876_v36  ;;  %v8509_v3 = vld [vmem:[%s9543_s0 + $0x46c] sm:$0xf0]  ;;  %4499 = vmatpush.bf16.msra.mxu1 %v6332_v60 }
 0x2dd   : > { %v6811_v4 = vld [vmem:[%s9543_s0 + $0x650] sm:$0xf]  ;;  %v6556_v19 = vor.u32 %v8509_v3, %v6555_v0 }
 0x2de   : > { %v8573_v13 = vld [vmem:[%s9543_s0 + $0x66c] sm:$0xf0]  ;;  %4512 = vmatpush.bf16.msra.mxu2 %v6588_v62  ;;  %4487 = vmatpush.bf16.msra.mxu0 %v6044_v10 }
 0x2df   : > { %v6011_v14 = vld [vmem:[%s9543_s0 + $0x10] sm:$0xf]  ;;  %v6812_v24 = vor.u32 %v8573_v13, %v6811_v4 }
 0x2e0   : > { %v8373_v16 = vld [vmem:[%s9543_s0 + $0x2c] sm:$0xf0]  ;;  %4525 = vmatpush.bf16.msra.mxu3 %v6844_v2  ;;  %4500 = vmatpush.bf16.msra.mxu1 %v6300_v52 }
 0x2e1   : > { %v6267_v18 = vld [vmem:[%s9543_s0 + $0x210] sm:$0xf]  ;;  %v6012_v35 = vor.u32 %v8373_v16, %v6011_v14  ;;  %v10256_v14 = vld [vmem:[%s9549_s28] sm:$0xff] }
 0x2e2   : > { %v8437_v20 = vld [vmem:[%s9543_s0 + $0x22c] sm:$0xf0]  ;;  %4513 = vmatpush.bf16.msra.mxu2 %v6556_v19  ;;  %v1463_v16 = vperm.slane %v10256_v14, 2 }
 0x2e3   : > { %v6523_v21 = vld [vmem:[%s9543_s0 + $0x410] sm:$0xf]  ;;  %v6268_v41 = vor.u32 %v8437_v20, %v6267_v18  ;;  %4488 = vmatpush.bf16.msra.mxu0 %v6012_v35 }
 0x2e4   : > { %v8501_v22 = vld [vmem:[%s9543_s0 + $0x42c] sm:$0xf0]  ;;  %4526 = vmatpush.bf16.msra.mxu3 %v6812_v24 }
 0x2e5   : > { %v6779_v25 = vld [vmem:[%s9543_s0 + $0x610] sm:$0xf]  ;;  %v6524_v42 = vor.u32 %v8501_v22, %v6523_v21  ;;  %4501 = vmatpush.bf16.msra.mxu1 %v6268_v41 }
 0x2e6   : > { %v8565_v26 = vld [vmem:[%s9543_s0 + $0x62c] sm:$0xf0]  ;;  %4489 = vmatmul.bf16.vlgmr.msra.gmra.mxu0 %v9668_v11 }
 0x2e7   : > { %v7259_v27 = vld [vmem:[%s9543_s0 + $0x9d0] sm:$0xf]  ;;  %v6780_v45 = vor.u32 %v8565_v26, %v6779_v25  ;;  %4514 = vmatpush.bf16.msra.mxu2 %v6524_v42 }
 0x2e8   : > { %v8685_v7 = vld [vmem:[%s9543_s0 + $0x9ec] sm:$0xf0]  ;;  %4502 = vmatmul.bf16.vlgmr.msra.gmra.mxu1 %v9671_v12 }
 0x2e9   : > { %v7515_v30 = vld [vmem:[%s9543_s0 + $0xbd0] sm:$0xf]  ;;  %v7260_v46 = vor.u32 %v8685_v7, %v7259_v27  ;;  %4527 = vmatpush.bf16.msra.mxu3 %v6780_v45  ;;  %v4283_v7 = vadd.f32 %v4282_v23, %v1463_v16 }
 0x2ea   : > { %v8749_v37 = vld [vmem:[%s9543_s0 + $0xbec] sm:$0xf0]  ;;  %4515 = vmatmul.bf16.vlgmr.msra.gmra.mxu2 %v9655_v59 }
 0x2eb   : > { %v7771_v38 = vld [vmem:[%s9543_s0 + $0xdd0] sm:$0xf]  ;;  %v7516_v47 = vor.u32 %v8749_v37, %v7515_v30  ;;  %4533 = vmatpush.bf16.msrb.mxu0 %v7260_v46  ;;  %v4295_v30 = vpop.f32.mrf.mxu1 }
 0x2ec   : > { %v8813_v39 = vld [vmem:[%s9543_s0 + $0xdec] sm:$0xf0]  ;;  %4528 = vmatmul.bf16.vlgmr.msra.gmra.mxu3 %v9657_v61 }
 0x2ed   : > { %v8027_v43 = vld [vmem:[%s9543_s0 + $0xfd0] sm:$0xf]  ;;  %v7772_v36 = vor.u32 %v8813_v39, %v7771_v38  ;;  %4546 = vmatpush.bf16.msrb.mxu1 %v7516_v47 }
 0x2ee   : > { %v8877_v44 = vld [vmem:[%s9543_s0 + $0xfec] sm:$0xf0] }
 0x2ef   : > { %v7227_v48 = vld [vmem:[%s9543_s0 + $0x990] sm:$0xf]  ;;  %v8028_v50 = vor.u32 %v8877_v44, %v8027_v43  ;;  %4559 = vmatpush.bf16.msrb.mxu2 %v7772_v36  ;;  %v4296_v43 = vadd.f32 %v4295_v30, %v4283_v7  ;;  %v8489_v7 = vld [vmem:[%s9543_s0 + $0x3d4] sm:$0xf] }
 0x2f0   : > { %v8677_v49 = vld [vmem:[%s9543_s0 + $0x9ac] sm:$0xf0] }
 0x2f1   : > { %v7483_v17 = vld [vmem:[%s9543_s0 + $0xb90] sm:$0xf]  ;;  %v7228_v5 = vor.u32 %v8677_v49, %v7227_v48  ;;  %4572 = vmatpush.bf16.msrb.mxu3 %v8028_v50  ;;  %v4308_v49 = vpop.f32.mrf.mxu2 }
 0x2f2   : > { %v8741_v51 = vld [vmem:[%s9543_s0 + $0xbac] sm:$0xf0] }
 0x2f3   : > { %v7739_v53 = vld [vmem:[%s9543_s0 + $0xd90] sm:$0xf]  ;;  %v7484_v56 = vor.u32 %v8741_v51, %v7483_v17  ;;  %4534 = vmatpush.bf16.msrb.mxu0 %v7228_v5 }
 0x2f4   : > { %v8805_v54 = vld [vmem:[%s9543_s0 + $0xdac] sm:$0xf0] }
 0x2f5   : > { %v7995_v55 = vld [vmem:[%s9543_s0 + $0xf90] sm:$0xf]  ;;  %v7740_v57 = vor.u32 %v8805_v54, %v7739_v53  ;;  %4547 = vmatpush.bf16.msrb.mxu1 %v7484_v56  ;;  %v4309_v54 = vadd.f32 %v4308_v49, %v4296_v43  ;;  %v7005_v43 = vld [vmem:[%s9543_s0 + $0x7f0] sm:$0xf0] }
 0x2f6   : > { %v8869_v6 = vld [vmem:[%s9543_s0 + $0xfac] sm:$0xf0]  ;;  %v8481_v49 = vld [vmem:[%s9543_s0 + $0x394] sm:$0xf] }
 0x2f7   : > { %v7195_v58 = vld [vmem:[%s9543_s0 + $0x950] sm:$0xf]  ;;  %v7996_v33 = vor.u32 %v8869_v6, %v7995_v55  ;;  %4560 = vmatpush.bf16.msrb.mxu2 %v7740_v57  ;;  %v4321_v55 = vpop.f32.mrf.mxu3 }
 0x2f8   : > { %v8669_v60 = vld [vmem:[%s9543_s0 + $0x96c] sm:$0xf0]  ;;  %v10280_v57 = vadd.f32 %v4321_v55, %v4309_v54  ;;  %v8609_v54 = vld [vmem:[%s9543_s0 + $0x794] sm:$0xf] }
 0x2f9   : > { %v7451_v62 = vld [vmem:[%s9543_s0 + $0xb50] sm:$0xf]  ;;  %v7196_v3 = vor.u32 %v8669_v60, %v7195_v58  ;;  %4573 = vmatpush.bf16.msrb.mxu3 %v7996_v33  ;;  %v4284_v58 = vpop.f32.mrf.mxu0  ;;  %v6973_v55 = vld [vmem:[%s9543_s0 + $0x7b0] sm:$0xf0] }
 0x2fa   : > { %v8733_v63 = vld [vmem:[%s9543_s0 + $0xb6c] sm:$0xf0]  ;;  %v8409_v58 = vld [vmem:[%s9543_s0 + $0x154] sm:$0xf] }
 0x2fb   : > { %v7707_v0 = vld [vmem:[%s9543_s0 + $0xd50] sm:$0xf]  ;;  %v7452_v13 = vor.u32 %v8733_v63, %v7451_v62  ;;  %4535 = vmatpush.bf16.msrb.mxu0 %v7196_v3 }
 0x2fc   : > { %v8797_v1 = vld [vmem:[%s9543_s0 + $0xd6c] sm:$0xf0] }
 0x2fd   : > { %v7963_v15 = vld [vmem:[%s9543_s0 + $0xf50] sm:$0xf]  ;;  %v7708_v8 = vor.u32 %v8797_v1, %v7707_v0  ;;  %4548 = vmatpush.bf16.msrb.mxu1 %v7452_v13  ;;  %v4297_v1 = vpop.f32.mrf.mxu1 }
 0x2fe   : > { %v8861_v2 = vld [vmem:[%s9543_s0 + $0xf6c] sm:$0xf0]  ;;  %v6685_v1 = vld [vmem:[%s9543_s0 + $0x570] sm:$0xf0] }
 0x2ff   : > { %v7163_v4 = vld [vmem:[%s9543_s0 + $0x910] sm:$0xf]  ;;  %v7964_v18 = vor.u32 %v8861_v2, %v7963_v15  ;;  %4561 = vmatpush.bf16.msrb.mxu2 %v7708_v8 }
 0x300   : > { %v8661_v9 = vld [vmem:[%s9543_s0 + $0x92c] sm:$0xf0] }
 0x301   : > { %v7419_v10 = vld [vmem:[%s9543_s0 + $0xb10] sm:$0xf]  ;;  %v7164_v22 = vor.u32 %v8661_v9, %v7163_v4  ;;  %4574 = vmatpush.bf16.msrb.mxu3 %v7964_v18 }
 0x302   : > { %v8725_v40 = vld [vmem:[%s9543_s0 + $0xb2c] sm:$0xf0] }
 0x303   : > { %v7675_v52 = vld [vmem:[%s9543_s0 + $0xd10] sm:$0xf]  ;;  %v7420_v24 = vor.u32 %v8725_v40, %v7419_v10  ;;  %4536 = vmatpush.bf16.msrb.mxu0 %v7164_v22 }
 0x304   : > { %v8789_v19 = vld [vmem:[%s9543_s0 + $0xd2c] sm:$0xf0] }
 0x305   : > { %v7931_v20 = vld [vmem:[%s9543_s0 + $0xf10] sm:$0xf]  ;;  %v7676_v25 = vor.u32 %v8789_v19, %v7675_v52  ;;  %4549 = vmatpush.bf16.msrb.mxu1 %v7420_v24 }
 0x306   : > { %v8853_v21 = vld [vmem:[%s9543_s0 + $0xf2c] sm:$0xf0] }
 0x307   : > { %v7131_v26 = vld [vmem:[%s9543_s0 + $0x8d0] sm:$0xf]  ;;  %v7932_v35 = vor.u32 %v8853_v21, %v7931_v20  ;;  %4562 = vmatpush.bf16.msrb.mxu2 %v7676_v25  ;;  %v4310_v21 = vpop.f32.mrf.mxu2 }
 0x308   : > { %v8653_v27 = vld [vmem:[%s9543_s0 + $0x8ec] sm:$0xf0] }
 0x309   : > { %v7387_v29 = vld [vmem:[%s9543_s0 + $0xad0] sm:$0xf]  ;;  %v7132_v44 = vor.u32 %v8653_v27, %v7131_v26  ;;  %4575 = vmatpush.bf16.msrb.mxu3 %v7932_v35  ;;  %v4323_v26 = vpop.f32.mrf.mxu3  ;;  %v8425_v27 = vld [vmem:[%s9543_s0 + $0x1d4] sm:$0xf] }
 0x30a   : > { %v8717_v37 = vld [vmem:[%s9543_s0 + $0xaec] sm:$0xf0]  ;;  %v6493_v35 = vld [vmem:[%s9543_s0 + $0x3f0] sm:$0xf0] }
 0x30b   : > { %v7643_v38 = vld [vmem:[%s9543_s0 + $0xcd0] sm:$0xf]  ;;  %v7388_v45 = vor.u32 %v8717_v37, %v7387_v29  ;;  %4537 = vmatpush.bf16.msrb.mxu0 %v7132_v44  ;;  %v6237_v29 = vld [vmem:[%s9543_s0 + $0x1f0] sm:$0xf0] }
 0x30c   : > { %v8781_v39 = vld [vmem:[%s9543_s0 + $0xcec] sm:$0xf0]  ;;  %v8553_v37 = vld [vmem:[%s9543_s0 + $0x5d4] sm:$0xf] }
 0x30d   : > { %v7899_v41 = vld [vmem:[%s9543_s0 + $0xed0] sm:$0xf]  ;;  %v7644_v46 = vor.u32 %v8781_v39, %v7643_v38  ;;  %4550 = vmatpush.bf16.msrb.mxu1 %v7388_v45  ;;  %v6749_v38 = vld [vmem:[%s9543_s0 + $0x5f0] sm:$0xf0]  ;;  %v6240_v45 = vor.u32 %v8425_v27, %v6237_v29  ;;  %v10339_v29 = vpop.f32.mrf.mxu1 }
 0x30e   : > { %v8845_v42 = vld [vmem:[%s9543_s0 + $0xeec] sm:$0xf0]  ;;  %v6109_v26 = vld [vmem:[%s9543_s0 + $0xf0] sm:$0xf0] }
 0x30f   : > { %v7099_v47 = vld [vmem:[%s9543_s0 + $0x890] sm:$0xf]  ;;  %v7900_v17 = vor.u32 %v8845_v42, %v7899_v41  ;;  %4563 = vmatpush.bf16.msrb.mxu2 %v7644_v46  ;;  %v8617_v42 = vld [vmem:[%s9543_s0 + $0x7d4] sm:$0xf]  ;;  %v6496_v46 = vor.u32 %v8489_v7, %v6493_v35 }
 0x310   : > { %v8645_v36 = vld [vmem:[%s9543_s0 + $0x8ac] sm:$0xf0]  ;;  %v8457_v27 = vld [vmem:[%s9543_s0 + $0x2d4] sm:$0xf] }
 0x311   : > { %v7355_v48 = vld [vmem:[%s9543_s0 + $0xa90] sm:$0xf]  ;;  %v7100_v56 = vor.u32 %v8645_v36, %v7099_v47  ;;  %4576 = vmatpush.bf16.msrb.mxu3 %v7900_v17  ;;  %v6752_v47 = vor.u32 %v8553_v37, %v6749_v38  ;;  %v8417_v36 = vld [vmem:[%s9543_s0 + $0x194] sm:$0xf]  ;;  %v7008_v17 = vor.u32 %v8617_v42, %v7005_v43 }
 0x312   : > { %v8709_v50 = vld [vmem:[%s9543_s0 + $0xaac] sm:$0xf0]  ;;  %v8521_v35 = vld [vmem:[%s9543_s0 + $0x4d4] sm:$0xf] }
 0x313   : > { %v7611_v51 = vld [vmem:[%s9543_s0 + $0xc90] sm:$0xf]  ;;  %v7356_v60 = vor.u32 %v8709_v50, %v7355_v48  ;;  %4538 = vmatpush.bf16.msrb.mxu0 %v7100_v56  ;;  %v6205_v48 = vld [vmem:[%s9543_s0 + $0x1b0] sm:$0xf0] }
 0x314   : > { %v8773_v53 = vld [vmem:[%s9543_s0 + $0xcac] sm:$0xf0]  ;;  %v6461_v50 = vld [vmem:[%s9543_s0 + $0x3b0] sm:$0xf0] }
 0x315   : > { %v7867_v6 = vld [vmem:[%s9543_s0 + $0xe90] sm:$0xf]  ;;  %v7612_v62 = vor.u32 %v8773_v53, %v7611_v51  ;;  %4551 = vmatpush.bf16.msrb.mxu1 %v7356_v60  ;;  %v8545_v51 = vld [vmem:[%s9543_s0 + $0x594] sm:$0xf] }
 0x316   : > { %v8837_v5 = vld [vmem:[%s9543_s0 + $0xeac] sm:$0xf0]  ;;  %v6717_v53 = vld [vmem:[%s9543_s0 + $0x5b0] sm:$0xf0] }
 0x317   : > { %v7067_v33 = vld [vmem:[%s9543_s0 + $0x850] sm:$0xf]  ;;  %v7868_v15 = vor.u32 %v8837_v5, %v7867_v6  ;;  %4564 = vmatpush.bf16.msrb.mxu2 %v7612_v62  ;;  %v6208_v6 = vor.u32 %v8417_v36, %v6205_v48  ;;  %v6464_v5 = vor.u32 %v8481_v49, %v6461_v50  ;;  %v6720_v56 = vor.u32 %v8545_v51, %v6717_v53  ;;  %v6173_v60 = vld [vmem:[%s9543_s0 + $0x170] sm:$0xf0]  ;;  %v10354_v50 = vpop.f32.mrf.mxu3 }
 0x318   : > { %v8637_v63 = vld [vmem:[%s9543_s0 + $0x86c] sm:$0xf0]  ;;  %v8473_v62 = vld [vmem:[%s9543_s0 + $0x354] sm:$0xf] }
 0x319   : > { %v7323_v0 = vld [vmem:[%s9543_s0 + $0xa50] sm:$0xf]  ;;  %v7068_v9 = vor.u32 %v8637_v63, %v7067_v33  ;;  %4577 = vmatpush.bf16.msrb.mxu3 %v7868_v15  ;;  %v6976_v33 = vor.u32 %v8609_v54, %v6973_v55  ;;  %v6429_v63 = vld [vmem:[%s9543_s0 + $0x370] sm:$0xf0] }
 0x31a   : > { %v8701_v2 = vld [vmem:[%s9543_s0 + $0xa6c] sm:$0xf0]  ;;  %v8601_v15 = vld [vmem:[%s9543_s0 + $0x754] sm:$0xf] }
 0x31b   : > { %v7579_v3 = vld [vmem:[%s9543_s0 + $0xc50] sm:$0xf]  ;;  %v7324_v18 = vor.u32 %v8701_v2, %v7323_v0  ;;  %4539 = vmatpush.bf16.msrb.mxu0 %v7068_v9  ;;  %v8537_v0 = vld [vmem:[%s9543_s0 + $0x554] sm:$0xf] }
 0x31c   : > { %v8765_v4 = vld [vmem:[%s9543_s0 + $0xc6c] sm:$0xf0]  ;;  %v6941_v2 = vld [vmem:[%s9543_s0 + $0x770] sm:$0xf0] }
 0x31d   : > { %v7835_v13 = vld [vmem:[%s9543_s0 + $0xe50] sm:$0xf]  ;;  %v7580_v40 = vor.u32 %v8765_v4, %v7579_v3  ;;  %4552 = vmatpush.bf16.msrb.mxu1 %v7324_v18  ;;  %v6176_v3 = vor.u32 %v8409_v58, %v6173_v60  ;;  %v6432_v4 = vor.u32 %v8473_v62, %v6429_v63  ;;  %v6141_v9 = vld [vmem:[%s9543_s0 + $0x130] sm:$0xf0]  ;;  %v4349_v62 = vpop.f32.mrf.mxu1 }
 0x31e   : > { %v8829_v8 = vld [vmem:[%s9543_s0 + $0xe6c] sm:$0xf0]  ;;  %v6397_v18 = vld [vmem:[%s9543_s0 + $0x330] sm:$0xf0] }
 0x31f   : > { %v7035_v10 = vld [vmem:[%s9543_s0 + $0x810] sm:$0xf]  ;;  %v7836_v22 = vor.u32 %v8829_v8, %v7835_v13  ;;  %4565 = vmatpush.bf16.msrb.mxu2 %v7580_v40  ;;  %v6688_v13 = vor.u32 %v8537_v0, %v6685_v1  ;;  %v8401_v8 = vld [vmem:[%s9543_s0 + $0x114] sm:$0xf] }
 0x320   : > { %v8629_v16 = vld [vmem:[%s9543_s0 + $0x82c] sm:$0xf0]  ;;  %v8529_v40 = vld [vmem:[%s9543_s0 + $0x514] sm:$0xf]  ;;  %v6144_v21 = vor.u32 %v8401_v8, %v6141_v9 }
 0x321   : > { %v7291_v52 = vld [vmem:[%s9543_s0 + $0xa10] sm:$0xf]  ;;  %v7036_v30 = vor.u32 %v8629_v16, %v7035_v10  ;;  %4578 = vmatpush.bf16.msrb.mxu3 %v7836_v22  ;;  %v8465_v10 = vld [vmem:[%s9543_s0 + $0x314] sm:$0xf]  ;;  %v6944_v16 = vor.u32 %v8601_v15, %v6941_v2  ;;  %v10334_v22 = vpop.f32.mrf.mxu0 }
 0x322   : > { %v8693_v19 = vld [vmem:[%s9543_s0 + $0xa2c] sm:$0xf0]  ;;  %v6621_v37 = vld [vmem:[%s9543_s0 + $0x4f0] sm:$0xf0] }
 0x323   : > { %v7547_v20 = vld [vmem:[%s9543_s0 + $0xc10] sm:$0xf]  ;;  %v7292_v39 = vor.u32 %v8693_v19, %v7291_v52  ;;  %4540 = vmatpush.bf16.msrb.mxu0 %v7036_v30  ;;  %v6653_v52 = vld [vmem:[%s9543_s0 + $0x530] sm:$0xf0]  ;;  %v6624_v43 = vor.u32 %v8521_v35, %v6621_v37 }
 0x324   : > { %v8757_v23 = vld [vmem:[%s9543_s0 + $0xc2c] sm:$0xf0]  ;;  %v8593_v19 = vld [vmem:[%s9543_s0 + $0x714] sm:$0xf] }
 0x325   : > { %v7803_v24 = vld [vmem:[%s9543_s0 + $0xe10] sm:$0xf]  ;;  %v7548_v41 = vor.u32 %v8757_v23, %v7547_v20  ;;  %4553 = vmatpush.bf16.msrb.mxu1 %v7292_v39  ;;  %v6909_v20 = vld [vmem:[%s9543_s0 + $0x730] sm:$0xf0]  ;;  %v6400_v23 = vor.u32 %v8465_v10, %v6397_v18 }
 0x326   : > { %v8821_v25 = vld [vmem:[%s9543_s0 + $0xe2c] sm:$0xf0]  ;;  %4541 = vmatmul.bf16.vlgmr.msrb.gmra.mxu0 %v9725_v31  ;;  %v6912_v7 = vor.u32 %v8593_v19, %v6909_v20  ;;  %v6365_v30 = vld [vmem:[%s9543_s0 + $0x2f0] sm:$0xf0] }
 0x327   : > { %v7804_v44 = vor.u32 %v8821_v25, %v7803_v24  ;;  %4566 = vmatpush.bf16.msrb.mxu2 %v7548_v41  ;;  %4585 = vmatpush.bf16.msra.mxu0 %v6240_v45  ;;  %v6656_v24 = vor.u32 %v8529_v40, %v6653_v52  ;;  %v8393_v25 = vld [vmem:[%s9543_s0 + $0xd4] sm:$0xf]  ;;  %v6368_v42 = vor.u32 %v8457_v27, %v6365_v30 }
 0x328   : > { %4554 = vmatmul.bf16.vlgmr.msrb.gmra.mxu1 %v9729_v34  ;;  %v8585_v38 = vld [vmem:[%s9543_s0 + $0x6d4] sm:$0xf]  ;;  %v6112_v41 = vor.u32 %v8393_v25, %v6109_v26 }
 0x329   : > { %4579 = vmatpush.bf16.msrb.mxu3 %v7804_v44  ;;  %4598 = vmatpush.bf16.msra.mxu1 %v6496_v46  ;;  %v6877_v39 = vld [vmem:[%s9543_s0 + $0x6f0] sm:$0xf0]  ;;  %v4336_v55 = vpop.f32.mrf.mxu0 }
 0x32a   : > { %4567 = vmatmul.bf16.vlgmr.msrb.gmra.mxu2 %v9721_v28  ;;  %v8385_v44 = vld [vmem:[%s9543_s0 + $0x94] sm:$0xf]  ;;  %v6880_v36 = vor.u32 %v8585_v38, %v6877_v39 }
 0x32b   : > { %4611 = vmatpush.bf16.msra.mxu2 %v6752_v47  ;;  %4586 = vmatpush.bf16.msra.mxu0 %v6208_v6  ;;  %v6077_v45 = vld [vmem:[%s9543_s0 + $0xb0] sm:$0xf0]  ;;  %v10349_v47 = vpop.f32.mrf.mxu2 }
 0x32c   : > { %4580 = vmatmul.bf16.vlgmr.msrb.gmra.mxu3 %v9727_v32  ;;  %v8449_v46 = vld [vmem:[%s9543_s0 + $0x294] sm:$0xf]  ;;  %v6080_v54 = vor.u32 %v8385_v44, %v6077_v45 }
 0x32d   : > { %4624 = vmatpush.bf16.msra.mxu3 %v7008_v17  ;;  %4599 = vmatpush.bf16.msra.mxu1 %v6464_v5  ;;  %v6333_v48 = vld [vmem:[%s9543_s0 + $0x2b0] sm:$0xf0] }
 0x32e   : > { %v8513_v49 = vld [vmem:[%s9543_s0 + $0x494] sm:$0xf]  ;;  %v6336_v6 = vor.u32 %v8449_v46, %v6333_v48 }
 0x32f   : > { %4612 = vmatpush.bf16.msra.mxu2 %v6720_v56  ;;  %4587 = vmatpush.bf16.msra.mxu0 %v6176_v3  ;;  %v6589_v17 = vld [vmem:[%s9543_s0 + $0x4b0] sm:$0xf0] }
 0x330   : > { %v8577_v51 = vld [vmem:[%s9543_s0 + $0x694] sm:$0xf]  ;;  %v6592_v5 = vor.u32 %v8513_v49, %v6589_v17 }
 0x331   : > { %4625 = vmatpush.bf16.msra.mxu3 %v6976_v33  ;;  %4600 = vmatpush.bf16.msra.mxu1 %v6432_v4  ;;  %v6845_v53 = vld [vmem:[%s9543_s0 + $0x6b0] sm:$0xf0] }
 0x332   : > { %v8377_v56 = vld [vmem:[%s9543_s0 + $0x54] sm:$0xf]  ;;  %v6848_v33 = vor.u32 %v8577_v51, %v6845_v53 }
 0x333   : > { %4613 = vmatpush.bf16.msra.mxu2 %v6688_v13  ;;  %4588 = vmatpush.bf16.msra.mxu0 %v6144_v21  ;;  %v6045_v58 = vld [vmem:[%s9543_s0 + $0x70] sm:$0xf0]  ;;  %v4362_v40 = vpop.f32.mrf.mxu2 }
 0x334   : > { %v8441_v60 = vld [vmem:[%s9543_s0 + $0x254] sm:$0xf]  ;;  %v6048_v3 = vor.u32 %v8377_v56, %v6045_v58 }
 0x335   : > { %4626 = vmatpush.bf16.msra.mxu3 %v6944_v16  ;;  %4601 = vmatpush.bf16.msra.mxu1 %v6400_v23  ;;  %v6301_v63 = vld [vmem:[%s9543_s0 + $0x270] sm:$0xf0]  ;;  %v4375_v23 = vpop.f32.mrf.mxu3 }
 0x336   : > { %v8505_v0 = vld [vmem:[%s9543_s0 + $0x454] sm:$0xf]  ;;  %v6304_v8 = vor.u32 %v8441_v60, %v6301_v63  ;;  %v10410_v23 = vpop.f32.mrf.mxu0 }
 0x337   : > { %4614 = vmatpush.bf16.msra.mxu2 %v6656_v24  ;;  %4589 = vmatpush.bf16.msra.mxu0 %v6112_v41  ;;  %v6557_v1 = vld [vmem:[%s9543_s0 + $0x470] sm:$0xf0] }
 0x338   : > { %v8569_v15 = vld [vmem:[%s9543_s0 + $0x654] sm:$0xf]  ;;  %v6560_v9 = vor.u32 %v8505_v0, %v6557_v1 }
 0x339   : > { %4627 = vmatpush.bf16.msra.mxu3 %v6912_v7  ;;  %4602 = vmatpush.bf16.msra.mxu1 %v6368_v42  ;;  %v6813_v2 = vld [vmem:[%s9543_s0 + $0x670] sm:$0xf0] }
 0x33a   : > { %v8369_v4 = vld [vmem:[%s9543_s0 + $0x14] sm:$0xf]  ;;  %v6816_v52 = vor.u32 %v8569_v15, %v6813_v2 }
 0x33b   : > { %4615 = vmatpush.bf16.msra.mxu2 %v6624_v43  ;;  %4590 = vmatpush.bf16.msra.mxu0 %v6080_v54  ;;  %v6013_v13 = vld [vmem:[%s9543_s0 + $0x30] sm:$0xf0] }
 0x33c   : > { %v8433_v10 = vld [vmem:[%s9543_s0 + $0x214] sm:$0xf]  ;;  %v6016_v27 = vor.u32 %v8369_v4, %v6013_v13 }
 0x33d   : > { %4628 = vmatpush.bf16.msra.mxu3 %v6880_v36  ;;  %4603 = vmatpush.bf16.msra.mxu1 %v6336_v6  ;;  %v6269_v16 = vld [vmem:[%s9543_s0 + $0x230] sm:$0xf0] }
 0x33e   : > { %v8497_v18 = vld [vmem:[%s9543_s0 + $0x414] sm:$0xf]  ;;  %v6272_v37 = vor.u32 %v8433_v10, %v6269_v16 }
 0x33f   : > { %4616 = vmatpush.bf16.msra.mxu2 %v6592_v5  ;;  %v6525_v19 = vld [vmem:[%s9543_s0 + $0x430] sm:$0xf0]  ;;  %4591 = vmatpush.bf16.msra.mxu0 %v6048_v3 }
 0x340   : > { %v8561_v20 = vld [vmem:[%s9543_s0 + $0x614] sm:$0xf]  ;;  %v6528_v38 = vor.u32 %v8497_v18, %v6525_v19 }
 0x341   : > { %4629 = vmatpush.bf16.msra.mxu3 %v6848_v33  ;;  %v6781_v21 = vld [vmem:[%s9543_s0 + $0x630] sm:$0xf0]  ;;  %4604 = vmatpush.bf16.msra.mxu1 %v6304_v8 }
 0x342   : > { %v8681_v24 = vld [vmem:[%s9543_s0 + $0x9d4] sm:$0xf]  ;;  %v6784_v42 = vor.u32 %v8561_v20, %v6781_v21 }
 0x343   : > { %v7261_v25 = vld [vmem:[%s9543_s0 + $0x9f0] sm:$0xf0]  ;;  %4617 = vmatpush.bf16.msra.mxu2 %v6560_v9  ;;  %4592 = vmatpush.bf16.msra.mxu0 %v6016_v27 }
 0x344   : > { %v8745_v26 = vld [vmem:[%s9543_s0 + $0xbd4] sm:$0xf]  ;;  %v7264_v43 = vor.u32 %v8681_v24, %v7261_v25 }
 0x345   : > { %v7517_v7 = vld [vmem:[%s9543_s0 + $0xbf0] sm:$0xf0]  ;;  %4630 = vmatpush.bf16.msra.mxu3 %v6816_v52  ;;  %4605 = vmatpush.bf16.msra.mxu1 %v6272_v37 }
 0x346   : > { %v8809_v30 = vld [vmem:[%s9543_s0 + $0xdd4] sm:$0xf]  ;;  %v7520_v44 = vor.u32 %v8745_v26, %v7517_v7  ;;  %4593 = vmatmul.bf16.vlgmr.msra.gmra.mxu0 %v9668_v11 }
 0x347   : > { %v7773_v35 = vld [vmem:[%s9543_s0 + $0xdf0] sm:$0xf0]  ;;  %4618 = vmatpush.bf16.msra.mxu2 %v6528_v38  ;;  %4637 = vmatpush.bf16.msrb.mxu0 %v7264_v43 }
 0x348   : > { %v8873_v39 = vld [vmem:[%s9543_s0 + $0xfd4] sm:$0xf]  ;;  %v7776_v45 = vor.u32 %v8809_v30, %v7773_v35  ;;  %4606 = vmatmul.bf16.vlgmr.msra.gmra.mxu1 %v9671_v12  ;;  %v10415_v30 = vpop.f32.mrf.mxu1 }
 0x349   : > { %v8029_v41 = vld [vmem:[%s9543_s0 + $0xff0] sm:$0xf0]  ;;  %4631 = vmatpush.bf16.msra.mxu3 %v6784_v42  ;;  %4650 = vmatpush.bf16.msrb.mxu1 %v7520_v44 }
 0x34a   : > { %v8673_v46 = vld [vmem:[%s9543_s0 + $0x994] sm:$0xf]  ;;  %v8032_v49 = vor.u32 %v8873_v39, %v8029_v41  ;;  %4619 = vmatmul.bf16.vlgmr.msra.gmra.mxu2 %v9655_v59 }
 0x34b   : > { %v7229_v36 = vld [vmem:[%s9543_s0 + $0x9b0] sm:$0xf0]  ;;  %4663 = vmatpush.bf16.msrb.mxu2 %v7776_v45 }
 0x34c   : > { %v8737_v48 = vld [vmem:[%s9543_s0 + $0xb94] sm:$0xf]  ;;  %v7232_v6 = vor.u32 %v8673_v46, %v7229_v36  ;;  %4632 = vmatmul.bf16.vlgmr.msra.gmra.mxu3 %v9657_v61 }
 0x34d   : > { %v7485_v17 = vld [vmem:[%s9543_s0 + $0xbb0] sm:$0xf0]  ;;  %4676 = vmatpush.bf16.msrb.mxu3 %v8032_v49  ;;  %v10425_v49 = vpop.f32.mrf.mxu2 }
 0x34e   : > { %v8801_v51 = vld [vmem:[%s9543_s0 + $0xd94] sm:$0xf]  ;;  %v7488_v5 = vor.u32 %v8737_v48, %v7485_v17  ;;  %4638 = vmatpush.bf16.msrb.mxu0 %v7232_v6 }
 0x34f   : > { %v7741_v53 = vld [vmem:[%s9543_s0 + $0xdb0] sm:$0xf0] }
 0x350   : > { %v8865_v54 = vld [vmem:[%s9543_s0 + $0xf94] sm:$0xf]  ;;  %v7744_v56 = vor.u32 %v8801_v51, %v7741_v53  ;;  %4651 = vmatpush.bf16.msrb.mxu1 %v7488_v5 }
 0x351   : > { %v7997_v55 = vld [vmem:[%s9543_s0 + $0xfb0] sm:$0xf0] }
 0x352   : > { %v8665_v58 = vld [vmem:[%s9543_s0 + $0x954] sm:$0xf]  ;;  %v8000_v33 = vor.u32 %v8865_v54, %v7997_v55  ;;  %4664 = vmatpush.bf16.msrb.mxu2 %v7744_v56  ;;  %v10430_v55 = vpop.f32.mrf.mxu3 }
 0x353   : > { %v7197_v60 = vld [vmem:[%s9543_s0 + $0x970] sm:$0xf0] }
 0x354   : > { %v8729_v62 = vld [vmem:[%s9543_s0 + $0xb54] sm:$0xf]  ;;  %v7200_v3 = vor.u32 %v8665_v58, %v7197_v60  ;;  %4677 = vmatpush.bf16.msrb.mxu3 %v8000_v33  ;;  %v4388_v58 = vpop.f32.mrf.mxu0 }
 0x355   : > { %v7453_v63 = vld [vmem:[%s9543_s0 + $0xb70] sm:$0xf0] }
 0x356   : > { %v8793_v0 = vld [vmem:[%s9543_s0 + $0xd54] sm:$0xf]  ;;  %v7456_v4 = vor.u32 %v8729_v62, %v7453_v63  ;;  %4639 = vmatpush.bf16.msrb.mxu0 %v7200_v3 }
 0x357   : > { %v7709_v1 = vld [vmem:[%s9543_s0 + $0xd70] sm:$0xf0] }
 0x358   : > { %v8857_v15 = vld [vmem:[%s9543_s0 + $0xf54] sm:$0xf]  ;;  %v7712_v13 = vor.u32 %v8793_v0, %v7709_v1  ;;  %4652 = vmatpush.bf16.msrb.mxu1 %v7456_v4  ;;  %v4401_v1 = vpop.f32.mrf.mxu1 }
 0x359   : > { %v7965_v2 = vld [vmem:[%s9543_s0 + $0xf70] sm:$0xf0] }
 0x35a   : > { %v8657_v8 = vld [vmem:[%s9543_s0 + $0x914] sm:$0xf]  ;;  %v7968_v16 = vor.u32 %v8857_v15, %v7965_v2  ;;  %4665 = vmatpush.bf16.msrb.mxu2 %v7712_v13 }
 0x35b   : > { %v7165_v9 = vld [vmem:[%s9543_s0 + $0x930] sm:$0xf0] }
 0x35c   : > { %v8721_v10 = vld [vmem:[%s9543_s0 + $0xb14] sm:$0xf]  ;;  %v7168_v21 = vor.u32 %v8657_v8, %v7165_v9  ;;  %4678 = vmatpush.bf16.msrb.mxu3 %v7968_v16  ;;  %v1464_v9 = vperm.slane %v10256_v14, 3  ;;  %v4414_v14 = vpop.f32.mrf.mxu2 }
 0x35d   : > { %v7421_v18 = vld [vmem:[%s9543_s0 + $0xb30] sm:$0xf0]  ;;  %v6403_v14 = vld [vmem:[%s9543_s0 + $0x318] sm:$0xf] }
 0x35e   : > { %v8785_v40 = vld [vmem:[%s9543_s0 + $0xd14] sm:$0xf]  ;;  %v7424_v24 = vor.u32 %v8721_v10, %v7421_v18  ;;  %4640 = vmatpush.bf16.msrb.mxu0 %v7168_v21 }
 0x35f   : > { %v7677_v52 = vld [vmem:[%s9543_s0 + $0xd30] sm:$0xf0] }
 0x360   : > { %v8849_v19 = vld [vmem:[%s9543_s0 + $0xf14] sm:$0xf]  ;;  %v7680_v25 = vor.u32 %v8785_v40, %v7677_v52  ;;  %4653 = vmatpush.bf16.msrb.mxu1 %v7424_v24 }
 0x361   : > { %v7933_v20 = vld [vmem:[%s9543_s0 + $0xf30] sm:$0xf0] }
 0x362   : > { %v8649_v26 = vld [vmem:[%s9543_s0 + $0x8d4] sm:$0xf]  ;;  %v7936_v35 = vor.u32 %v8849_v19, %v7933_v20  ;;  %4666 = vmatpush.bf16.msrb.mxu2 %v7680_v25 }
 0x363   : > { %v7133_v27 = vld [vmem:[%s9543_s0 + $0x8f0] sm:$0xf0] }
 0x364   : > { %v8713_v7 = vld [vmem:[%s9543_s0 + $0xad4] sm:$0xf]  ;;  %v7136_v43 = vor.u32 %v8649_v26, %v7133_v27  ;;  %4679 = vmatpush.bf16.msrb.mxu3 %v7936_v35  ;;  %v4387_v35 = vadd.f32 %v10410_v23, %v1464_v9  ;;  %v8622_v23 = vld [vmem:[%s9543_s0 + $0x7f4] sm:$0xf0] }
 0x365   : > { %v7389_v37 = vld [vmem:[%s9543_s0 + $0xaf0] sm:$0xf0]  ;;  %v6691_v9 = vld [vmem:[%s9543_s0 + $0x558] sm:$0xf] }
 0x366   : > { %v8777_v38 = vld [vmem:[%s9543_s0 + $0xcd4] sm:$0xf]  ;;  %v7392_v44 = vor.u32 %v8713_v7, %v7389_v37  ;;  %4641 = vmatpush.bf16.msrb.mxu0 %v7136_v43  ;;  %v4427_v7 = vpop.f32.mrf.mxu3  ;;  %v6243_v37 = vld [vmem:[%s9543_s0 + $0x1d8] sm:$0xf] }
 0x367   : > { %v7645_v39 = vld [vmem:[%s9543_s0 + $0xcf0] sm:$0xf0]  ;;  %v6755_v43 = vld [vmem:[%s9543_s0 + $0x5d8] sm:$0xf] }
 0x368   : > { %v8841_v41 = vld [vmem:[%s9543_s0 + $0xed4] sm:$0xf]  ;;  %v7648_v45 = vor.u32 %v8777_v38, %v7645_v39  ;;  %4654 = vmatpush.bf16.msrb.mxu1 %v7392_v44  ;;  %v8430_v38 = vld [vmem:[%s9543_s0 + $0x1f4] sm:$0xf0] }
 0x369   : > { %v7901_v42 = vld [vmem:[%s9543_s0 + $0xef0] sm:$0xf0]  ;;  %v6499_v39 = vld [vmem:[%s9543_s0 + $0x3d8] sm:$0xf] }
 0x36a   : > { %v8641_v46 = vld [vmem:[%s9543_s0 + $0x894] sm:$0xf]  ;;  %v7904_v17 = vor.u32 %v8841_v41, %v7901_v42  ;;  %4667 = vmatpush.bf16.msrb.mxu2 %v7648_v45  ;;  %v8494_v42 = vld [vmem:[%s9543_s0 + $0x3f4] sm:$0xf0] }
 0x36b   : > { %v7101_v36 = vld [vmem:[%s9543_s0 + $0x8b0] sm:$0xf0]  ;;  %v8558_v44 = vld [vmem:[%s9543_s0 + $0x5f4] sm:$0xf0] }
 0x36c   : > { %v8705_v48 = vld [vmem:[%s9543_s0 + $0xa94] sm:$0xf]  ;;  %v7104_v56 = vor.u32 %v8641_v46, %v7101_v36  ;;  %4680 = vmatpush.bf16.msrb.mxu3 %v7904_v17  ;;  %v7011_v36 = vld [vmem:[%s9543_s0 + $0x7d8] sm:$0xf]  ;;  %v6244_v17 = vor.u32 %v8430_v38, %v6243_v37  ;;  %v4438_v38 = vpop.f32.mrf.mxu0 }
 0x36d   : > { %v7357_v51 = vld [vmem:[%s9543_s0 + $0xab0] sm:$0xf0]  ;;  %v7012_v58 = vor.u32 %v8622_v23, %v7011_v36  ;;  %v8462_v36 = vld [vmem:[%s9543_s0 + $0x2f4] sm:$0xf0] }
 0x36e   : > { %v8769_v53 = vld [vmem:[%s9543_s0 + $0xc94] sm:$0xf]  ;;  %v7360_v60 = vor.u32 %v8705_v48, %v7357_v51  ;;  %4642 = vmatpush.bf16.msrb.mxu0 %v7104_v56  ;;  %v4400_v51 = vadd.f32 %v10415_v30, %v4387_v35  ;;  %v6467_v56 = vld [vmem:[%s9543_s0 + $0x398] sm:$0xf] }
 0x36f   : > { %v7613_v54 = vld [vmem:[%s9543_s0 + $0xcb0] sm:$0xf0]  ;;  %v8614_v30 = vld [vmem:[%s9543_s0 + $0x7b4] sm:$0xf0] }
 0x370   : > { %v8833_v6 = vld [vmem:[%s9543_s0 + $0xe94] sm:$0xf]  ;;  %v7616_v62 = vor.u32 %v8769_v53, %v7613_v54  ;;  %4655 = vmatpush.bf16.msrb.mxu1 %v7360_v60  ;;  %v6500_v53 = vor.u32 %v8494_v42, %v6499_v39  ;;  %v6756_v54 = vor.u32 %v8558_v44, %v6755_v43  ;;  %v8486_v60 = vld [vmem:[%s9543_s0 + $0x3b4] sm:$0xf0]  ;;  %v4451_v43 = vpop.f32.mrf.mxu1 }
 0x371   : > { %v7869_v5 = vld [vmem:[%s9543_s0 + $0xeb0] sm:$0xf0]  ;;  %v6915_v35 = vld [vmem:[%s9543_s0 + $0x718] sm:$0xf] }
 0x372   : > { %v8633_v33 = vld [vmem:[%s9543_s0 + $0x854] sm:$0xf]  ;;  %v7872_v15 = vor.u32 %v8833_v6, %v7869_v5  ;;  %4668 = vmatpush.bf16.msrb.mxu2 %v7616_v62  ;;  %v6211_v6 = vld [vmem:[%s9543_s0 + $0x198] sm:$0xf] }
 0x373   : > { %v7069_v63 = vld [vmem:[%s9543_s0 + $0x870] sm:$0xf0]  ;;  %v8422_v5 = vld [vmem:[%s9543_s0 + $0x1b4] sm:$0xf0] }
 0x374   : > { %v8697_v0 = vld [vmem:[%s9543_s0 + $0xa54] sm:$0xf]  ;;  %v7072_v10 = vor.u32 %v8633_v33, %v7069_v63  ;;  %4681 = vmatpush.bf16.msrb.mxu3 %v7872_v15  ;;  %v6723_v62 = vld [vmem:[%s9543_s0 + $0x598] sm:$0xf]  ;;  %v4335_v63 = vadd.f32 %v10334_v22, %v10280_v57  ;;  %v6212_v1 = vor.u32 %v8422_v5, %v6211_v6  ;;  %v4413_v15 = vadd.f32 %v10425_v49, %v4400_v51 }
 0x375   : > { %v7325_v2 = vld [vmem:[%s9543_s0 + $0xa70] sm:$0xf0]  ;;  %v8550_v33 = vld [vmem:[%s9543_s0 + $0x5b4] sm:$0xf0] }
 0x376   : > { %v8761_v3 = vld [vmem:[%s9543_s0 + $0xc54] sm:$0xf]  ;;  %v7328_v40 = vor.u32 %v8697_v0, %v7325_v2  ;;  %4643 = vmatpush.bf16.msrb.mxu0 %v7072_v10  ;;  %v6979_v0 = vld [vmem:[%s9543_s0 + $0x798] sm:$0xf]  ;;  %v6468_v2 = vor.u32 %v8486_v60, %v6467_v56 }
 0x377   : > { %v7581_v4 = vld [vmem:[%s9543_s0 + $0xc70] sm:$0xf0]  ;;  %v8414_v57 = vld [vmem:[%s9543_s0 + $0x174] sm:$0xf0] }
 0x378   : > { %v8825_v13 = vld [vmem:[%s9543_s0 + $0xe54] sm:$0xf]  ;;  %v7584_v52 = vor.u32 %v8761_v3, %v7581_v4  ;;  %4656 = vmatpush.bf16.msrb.mxu1 %v7328_v40  ;;  %v6724_v3 = vor.u32 %v8550_v33, %v6723_v62  ;;  %v6179_v4 = vld [vmem:[%s9543_s0 + $0x158] sm:$0xf] }
 0x379   : > { %v7837_v8 = vld [vmem:[%s9543_s0 + $0xe70] sm:$0xf0]  ;;  %v6435_v22 = vld [vmem:[%s9543_s0 + $0x358] sm:$0xf]  ;;  %v6180_v40 = vor.u32 %v8414_v57, %v6179_v4 }
 0x37a   : > { %v8625_v16 = vld [vmem:[%s9543_s0 + $0x814] sm:$0xf]  ;;  %v7840_v24 = vor.u32 %v8825_v13, %v7837_v8  ;;  %4669 = vmatpush.bf16.msrb.mxu2 %v7584_v52  ;;  %v6980_v13 = vor.u32 %v8614_v30, %v6979_v0  ;;  %v8478_v8 = vld [vmem:[%s9543_s0 + $0x374] sm:$0xf0]  ;;  %v4426_v52 = vadd.f32 %v10430_v55, %v4413_v15  ;;  %v4477_v0 = vpop.f32.mrf.mxu3 }
 0x37b   : > { %v7037_v18 = vld [vmem:[%s9543_s0 + $0x830] sm:$0xf0]  ;;  %v8542_v10 = vld [vmem:[%s9543_s0 + $0x574] sm:$0xf0] }
 0x37c   : > { %v8689_v19 = vld [vmem:[%s9543_s0 + $0xa14] sm:$0xf]  ;;  %v7040_v41 = vor.u32 %v8625_v16, %v7037_v18  ;;  %4682 = vmatpush.bf16.msrb.mxu3 %v7840_v24  ;;  %v4348_v16 = vadd.f32 %v10339_v29, %v4335_v63  ;;  %v6947_v49 = vld [vmem:[%s9543_s0 + $0x758] sm:$0xf]  ;;  %v6436_v29 = vor.u32 %v8478_v8, %v6435_v22  ;;  %v4439_v42 = vadd.f32 %v4438_v38, %v4426_v52  ;;  %v4453_v52 = vpop.f32.mrf.mxu1 }
 0x37d   : > { %v7293_v20 = vld [vmem:[%s9543_s0 + $0xa30] sm:$0xf0]  ;;  %v8606_v18 = vld [vmem:[%s9543_s0 + $0x774] sm:$0xf0] }
 0x37e   : > { %v8753_v21 = vld [vmem:[%s9543_s0 + $0xc14] sm:$0xf]  ;;  %v7296_v45 = vor.u32 %v8689_v19, %v7293_v20  ;;  %4644 = vmatpush.bf16.msrb.mxu0 %v7040_v41  ;;  %v6692_v19 = vor.u32 %v8542_v10, %v6691_v9  ;;  %v6147_v20 = vld [vmem:[%s9543_s0 + $0x118] sm:$0xf]  ;;  %v6948_v24 = vor.u32 %v8606_v18, %v6947_v49  ;;  %v4361_v7 = vadd.f32 %v10349_v47, %v4348_v16  ;;  %v4440_v9 = vpop.f32.mrf.mxu0 }
 0x37f   : > { %v7549_v25 = vld [vmem:[%s9543_s0 + $0xc30] sm:$0xf0]  ;;  %v8598_v55 = vld [vmem:[%s9543_s0 + $0x734] sm:$0xf0]  ;;  %v4452_v51 = vadd.f32 %v4451_v43, %v4439_v42 }
 0x380   : > { %v8817_v26 = vld [vmem:[%s9543_s0 + $0xe14] sm:$0xf]  ;;  %v7552_v46 = vor.u32 %v8753_v21, %v7549_v25  ;;  %4657 = vmatpush.bf16.msrb.mxu1 %v7296_v45  ;;  %v8406_v21 = vld [vmem:[%s9543_s0 + $0x134] sm:$0xf0]  ;;  %v6916_v47 = vor.u32 %v8598_v55, %v6915_v35 }
 0x381   : > { %v7805_v27 = vld [vmem:[%s9543_s0 + $0xe30] sm:$0xf0]  ;;  %4645 = vmatmul.bf16.vlgmr.msrb.gmra.mxu0 %v9725_v31  ;;  %v8470_v25 = vld [vmem:[%s9543_s0 + $0x334] sm:$0xf0]  ;;  %v6148_v37 = vor.u32 %v8406_v21, %v6147_v20 }
 0x382   : > { %v7808_v48 = vor.u32 %v8817_v26, %v7805_v27  ;;  %4670 = vmatpush.bf16.msrb.mxu2 %v7552_v46  ;;  %4689 = vmatpush.bf16.msra.mxu0 %v6244_v17  ;;  %v6659_v26 = vld [vmem:[%s9543_s0 + $0x518] sm:$0xf]  ;;  %v6404_v39 = vor.u32 %v8470_v25, %v6403_v14  ;;  %v4374_v17 = vadd.f32 %v10354_v50, %v4361_v7 }
 0x383   : > { %4658 = vmatmul.bf16.vlgmr.msrb.gmra.mxu1 %v9729_v34  ;;  %v8534_v27 = vld [vmem:[%s9543_s0 + $0x534] sm:$0xf0] }
 0x384   : > { %4683 = vmatpush.bf16.msrb.mxu3 %v7808_v48  ;;  %4702 = vmatpush.bf16.msra.mxu1 %v6500_v53  ;;  %v6660_v41 = vor.u32 %v8534_v27, %v6659_v26  ;;  %v6115_v44 = vld [vmem:[%s9543_s0 + $0xd8] sm:$0xf]  ;;  %vm4899_vm10 = vcmp.gt.f32.partialorder %v4374_v17, 0.0  ;;  %v4907_v4 = vmul.f32 0.2, %v4374_v17 }
 0x385   : > { %4671 = vmatmul.bf16.vlgmr.msrb.gmra.mxu2 %v9721_v28  ;;  %v8398_v45 = vld [vmem:[%s9543_s0 + $0xf4] sm:$0xf0] }
 0x386   : > { %4715 = vmatpush.bf16.msra.mxu2 %v6756_v54  ;;  %4690 = vmatpush.bf16.msra.mxu0 %v6212_v1  ;;  %v6371_v46 = vld [vmem:[%s9543_s0 + $0x2d8] sm:$0xf]  ;;  %v6116_v6 = vor.u32 %v8398_v45, %v6115_v44 }
 0x387   : > { %4684 = vmatmul.bf16.vlgmr.msrb.gmra.mxu3 %v9727_v32  ;;  %v6627_v23 = vld [vmem:[%s9543_s0 + $0x4d8] sm:$0xf]  ;;  %v6372_v5 = vor.u32 %v8462_v36, %v6371_v46  ;;  %v4479_v36 = vpop.f32.mrf.mxu3 }
 0x388   : > { %4728 = vmatpush.bf16.msra.mxu3 %v7012_v58  ;;  %4703 = vmatpush.bf16.msra.mxu1 %v6468_v2  ;;  %v8526_v48 = vld [vmem:[%s9543_s0 + $0x4f4] sm:$0xf0]  ;;  %v4464_v58 = vpop.f32.mrf.mxu2 }
 0x389   : > { %v6883_v53 = vld [vmem:[%s9543_s0 + $0x6d8] sm:$0xf]  ;;  %v6628_v56 = vor.u32 %v8526_v48, %v6627_v23  ;;  %v4465_v63 = vadd.f32 %v4464_v58, %v4452_v51 }
 0x38a   : > { %4716 = vmatpush.bf16.msra.mxu2 %v6724_v3  ;;  %4691 = vmatpush.bf16.msra.mxu0 %v6180_v40  ;;  %v8590_v54 = vld [vmem:[%s9543_s0 + $0x6f4] sm:$0xf0] }
 0x38b   : > { %v6083_v60 = vld [vmem:[%s9543_s0 + $0x98] sm:$0xf]  ;;  %v6884_v50 = vor.u32 %v8590_v54, %v6883_v53  ;;  %v4478_v57 = vadd.f32 %v4477_v0, %v4465_v63 }
 0x38c   : > { %4729 = vmatpush.bf16.msra.mxu3 %v6980_v13  ;;  %4704 = vmatpush.bf16.msra.mxu1 %v6436_v29  ;;  %v8390_v62 = vld [vmem:[%s9543_s0 + $0xb4] sm:$0xf0] }
 0x38d   : > { %v6339_v33 = vld [vmem:[%s9543_s0 + $0x298] sm:$0xf]  ;;  %v6084_v22 = vor.u32 %v8390_v62, %v6083_v60  ;;  %vm4900_vm11 = vcmp.gt.f32.partialorder %v4478_v57, 0.0  ;;  %v4908_v29 = vmul.f32 0.2, %v4478_v57 }
 0x38e   : > { %4717 = vmatpush.bf16.msra.mxu2 %v6692_v19  ;;  %4692 = vmatpush.bf16.msra.mxu0 %v6148_v37  ;;  %v8454_v30 = vld [vmem:[%s9543_s0 + $0x2b4] sm:$0xf0] }
 0x38f   : > { %v6595_v1 = vld [vmem:[%s9543_s0 + $0x498] sm:$0xf]  ;;  %v6340_v10 = vor.u32 %v8454_v30, %v6339_v33  ;;  %v4916_v25 = vsel %vm4900_vm11, %v4478_v57, %v4908_v29 }
 0x390   : > { %4730 = vmatpush.bf16.msra.mxu3 %v6948_v24  ;;  %4705 = vmatpush.bf16.msra.mxu1 %v6404_v39  ;;  %v8518_v15 = vld [vmem:[%s9543_s0 + $0x4b4] sm:$0xf0]  ;;  %v4915_v24 = vsel %vm4899_vm10, %v4374_v17, %v4907_v4  ;;  %v4466_v43 = vpop.f32.mrf.mxu2 }
 0x391   : > { %v6851_v2 = vld [vmem:[%s9543_s0 + $0x698] sm:$0xf]  ;;  %v6596_v16 = vor.u32 %v8518_v15, %v6595_v1  ;;  %v4922_v55 = vpack.c.bf16 %v4916_v25, %v4915_v24  ;;  %v4490_v43 = vpop.f32.mrf.mxu0 }
 0x392   : > { %4718 = vmatpush.bf16.msra.mxu2 %v6660_v41  ;;  %v8582_v3 = vld [vmem:[%s9543_s0 + $0x6b4] sm:$0xf0]  ;;  %4693 = vmatpush.bf16.msra.mxu0 %v6116_v6 }
 0x393   : > { %v6051_v13 = vld [vmem:[%s9543_s0 + $0x58] sm:$0xf]  ;;  %v6852_v19 = vor.u32 %v8582_v3, %v6851_v2  ;;  %4926 = vst [vmem:[#allocation2] sm:$0xff] %v4922_v55 }
 0x394   : > { %4731 = vmatpush.bf16.msra.mxu3 %v6916_v47  ;;  %v8382_v8 = vld [vmem:[%s9543_s0 + $0x74] sm:$0xf0]  ;;  %4706 = vmatpush.bf16.msra.mxu1 %v6372_v5 }
 0x395   : > { %v6307_v49 = vld [vmem:[%s9543_s0 + $0x258] sm:$0xf]  ;;  %v6052_v26 = vor.u32 %v8382_v8, %v6051_v13 }
 0x396   : > { %4719 = vmatpush.bf16.msra.mxu2 %v6628_v56  ;;  %v8446_v18 = vld [vmem:[%s9543_s0 + $0x274] sm:$0xf0]  ;;  %4694 = vmatpush.bf16.msra.mxu0 %v6084_v22 }
 0x397   : > { %v6563_v40 = vld [vmem:[%s9543_s0 + $0x458] sm:$0xf]  ;;  %v6308_v37 = vor.u32 %v8446_v18, %v6307_v49 }
 0x398   : > { %4732 = vmatpush.bf16.msra.mxu3 %v6884_v50  ;;  %v8510_v20 = vld [vmem:[%s9543_s0 + $0x474] sm:$0xf0]  ;;  %4707 = vmatpush.bf16.msra.mxu1 %v6340_v10 }
 0x399   : > { %v6819_v21 = vld [vmem:[%s9543_s0 + $0x658] sm:$0xf]  ;;  %v6564_v38 = vor.u32 %v8510_v20, %v6563_v40 }
 0x39a   : > { %v8574_v14 = vld [vmem:[%s9543_s0 + $0x674] sm:$0xf0]  ;;  %4720 = vmatpush.bf16.msra.mxu2 %v6596_v16  ;;  %4695 = vmatpush.bf16.msra.mxu0 %v6052_v26 }
 0x39b   : > { %v6019_v27 = vld [vmem:[%s9543_s0 + $0x18] sm:$0xf]  ;;  %v6820_v44 = vor.u32 %v8574_v14, %v6819_v21 }
 0x39c   : > { %v8374_v7 = vld [vmem:[%s9543_s0 + $0x34] sm:$0xf0]  ;;  %4733 = vmatpush.bf16.msra.mxu3 %v6852_v19  ;;  %4708 = vmatpush.bf16.msra.mxu1 %v6308_v37 }
 0x39d   : > { %v6275_v35 = vld [vmem:[%s9543_s0 + $0x218] sm:$0xf]  ;;  %v6020_v17 = vor.u32 %v8374_v7, %v6019_v27  ;;  %v10561_v27 = vld [vmem:[%s9549_s28] sm:$0xff] }
 0x39e   : > { %v8438_v39 = vld [vmem:[%s9543_s0 + $0x234] sm:$0xf0]  ;;  %4721 = vmatpush.bf16.msra.mxu2 %v6564_v38  ;;  %v1465_v7 = vperm.slane %v10561_v27, 4 }
 0x39f   : > { %v6531_v41 = vld [vmem:[%s9543_s0 + $0x418] sm:$0xf]  ;;  %v6276_v6 = vor.u32 %v8438_v39, %v6275_v35  ;;  %4696 = vmatpush.bf16.msra.mxu0 %v6020_v17 }
 0x3a0   : > { %v8502_v42 = vld [vmem:[%s9543_s0 + $0x434] sm:$0xf0]  ;;  %4734 = vmatpush.bf16.msra.mxu3 %v6820_v44 }
 0x3a1   : > { %v6787_v45 = vld [vmem:[%s9543_s0 + $0x618] sm:$0xf]  ;;  %v6532_v5 = vor.u32 %v8502_v42, %v6531_v41  ;;  %4709 = vmatpush.bf16.msra.mxu1 %v6276_v6 }
 0x3a2   : > { %v8566_v46 = vld [vmem:[%s9543_s0 + $0x634] sm:$0xf0]  ;;  %4697 = vmatmul.bf16.vlgmr.msra.gmra.mxu0 %v9668_v11 }
 0x3a3   : > { %v7267_v47 = vld [vmem:[%s9543_s0 + $0x9d8] sm:$0xf]  ;;  %v6788_v60 = vor.u32 %v8566_v46, %v6787_v45  ;;  %4722 = vmatpush.bf16.msra.mxu2 %v6532_v5 }
 0x3a4   : > { %v8686_v23 = vld [vmem:[%s9543_s0 + $0x9f4] sm:$0xf0]  ;;  %4710 = vmatmul.bf16.vlgmr.msra.gmra.mxu1 %v9671_v12 }
 0x3a5   : > { %v7523_v48 = vld [vmem:[%s9543_s0 + $0xbd8] sm:$0xf]  ;;  %v7268_v62 = vor.u32 %v8686_v23, %v7267_v47  ;;  %4735 = vmatpush.bf16.msra.mxu3 %v6788_v60  ;;  %v4491_v23 = vadd.f32 %v4490_v43, %v1465_v7 }
 0x3a6   : > { %v8750_v51 = vld [vmem:[%s9543_s0 + $0xbf4] sm:$0xf0]  ;;  %4723 = vmatmul.bf16.vlgmr.msra.gmra.mxu2 %v9655_v59 }
 0x3a7   : > { %v7779_v53 = vld [vmem:[%s9543_s0 + $0xdd8] sm:$0xf]  ;;  %v7524_v33 = vor.u32 %v8750_v51, %v7523_v48  ;;  %4741 = vmatpush.bf16.msrb.mxu0 %v7268_v62  ;;  %v4503_v48 = vpop.f32.mrf.mxu1 }
 0x3a8   : > { %v8814_v54 = vld [vmem:[%s9543_s0 + $0xdf4] sm:$0xf0]  ;;  %4736 = vmatmul.bf16.vlgmr.msra.gmra.mxu3 %v9657_v61 }
 0x3a9   : > { %v8035_v56 = vld [vmem:[%s9543_s0 + $0xfd8] sm:$0xf]  ;;  %v7780_v50 = vor.u32 %v8814_v54, %v7779_v53  ;;  %4754 = vmatpush.bf16.msrb.mxu1 %v7524_v33 }
 0x3aa   : > { %v8878_v58 = vld [vmem:[%s9543_s0 + $0xff4] sm:$0xf0] }
 0x3ab   : > { %v7235_v63 = vld [vmem:[%s9543_s0 + $0x998] sm:$0xf]  ;;  %v8036_v1 = vor.u32 %v8878_v58, %v8035_v56  ;;  %4767 = vmatpush.bf16.msrb.mxu2 %v7780_v50  ;;  %v4504_v56 = vadd.f32 %v4503_v48, %v4491_v23  ;;  %v8490_v23 = vld [vmem:[%s9543_s0 + $0x3dc] sm:$0xf] }
 0x3ac   : > { %v8678_v0 = vld [vmem:[%s9543_s0 + $0x9b4] sm:$0xf0] }
 0x3ad   : > { %v7491_v30 = vld [vmem:[%s9543_s0 + $0xb98] sm:$0xf]  ;;  %v7236_v22 = vor.u32 %v8678_v0, %v7235_v63  ;;  %4780 = vmatpush.bf16.msrb.mxu3 %v8036_v1  ;;  %v4516_v0 = vpop.f32.mrf.mxu2 }
 0x3ae   : > { %v8742_v15 = vld [vmem:[%s9543_s0 + $0xbb4] sm:$0xf0] }
 0x3af   : > { %v7747_v2 = vld [vmem:[%s9543_s0 + $0xd98] sm:$0xf]  ;;  %v7492_v13 = vor.u32 %v8742_v15, %v7491_v30  ;;  %4742 = vmatpush.bf16.msrb.mxu0 %v7236_v22 }
 0x3b0   : > { %v8806_v3 = vld [vmem:[%s9543_s0 + $0xdb4] sm:$0xf0] }
 0x3b1   : > { %v8003_v4 = vld [vmem:[%s9543_s0 + $0xf98] sm:$0xf]  ;;  %v7748_v8 = vor.u32 %v8806_v3, %v7747_v2  ;;  %4755 = vmatpush.bf16.msrb.mxu1 %v7492_v13  ;;  %v4517_v3 = vadd.f32 %v4516_v0, %v4504_v56  ;;  %v7013_v56 = vld [vmem:[%s9543_s0 + $0x7f8] sm:$0xf0] }
 0x3b2   : > { %v8870_v57 = vld [vmem:[%s9543_s0 + $0xfb4] sm:$0xf0]  ;;  %v8482_v0 = vld [vmem:[%s9543_s0 + $0x39c] sm:$0xf] }
 0x3b3   : > { %v7203_v9 = vld [vmem:[%s9543_s0 + $0x958] sm:$0xf]  ;;  %v8004_v49 = vor.u32 %v8870_v57, %v8003_v4  ;;  %4768 = vmatpush.bf16.msrb.mxu2 %v7748_v8  ;;  %v4529_v4 = vpop.f32.mrf.mxu3 }
 0x3b4   : > { %v8670_v10 = vld [vmem:[%s9543_s0 + $0x974] sm:$0xf0]  ;;  %v10585_v8 = vadd.f32 %v4529_v4, %v4517_v3  ;;  %v8610_v3 = vld [vmem:[%s9543_s0 + $0x79c] sm:$0xf] }
 0x3b5   : > { %v7459_v16 = vld [vmem:[%s9543_s0 + $0xb58] sm:$0xf]  ;;  %v7204_v20 = vor.u32 %v8670_v10, %v7203_v9  ;;  %4781 = vmatpush.bf16.msrb.mxu3 %v8004_v49  ;;  %v4492_v9 = vpop.f32.mrf.mxu0  ;;  %v6981_v4 = vld [vmem:[%s9543_s0 + $0x7b8] sm:$0xf0] }
 0x3b6   : > { %v8734_v18 = vld [vmem:[%s9543_s0 + $0xb74] sm:$0xf0]  ;;  %v8410_v9 = vld [vmem:[%s9543_s0 + $0x15c] sm:$0xf] }
 0x3b7   : > { %v7715_v40 = vld [vmem:[%s9543_s0 + $0xd58] sm:$0xf]  ;;  %v7460_v14 = vor.u32 %v8734_v18, %v7459_v16  ;;  %4743 = vmatpush.bf16.msrb.mxu0 %v7204_v20 }
 0x3b8   : > { %v8798_v52 = vld [vmem:[%s9543_s0 + $0xd74] sm:$0xf0] }
 0x3b9   : > { %v7971_v29 = vld [vmem:[%s9543_s0 + $0xf58] sm:$0xf]  ;;  %v7716_v24 = vor.u32 %v8798_v52, %v7715_v40  ;;  %4756 = vmatpush.bf16.msrb.mxu1 %v7460_v14  ;;  %v4505_v52 = vpop.f32.mrf.mxu1 }
 0x3ba   : > { %v8862_v19 = vld [vmem:[%s9543_s0 + $0xf74] sm:$0xf0]  ;;  %v6693_v52 = vld [vmem:[%s9543_s0 + $0x578] sm:$0xf0] }
 0x3bb   : > { %v7171_v21 = vld [vmem:[%s9543_s0 + $0x918] sm:$0xf]  ;;  %v7972_v35 = vor.u32 %v8862_v19, %v7971_v29  ;;  %4769 = vmatpush.bf16.msrb.mxu2 %v7716_v24 }
 0x3bc   : > { %v8662_v25 = vld [vmem:[%s9543_s0 + $0x934] sm:$0xf0] }
 0x3bd   : > { %v7427_v26 = vld [vmem:[%s9543_s0 + $0xb18] sm:$0xf]  ;;  %v7172_v42 = vor.u32 %v8662_v25, %v7171_v21  ;;  %4782 = vmatpush.bf16.msrb.mxu3 %v7972_v35 }
 0x3be   : > { %v8726_v55 = vld [vmem:[%s9543_s0 + $0xb34] sm:$0xf0] }
 0x3bf   : > { %v7683_v37 = vld [vmem:[%s9543_s0 + $0xd18] sm:$0xf]  ;;  %v7428_v44 = vor.u32 %v8726_v55, %v7427_v26  ;;  %4744 = vmatpush.bf16.msrb.mxu0 %v7172_v42 }
 0x3c0   : > { %v8790_v38 = vld [vmem:[%s9543_s0 + $0xd34] sm:$0xf0] }
 0x3c1   : > { %v7939_v39 = vld [vmem:[%s9543_s0 + $0xf18] sm:$0xf]  ;;  %v7684_v45 = vor.u32 %v8790_v38, %v7683_v37  ;;  %4757 = vmatpush.bf16.msrb.mxu1 %v7428_v44 }
 0x3c2   : > { %v8854_v41 = vld [vmem:[%s9543_s0 + $0xf34] sm:$0xf0] }
 0x3c3   : > { %v7139_v46 = vld [vmem:[%s9543_s0 + $0x8d8] sm:$0xf]  ;;  %v7940_v17 = vor.u32 %v8854_v41, %v7939_v39  ;;  %4770 = vmatpush.bf16.msrb.mxu2 %v7684_v45  ;;  %v4518_v41 = vpop.f32.mrf.mxu2 }
 0x3c4   : > { %v8654_v47 = vld [vmem:[%s9543_s0 + $0x8f4] sm:$0xf0] }
 0x3c5   : > { %v7395_v36 = vld [vmem:[%s9543_s0 + $0xad8] sm:$0xf]  ;;  %v7140_v58 = vor.u32 %v8654_v47, %v7139_v46  ;;  %4783 = vmatpush.bf16.msrb.mxu3 %v7940_v17  ;;  %v4531_v46 = vpop.f32.mrf.mxu3  ;;  %v8426_v47 = vld [vmem:[%s9543_s0 + $0x1dc] sm:$0xf] }
 0x3c6   : > { %v8718_v51 = vld [vmem:[%s9543_s0 + $0xaf4] sm:$0xf0]  ;;  %v6501_v17 = vld [vmem:[%s9543_s0 + $0x3f8] sm:$0xf0] }
 0x3c7   : > { %v7651_v53 = vld [vmem:[%s9543_s0 + $0xcd8] sm:$0xf]  ;;  %v7396_v60 = vor.u32 %v8718_v51, %v7395_v36  ;;  %4745 = vmatpush.bf16.msrb.mxu0 %v7140_v58  ;;  %v6245_v36 = vld [vmem:[%s9543_s0 + $0x1f8] sm:$0xf0] }
 0x3c8   : > { %v8782_v54 = vld [vmem:[%s9543_s0 + $0xcf4] sm:$0xf0]  ;;  %v8554_v51 = vld [vmem:[%s9543_s0 + $0x5dc] sm:$0xf] }
 0x3c9   : > { %v7907_v6 = vld [vmem:[%s9543_s0 + $0xed8] sm:$0xf]  ;;  %v7652_v62 = vor.u32 %v8782_v54, %v7651_v53  ;;  %4758 = vmatpush.bf16.msrb.mxu1 %v7396_v60  ;;  %v6757_v53 = vld [vmem:[%s9543_s0 + $0x5f8] sm:$0xf0]  ;;  %v6248_v60 = vor.u32 %v8426_v47, %v6245_v36  ;;  %v10644_v36 = vpop.f32.mrf.mxu1 }
 0x3ca   : > { %v8846_v5 = vld [vmem:[%s9543_s0 + $0xef4] sm:$0xf0]  ;;  %v6117_v46 = vld [vmem:[%s9543_s0 + $0xf8] sm:$0xf0] }
 0x3cb   : > { %v7107_v33 = vld [vmem:[%s9543_s0 + $0x898] sm:$0xf]  ;;  %v7908_v30 = vor.u32 %v8846_v5, %v7907_v6  ;;  %4771 = vmatpush.bf16.msrb.mxu2 %v7652_v62  ;;  %v8618_v5 = vld [vmem:[%s9543_s0 + $0x7dc] sm:$0xf]  ;;  %v6504_v62 = vor.u32 %v8490_v23, %v6501_v17 }
 0x3cc   : > { %v8646_v50 = vld [vmem:[%s9543_s0 + $0x8b4] sm:$0xf0]  ;;  %v8458_v47 = vld [vmem:[%s9543_s0 + $0x2dc] sm:$0xf] }
 0x3cd   : > { %v7363_v63 = vld [vmem:[%s9543_s0 + $0xa98] sm:$0xf]  ;;  %v7108_v13 = vor.u32 %v8646_v50, %v7107_v33  ;;  %4784 = vmatpush.bf16.msrb.mxu3 %v7908_v30  ;;  %v6760_v33 = vor.u32 %v8554_v51, %v6757_v53  ;;  %v8418_v50 = vld [vmem:[%s9543_s0 + $0x19c] sm:$0xf]  ;;  %v7016_v30 = vor.u32 %v8618_v5, %v7013_v56 }
 0x3ce   : > { %v8710_v1 = vld [vmem:[%s9543_s0 + $0xab4] sm:$0xf0]  ;;  %v8522_v17 = vld [vmem:[%s9543_s0 + $0x4dc] sm:$0xf] }
 0x3cf   : > { %v7619_v15 = vld [vmem:[%s9543_s0 + $0xc98] sm:$0xf]  ;;  %v7364_v10 = vor.u32 %v8710_v1, %v7363_v63  ;;  %4746 = vmatpush.bf16.msrb.mxu0 %v7108_v13  ;;  %v6213_v63 = vld [vmem:[%s9543_s0 + $0x1b8] sm:$0xf0] }
 0x3d0   : > { %v8774_v2 = vld [vmem:[%s9543_s0 + $0xcb4] sm:$0xf0]  ;;  %v6469_v1 = vld [vmem:[%s9543_s0 + $0x3b8] sm:$0xf0] }
 0x3d1   : > { %v7875_v57 = vld [vmem:[%s9543_s0 + $0xe98] sm:$0xf]  ;;  %v7620_v16 = vor.u32 %v8774_v2, %v7619_v15  ;;  %4759 = vmatpush.bf16.msrb.mxu1 %v7364_v10  ;;  %v8546_v15 = vld [vmem:[%s9543_s0 + $0x59c] sm:$0xf] }
 0x3d2   : > { %v8838_v22 = vld [vmem:[%s9543_s0 + $0xeb4] sm:$0xf0]  ;;  %v6725_v2 = vld [vmem:[%s9543_s0 + $0x5b8] sm:$0xf0] }
 0x3d3   : > { %v7075_v49 = vld [vmem:[%s9543_s0 + $0x858] sm:$0xf]  ;;  %v7876_v29 = vor.u32 %v8838_v22, %v7875_v57  ;;  %4772 = vmatpush.bf16.msrb.mxu2 %v7620_v16  ;;  %v6216_v57 = vor.u32 %v8418_v50, %v6213_v63  ;;  %v6472_v22 = vor.u32 %v8482_v0, %v6469_v1  ;;  %v6728_v13 = vor.u32 %v8546_v15, %v6725_v2  ;;  %v6181_v10 = vld [vmem:[%s9543_s0 + $0x178] sm:$0xf0]  ;;  %v10659_v1 = vpop.f32.mrf.mxu3 }
 0x3d4   : > { %v8638_v18 = vld [vmem:[%s9543_s0 + $0x874] sm:$0xf0]  ;;  %v8474_v16 = vld [vmem:[%s9543_s0 + $0x35c] sm:$0xf] }
 0x3d5   : > { %v7331_v40 = vld [vmem:[%s9543_s0 + $0xa58] sm:$0xf]  ;;  %v7076_v25 = vor.u32 %v8638_v18, %v7075_v49  ;;  %4785 = vmatpush.bf16.msrb.mxu3 %v7876_v29  ;;  %v6984_v49 = vor.u32 %v8610_v3, %v6981_v4  ;;  %v6437_v18 = vld [vmem:[%s9543_s0 + $0x378] sm:$0xf0] }
 0x3d6   : > { %v8702_v19 = vld [vmem:[%s9543_s0 + $0xa74] sm:$0xf0]  ;;  %v8602_v29 = vld [vmem:[%s9543_s0 + $0x75c] sm:$0xf] }
 0x3d7   : > { %v7587_v20 = vld [vmem:[%s9543_s0 + $0xc58] sm:$0xf]  ;;  %v7332_v35 = vor.u32 %v8702_v19, %v7331_v40  ;;  %4747 = vmatpush.bf16.msrb.mxu0 %v7076_v25  ;;  %v8538_v40 = vld [vmem:[%s9543_s0 + $0x55c] sm:$0xf] }
 0x3d8   : > { %v8766_v21 = vld [vmem:[%s9543_s0 + $0xc74] sm:$0xf0]  ;;  %v6949_v19 = vld [vmem:[%s9543_s0 + $0x778] sm:$0xf0] }
 0x3d9   : > { %v7843_v14 = vld [vmem:[%s9543_s0 + $0xe58] sm:$0xf]  ;;  %v7588_v55 = vor.u32 %v8766_v21, %v7587_v20  ;;  %4760 = vmatpush.bf16.msrb.mxu1 %v7332_v35  ;;  %v6184_v20 = vor.u32 %v8410_v9, %v6181_v10  ;;  %v6440_v21 = vor.u32 %v8474_v16, %v6437_v18  ;;  %v6149_v25 = vld [vmem:[%s9543_s0 + $0x138] sm:$0xf0]  ;;  %v4557_v16 = vpop.f32.mrf.mxu1 }
 0x3da   : > { %v8830_v24 = vld [vmem:[%s9543_s0 + $0xe74] sm:$0xf0]  ;;  %v6405_v35 = vld [vmem:[%s9543_s0 + $0x338] sm:$0xf0] }
 0x3db   : > { %v7043_v26 = vld [vmem:[%s9543_s0 + $0x818] sm:$0xf]  ;;  %v7844_v42 = vor.u32 %v8830_v24, %v7843_v14  ;;  %4773 = vmatpush.bf16.msrb.mxu2 %v7588_v55  ;;  %v6696_v14 = vor.u32 %v8538_v40, %v6693_v52  ;;  %v8402_v24 = vld [vmem:[%s9543_s0 + $0x11c] sm:$0xf] }
 0x3dc   : > { %v8630_v7 = vld [vmem:[%s9543_s0 + $0x834] sm:$0xf0]  ;;  %v8530_v55 = vld [vmem:[%s9543_s0 + $0x51c] sm:$0xf]  ;;  %v6152_v41 = vor.u32 %v8402_v24, %v6149_v25 }
 0x3dd   : > { %v7299_v37 = vld [vmem:[%s9543_s0 + $0xa18] sm:$0xf]  ;;  %v7044_v48 = vor.u32 %v8630_v7, %v7043_v26  ;;  %4786 = vmatpush.bf16.msrb.mxu3 %v7844_v42  ;;  %v8466_v26 = vld [vmem:[%s9543_s0 + $0x31c] sm:$0xf]  ;;  %v6952_v7 = vor.u32 %v8602_v29, %v6949_v19  ;;  %v10639_v42 = vpop.f32.mrf.mxu0 }
 0x3de   : > { %v8694_v38 = vld [vmem:[%s9543_s0 + $0xa34] sm:$0xf0]  ;;  %v6629_v51 = vld [vmem:[%s9543_s0 + $0x4f8] sm:$0xf0] }
 0x3df   : > { %v7555_v39 = vld [vmem:[%s9543_s0 + $0xc18] sm:$0xf]  ;;  %v7300_v54 = vor.u32 %v8694_v38, %v7299_v37  ;;  %4748 = vmatpush.bf16.msrb.mxu0 %v7044_v48  ;;  %v6661_v37 = vld [vmem:[%s9543_s0 + $0x538] sm:$0xf0]  ;;  %v6632_v56 = vor.u32 %v8522_v17, %v6629_v51 }
 0x3e0   : > { %v8758_v43 = vld [vmem:[%s9543_s0 + $0xc34] sm:$0xf0]  ;;  %v8594_v38 = vld [vmem:[%s9543_s0 + $0x71c] sm:$0xf] }
 0x3e1   : > { %v7811_v44 = vld [vmem:[%s9543_s0 + $0xe18] sm:$0xf]  ;;  %v7556_v6 = vor.u32 %v8758_v43, %v7555_v39  ;;  %4761 = vmatpush.bf16.msrb.mxu1 %v7300_v54  ;;  %v6917_v39 = vld [vmem:[%s9543_s0 + $0x738] sm:$0xf0]  ;;  %v6408_v43 = vor.u32 %v8466_v26, %v6405_v35 }
 0x3e2   : > { %v8822_v45 = vld [vmem:[%s9543_s0 + $0xe34] sm:$0xf0]  ;;  %4749 = vmatmul.bf16.vlgmr.msrb.gmra.mxu0 %v9725_v31  ;;  %v6920_v23 = vor.u32 %v8594_v38, %v6917_v39  ;;  %v6373_v48 = vld [vmem:[%s9543_s0 + $0x2f8] sm:$0xf0] }
 0x3e3   : > { %v7812_v58 = vor.u32 %v8822_v45, %v7811_v44  ;;  %4774 = vmatpush.bf16.msrb.mxu2 %v7556_v6  ;;  %4793 = vmatpush.bf16.msra.mxu0 %v6248_v60  ;;  %v6664_v44 = vor.u32 %v8530_v55, %v6661_v37  ;;  %v8394_v45 = vld [vmem:[%s9543_s0 + $0xdc] sm:$0xf]  ;;  %v6376_v5 = vor.u32 %v8458_v47, %v6373_v48 }
 0x3e4   : > { %4762 = vmatmul.bf16.vlgmr.msrb.gmra.mxu1 %v9729_v34  ;;  %v8586_v53 = vld [vmem:[%s9543_s0 + $0x6dc] sm:$0xf]  ;;  %v6120_v6 = vor.u32 %v8394_v45, %v6117_v46 }
 0x3e5   : > { %4787 = vmatpush.bf16.msrb.mxu3 %v7812_v58  ;;  %4806 = vmatpush.bf16.msra.mxu1 %v6504_v62  ;;  %v6885_v54 = vld [vmem:[%s9543_s0 + $0x6f8] sm:$0xf0]  ;;  %v4544_v4 = vpop.f32.mrf.mxu0 }
 0x3e6   : > { %4775 = vmatmul.bf16.vlgmr.msrb.gmra.mxu2 %v9721_v28  ;;  %v8386_v58 = vld [vmem:[%s9543_s0 + $0x9c] sm:$0xf]  ;;  %v6888_v50 = vor.u32 %v8586_v53, %v6885_v54 }
 0x3e7   : > { %4819 = vmatpush.bf16.msra.mxu2 %v6760_v33  ;;  %4794 = vmatpush.bf16.msra.mxu0 %v6216_v57  ;;  %v6085_v60 = vld [vmem:[%s9543_s0 + $0xb8] sm:$0xf0]  ;;  %v10654_v33 = vpop.f32.mrf.mxu2 }
 0x3e8   : > { %4788 = vmatmul.bf16.vlgmr.msrb.gmra.mxu3 %v9727_v32  ;;  %v8450_v62 = vld [vmem:[%s9543_s0 + $0x29c] sm:$0xf]  ;;  %v6088_v3 = vor.u32 %v8386_v58, %v6085_v60 }
 0x3e9   : > { %4832 = vmatpush.bf16.msra.mxu3 %v7016_v30  ;;  %4807 = vmatpush.bf16.msra.mxu1 %v6472_v22  ;;  %v6341_v63 = vld [vmem:[%s9543_s0 + $0x2b8] sm:$0xf0] }
 0x3ea   : > { %v8514_v0 = vld [vmem:[%s9543_s0 + $0x49c] sm:$0xf]  ;;  %v6344_v57 = vor.u32 %v8450_v62, %v6341_v63 }
 0x3eb   : > { %4820 = vmatpush.bf16.msra.mxu2 %v6728_v13  ;;  %4795 = vmatpush.bf16.msra.mxu0 %v6184_v20  ;;  %v6597_v30 = vld [vmem:[%s9543_s0 + $0x4b8] sm:$0xf0] }
 0x3ec   : > { %v8578_v15 = vld [vmem:[%s9543_s0 + $0x69c] sm:$0xf]  ;;  %v6600_v22 = vor.u32 %v8514_v0, %v6597_v30 }
 0x3ed   : > { %4833 = vmatpush.bf16.msra.mxu3 %v6984_v49  ;;  %4808 = vmatpush.bf16.msra.mxu1 %v6440_v21  ;;  %v6853_v2 = vld [vmem:[%s9543_s0 + $0x6b8] sm:$0xf0] }
 0x3ee   : > { %v8378_v13 = vld [vmem:[%s9543_s0 + $0x5c] sm:$0xf]  ;;  %v6856_v49 = vor.u32 %v8578_v15, %v6853_v2 }
 0x3ef   : > { %4821 = vmatpush.bf16.msra.mxu2 %v6696_v14  ;;  %4796 = vmatpush.bf16.msra.mxu0 %v6152_v41  ;;  %v6053_v9 = vld [vmem:[%s9543_s0 + $0x78] sm:$0xf0]  ;;  %v4570_v55 = vpop.f32.mrf.mxu2 }
 0x3f0   : > { %v8442_v10 = vld [vmem:[%s9543_s0 + $0x25c] sm:$0xf]  ;;  %v6056_v20 = vor.u32 %v8378_v13, %v6053_v9 }
 0x3f1   : > { %4834 = vmatpush.bf16.msra.mxu3 %v6952_v7  ;;  %4809 = vmatpush.bf16.msra.mxu1 %v6408_v43  ;;  %v6309_v18 = vld [vmem:[%s9543_s0 + $0x278] sm:$0xf0]  ;;  %v4583_v43 = vpop.f32.mrf.mxu3 }
 0x3f2   : > { %v8506_v40 = vld [vmem:[%s9543_s0 + $0x45c] sm:$0xf]  ;;  %v6312_v24 = vor.u32 %v8442_v10, %v6309_v18 }
 0x3f3   : > { %4822 = vmatpush.bf16.msra.mxu2 %v6664_v44  ;;  %4797 = vmatpush.bf16.msra.mxu0 %v6120_v6  ;;  %v6565_v52 = vld [vmem:[%s9543_s0 + $0x478] sm:$0xf0] }
 0x3f4   : > { %v8570_v29 = vld [vmem:[%s9543_s0 + $0x65c] sm:$0xf]  ;;  %v6568_v25 = vor.u32 %v8506_v40, %v6565_v52 }
 0x3f5   : > { %4835 = vmatpush.bf16.msra.mxu3 %v6920_v23  ;;  %4810 = vmatpush.bf16.msra.mxu1 %v6376_v5  ;;  %v6821_v19 = vld [vmem:[%s9543_s0 + $0x678] sm:$0xf0] }
 0x3f6   : > { %v8370_v21 = vld [vmem:[%s9543_s0 + $0x1c] sm:$0xf]  ;;  %v6824_v37 = vor.u32 %v8570_v29, %v6821_v19 }
 0x3f7   : > { %4823 = vmatpush.bf16.msra.mxu2 %v6632_v56  ;;  %4798 = vmatpush.bf16.msra.mxu0 %v6088_v3  ;;  %v6021_v14 = vld [vmem:[%s9543_s0 + $0x38] sm:$0xf0] }
 0x3f8   : > { %v8434_v26 = vld [vmem:[%s9543_s0 + $0x21c] sm:$0xf]  ;;  %v6024_v47 = vor.u32 %v8370_v21, %v6021_v14 }
 0x3f9   : > { %4836 = vmatpush.bf16.msra.mxu3 %v6888_v50  ;;  %4811 = vmatpush.bf16.msra.mxu1 %v6344_v57  ;;  %v6277_v7 = vld [vmem:[%s9543_s0 + $0x238] sm:$0xf0] }
 0x3fa   : > { %v8498_v35 = vld [vmem:[%s9543_s0 + $0x41c] sm:$0xf]  ;;  %v6280_v51 = vor.u32 %v8434_v26, %v6277_v7 }
 0x3fb   : > { %4824 = vmatpush.bf16.msra.mxu2 %v6600_v22  ;;  %v6533_v38 = vld [vmem:[%s9543_s0 + $0x438] sm:$0xf0]  ;;  %4799 = vmatpush.bf16.msra.mxu0 %v6056_v20 }
 0x3fc   : > { %v8562_v39 = vld [vmem:[%s9543_s0 + $0x61c] sm:$0xf]  ;;  %v6536_v53 = vor.u32 %v8498_v35, %v6533_v38 }
 0x3fd   : > { %4837 = vmatpush.bf16.msra.mxu3 %v6856_v49  ;;  %v6789_v41 = vld [vmem:[%s9543_s0 + $0x638] sm:$0xf0]  ;;  %4812 = vmatpush.bf16.msra.mxu1 %v6312_v24 }
 0x3fe   : > { %v8682_v44 = vld [vmem:[%s9543_s0 + $0x9dc] sm:$0xf]  ;;  %v6792_v5 = vor.u32 %v8562_v39, %v6789_v41 }
 0x3ff   : > { %v7269_v45 = vld [vmem:[%s9543_s0 + $0x9f8] sm:$0xf0]  ;;  %4825 = vmatpush.bf16.msra.mxu2 %v6568_v25  ;;  %4800 = vmatpush.bf16.msra.mxu0 %v6024_v47 }
 0x400   : > { %v8746_v46 = vld [vmem:[%s9543_s0 + $0xbdc] sm:$0xf]  ;;  %v7272_v56 = vor.u32 %v8682_v44, %v7269_v45  ;;  %v10720_v45 = vpop.f32.mrf.mxu1 }
 0x401   : > { %v7525_v23 = vld [vmem:[%s9543_s0 + $0xbf8] sm:$0xf0]  ;;  %4838 = vmatpush.bf16.msra.mxu3 %v6824_v37  ;;  %4813 = vmatpush.bf16.msra.mxu1 %v6280_v51  ;;  %v10715_v37 = vpop.f32.mrf.mxu0 }
 0x402   : > { %v8810_v48 = vld [vmem:[%s9543_s0 + $0xddc] sm:$0xf]  ;;  %v7528_v58 = vor.u32 %v8746_v46, %v7525_v23  ;;  %4801 = vmatmul.bf16.vlgmr.msra.gmra.mxu0 %v9668_v11 }
 0x403   : > { %v7781_v17 = vld [vmem:[%s9543_s0 + $0xdf8] sm:$0xf0]  ;;  %4826 = vmatpush.bf16.msra.mxu2 %v6536_v53  ;;  %4845 = vmatpush.bf16.msrb.mxu0 %v7272_v56 }
 0x404   : > { %v8874_v54 = vld [vmem:[%s9543_s0 + $0xfdc] sm:$0xf]  ;;  %v7784_v60 = vor.u32 %v8810_v48, %v7781_v17  ;;  %4814 = vmatmul.bf16.vlgmr.msra.gmra.mxu1 %v9671_v12 }
 0x405   : > { %v8037_v6 = vld [vmem:[%s9543_s0 + $0xff8] sm:$0xf0]  ;;  %4839 = vmatpush.bf16.msra.mxu3 %v6792_v5  ;;  %4858 = vmatpush.bf16.msrb.mxu1 %v7528_v58 }
 0x406   : > { %v8674_v62 = vld [vmem:[%s9543_s0 + $0x99c] sm:$0xf]  ;;  %v8040_v0 = vor.u32 %v8874_v54, %v8037_v6  ;;  %4827 = vmatmul.bf16.vlgmr.msra.gmra.mxu2 %v9655_v59 }
 0x407   : > { %v7237_v50 = vld [vmem:[%s9543_s0 + $0x9b8] sm:$0xf0]  ;;  %4871 = vmatpush.bf16.msrb.mxu2 %v7784_v60  ;;  %v4620_v60 = vpop.f32.mrf.mxu2 }
 0x408   : > { %v8738_v63 = vld [vmem:[%s9543_s0 + $0xb9c] sm:$0xf]  ;;  %v7240_v57 = vor.u32 %v8674_v62, %v7237_v50  ;;  %4840 = vmatmul.bf16.vlgmr.msra.gmra.mxu3 %v9657_v61 }
 0x409   : > { %v7493_v30 = vld [vmem:[%s9543_s0 + $0xbb8] sm:$0xf0]  ;;  %4884 = vmatpush.bf16.msrb.mxu3 %v8040_v0 }
 0x40a   : > { %v8802_v15 = vld [vmem:[%s9543_s0 + $0xd9c] sm:$0xf]  ;;  %v7496_v22 = vor.u32 %v8738_v63, %v7493_v30  ;;  %4846 = vmatpush.bf16.msrb.mxu0 %v7240_v57  ;;  %v4633_v30 = vpop.f32.mrf.mxu3 }
 0x40b   : > { %v7749_v2 = vld [vmem:[%s9543_s0 + $0xdb8] sm:$0xf0] }
 0x40c   : > { %v8866_v3 = vld [vmem:[%s9543_s0 + $0xf9c] sm:$0xf]  ;;  %v7752_v13 = vor.u32 %v8802_v15, %v7749_v2  ;;  %4859 = vmatpush.bf16.msrb.mxu1 %v7496_v22 }
 0x40d   : > { %v8005_v4 = vld [vmem:[%s9543_s0 + $0xfb8] sm:$0xf0] }
 0x40e   : > { %v8666_v9 = vld [vmem:[%s9543_s0 + $0x95c] sm:$0xf]  ;;  %v8008_v49 = vor.u32 %v8866_v3, %v8005_v4  ;;  %4872 = vmatpush.bf16.msrb.mxu2 %v7752_v13  ;;  %v4596_v4 = vpop.f32.mrf.mxu0 }
 0x40f   : > { %v7205_v10 = vld [vmem:[%s9543_s0 + $0x978] sm:$0xf0] }
 0x410   : > { %v8730_v16 = vld [vmem:[%s9543_s0 + $0xb5c] sm:$0xf]  ;;  %v7208_v20 = vor.u32 %v8666_v9, %v7205_v10  ;;  %4885 = vmatpush.bf16.msrb.mxu3 %v8008_v49 }
 0x411   : > { %v7461_v18 = vld [vmem:[%s9543_s0 + $0xb78] sm:$0xf0] }
 0x412   : > { %v8794_v40 = vld [vmem:[%s9543_s0 + $0xd5c] sm:$0xf]  ;;  %v7464_v59 = vor.u32 %v8730_v16, %v7461_v18  ;;  %4847 = vmatpush.bf16.msrb.mxu0 %v7208_v20  ;;  %v4609_v16 = vpop.f32.mrf.mxu1  ;;  %v1466_v20 = vperm.slane %v10561_v27, 5 }
 0x413   : > { %v7717_v52 = vld [vmem:[%s9543_s0 + $0xd78] sm:$0xf0] }
 0x414   : > { %v8858_v29 = vld [vmem:[%s9543_s0 + $0xf5c] sm:$0xf]  ;;  %v7720_v21 = vor.u32 %v8794_v40, %v7717_v52  ;;  %4860 = vmatpush.bf16.msrb.mxu1 %v7464_v59 }
 0x415   : > { %v7973_v19 = vld [vmem:[%s9543_s0 + $0xf78] sm:$0xf0] }
 0x416   : > { %v8658_v14 = vld [vmem:[%s9543_s0 + $0x91c] sm:$0xf]  ;;  %v7976_v11 = vor.u32 %v8858_v29, %v7973_v19  ;;  %4873 = vmatpush.bf16.msrb.mxu2 %v7720_v21 }
 0x417   : > { %v7173_v24 = vld [vmem:[%s9543_s0 + $0x938] sm:$0xf0] }
 0x418   : > { %v8722_v25 = vld [vmem:[%s9543_s0 + $0xb1c] sm:$0xf]  ;;  %v7176_v12 = vor.u32 %v8658_v14, %v7173_v24  ;;  %4886 = vmatpush.bf16.msrb.mxu3 %v7976_v11 }
 0x419   : > { %v7429_v26 = vld [vmem:[%s9543_s0 + $0xb38] sm:$0xf0] }
 0x41a   : > { %v8786_v61 = vld [vmem:[%s9543_s0 + $0xd1c] sm:$0xf]  ;;  %v7432_v38 = vor.u32 %v8722_v25, %v7429_v26  ;;  %4848 = vmatpush.bf16.msrb.mxu0 %v7176_v12  ;;  %v4622_v26 = vpop.f32.mrf.mxu2  ;;  %v4635_v12 = vpop.f32.mrf.mxu3 }
 0x41b   : > { %v7685_v7 = vld [vmem:[%s9543_s0 + $0xd38] sm:$0xf0] }
 0x41c   : > { %v8850_v35 = vld [vmem:[%s9543_s0 + $0xf1c] sm:$0xf]  ;;  %v7688_v39 = vor.u32 %v8786_v61, %v7685_v7  ;;  %4861 = vmatpush.bf16.msrb.mxu1 %v7432_v38  ;;  %v4595_v38 = vadd.f32 %v10715_v37, %v1466_v20 }
 0x41d   : > { %v7941_v55 = vld [vmem:[%s9543_s0 + $0xf38] sm:$0xf0] }
 0x41e   : > { %v8650_v41 = vld [vmem:[%s9543_s0 + $0x8dc] sm:$0xf]  ;;  %v7944_v46 = vor.u32 %v8850_v35, %v7941_v55  ;;  %4874 = vmatpush.bf16.msrb.mxu2 %v7688_v39 }
 0x41f   : > { %v7141_v43 = vld [vmem:[%s9543_s0 + $0x8f8] sm:$0xf0] }
 0x420   : > { %v8714_v44 = vld [vmem:[%s9543_s0 + $0xadc] sm:$0xf]  ;;  %v7144_v53 = vor.u32 %v8650_v41, %v7141_v43  ;;  %4887 = vmatpush.bf16.msrb.mxu3 %v7944_v46 }
 0x421   : > { %v7397_v47 = vld [vmem:[%s9543_s0 + $0xaf8] sm:$0xf0] }
 0x422   : > { %v8778_v23 = vld [vmem:[%s9543_s0 + $0xcdc] sm:$0xf]  ;;  %v7400_v54 = vor.u32 %v8714_v44, %v7397_v47  ;;  %4849 = vmatpush.bf16.msrb.mxu0 %v7144_v53  ;;  %v4646_v53 = vpop.f32.mrf.mxu0 }
 0x423   : > { %v7653_v48 = vld [vmem:[%s9543_s0 + $0xcf8] sm:$0xf0] }
 0x424   : > { %v8842_v17 = vld [vmem:[%s9543_s0 + $0xedc] sm:$0xf]  ;;  %v7656_v6 = vor.u32 %v8778_v23, %v7653_v48  ;;  %4862 = vmatpush.bf16.msrb.mxu1 %v7400_v54  ;;  %v4608_v23 = vadd.f32 %v10720_v45, %v4595_v38  ;;  %v4543_v48 = vadd.f32 %v10639_v42, %v10585_v8  ;;  %v4672_v42 = vpop.f32.mrf.mxu2 }
 0x425   : > { %v7909_v51 = vld [vmem:[%s9543_s0 + $0xef8] sm:$0xf0] }
 0x426   : > { %v8642_v5 = vld [vmem:[%s9543_s0 + $0x89c] sm:$0xf]  ;;  %v7912_v62 = vor.u32 %v8842_v17, %v7909_v51  ;;  %4875 = vmatpush.bf16.msrb.mxu2 %v7656_v6  ;;  %v4621_v37 = vadd.f32 %v4620_v60, %v4608_v23  ;;  %v4556_v17 = vadd.f32 %v10644_v36, %v4543_v48  ;;  %v4659_v6 = vpop.f32.mrf.mxu1 }
 0x427   : > { %v7109_v56 = vld [vmem:[%s9543_s0 + $0x8b8] sm:$0xf0] }
 0x428   : > { %v8706_v58 = vld [vmem:[%s9543_s0 + $0xa9c] sm:$0xf]  ;;  %v7112_v3 = vor.u32 %v8642_v5, %v7109_v56  ;;  %4888 = vmatpush.bf16.msrb.mxu3 %v7912_v62  ;;  %v4634_v51 = vadd.f32 %v4633_v30, %v4621_v37  ;;  %v4569_v45 = vadd.f32 %v10654_v33, %v4556_v17 }
 0x429   : > { %v7365_v50 = vld [vmem:[%s9543_s0 + $0xab8] sm:$0xf0] }
 0x42a   : > { %v8770_v63 = vld [vmem:[%s9543_s0 + $0xc9c] sm:$0xf]  ;;  %v7368_v57 = vor.u32 %v8706_v58, %v7365_v50  ;;  %4850 = vmatpush.bf16.msrb.mxu0 %v7112_v3  ;;  %v4647_v54 = vadd.f32 %v4646_v53, %v4634_v51  ;;  %v4582_v8 = vadd.f32 %v10659_v1, %v4569_v45  ;;  %v4648_v60 = vpop.f32.mrf.mxu0 }
 0x42b   : > { %v7621_v0 = vld [vmem:[%s9543_s0 + $0xcb8] sm:$0xf0] }
 0x42c   : > { %v8834_v15 = vld [vmem:[%s9543_s0 + $0xe9c] sm:$0xf]  ;;  %v7624_v22 = vor.u32 %v8770_v63, %v7621_v0  ;;  %4863 = vmatpush.bf16.msrb.mxu1 %v7368_v57  ;;  %v4660_v5 = vadd.f32 %v4659_v6, %v4647_v54  ;;  %v4909_v58 = vmul.f32 0.2, %v4582_v8  ;;  %vm4901_vm12 = vcmp.gt.f32.partialorder %v4582_v8, 0.0  ;;  %v4674_v33 = vpop.f32.mrf.mxu2 }
 0x42d   : > { %v7877_v2 = vld [vmem:[%s9543_s0 + $0xeb8] sm:$0xf0]  ;;  %v1467_v0 = vperm.slane %v10561_v27, 6 }
 0x42e   : > { %v8634_v13 = vld [vmem:[%s9543_s0 + $0x85c] sm:$0xf]  ;;  %v7880_v49 = vor.u32 %v8834_v15, %v7877_v2  ;;  %4876 = vmatpush.bf16.msrb.mxu2 %v7624_v22  ;;  %v4673_v56 = vadd.f32 %v4672_v42, %v4660_v5  ;;  %v4917_v36 = vsel %vm4901_vm12, %v4582_v8, %v4909_v58 }
 0x42f   : > { %v7077_v9 = vld [vmem:[%s9543_s0 + $0x878] sm:$0xf0] }
 0x430   : > { %v8698_v10 = vld [vmem:[%s9543_s0 + $0xa5c] sm:$0xf]  ;;  %v7080_v59 = vor.u32 %v8634_v13, %v7077_v9  ;;  %4889 = vmatpush.bf16.msrb.mxu3 %v7880_v49 }
 0x431   : > { %v7333_v18 = vld [vmem:[%s9543_s0 + $0xa78] sm:$0xf0] }
 0x432   : > { %v8762_v40 = vld [vmem:[%s9543_s0 + $0xc5c] sm:$0xf]  ;;  %v7336_v21 = vor.u32 %v8698_v10, %v7333_v18  ;;  %4851 = vmatpush.bf16.msrb.mxu0 %v7080_v59  ;;  %v4698_v30 = vpop.f32.mrf.mxu0 }
 0x433   : > { %v7589_v52 = vld [vmem:[%s9543_s0 + $0xc78] sm:$0xf0]  ;;  %v4699_v1 = vadd.f32 %v4698_v30, %v1467_v0 }
 0x434   : > { %v8826_v29 = vld [vmem:[%s9543_s0 + $0xe5c] sm:$0xf]  ;;  %v7592_v14 = vor.u32 %v8762_v40, %v7589_v52  ;;  %4864 = vmatpush.bf16.msrb.mxu1 %v7336_v21  ;;  %v4724_v3 = vpop.f32.mrf.mxu2 }
 0x435   : > { %v7845_v19 = vld [vmem:[%s9543_s0 + $0xe78] sm:$0xf0] }
 0x436   : > { %v8626_v24 = vld [vmem:[%s9543_s0 + $0x81c] sm:$0xf]  ;;  %v7848_v61 = vor.u32 %v8826_v29, %v7845_v19  ;;  %4877 = vmatpush.bf16.msrb.mxu2 %v7592_v14 }
 0x437   : > { %v7045_v25 = vld [vmem:[%s9543_s0 + $0x838] sm:$0xf0] }
 0x438   : > { %v8690_v11 = vld [vmem:[%s9543_s0 + $0xa1c] sm:$0xf]  ;;  %v7048_v43 = vor.u32 %v8626_v24, %v7045_v25  ;;  %4890 = vmatpush.bf16.msrb.mxu3 %v7848_v61  ;;  %v1468_v61 = vperm.slane %v10561_v27, 7 }
 0x439   : > { %v7301_v7 = vld [vmem:[%s9543_s0 + $0xa38] sm:$0xf0] }
 0x43a   : > { %v8754_v35 = vld [vmem:[%s9543_s0 + $0xc1c] sm:$0xf]  ;;  %v7304_v44 = vor.u32 %v8690_v11, %v7301_v7  ;;  %4852 = vmatpush.bf16.msrb.mxu0 %v7048_v43  ;;  %v4700_v13 = vpop.f32.mrf.mxu0 }
 0x43b   : > { %v7557_v55 = vld [vmem:[%s9543_s0 + $0xc38] sm:$0xf0] }
 0x43c   : > { %v8818_v39 = vld [vmem:[%s9543_s0 + $0xe1c] sm:$0xf]  ;;  %v7560_v46 = vor.u32 %v8754_v35, %v7557_v55  ;;  %4865 = vmatpush.bf16.msrb.mxu1 %v7304_v44  ;;  %v4726_v10 = vpop.f32.mrf.mxu2 }
 0x43d   : > { %v7813_v41 = vld [vmem:[%s9543_s0 + $0xe38] sm:$0xf0]  ;;  %4853 = vmatmul.bf16.vlgmr.msrb.gmra.mxu0 %v9725_v31  ;;  %v4685_v31 = vpop.f32.mrf.mxu3 }
 0x43e   : > { %v7816_v47 = vor.u32 %v8818_v39, %v7813_v41  ;;  %4878 = vmatpush.bf16.msrb.mxu2 %v7560_v46 }
 0x43f   : > { %4866 = vmatmul.bf16.vlgmr.msrb.gmra.mxu1 %v9729_v34  ;;  %v4686_v34 = vadd.f32 %v4685_v31, %v4673_v56 }
 0x440   : > { %4891 = vmatpush.bf16.msrb.mxu3 %v7816_v47 }
 0x441   : > { %4879 = vmatmul.bf16.vlgmr.msrb.gmra.mxu2 %v9721_v28  ;;  %v4661_v28 = vpop.f32.mrf.mxu1  ;;  %vm4902_vm13 = vcmp.gt.f32.partialorder %v4686_v34, 0.0 }
 0x443   : > { %4892 = vmatmul.bf16.vlgmr.msrb.gmra.mxu3 %v9727_v32  ;;  %v4910_v32 = vmul.f32 0.2, %v4686_v34 }
 0x445   : > { %v4918_v62 = vsel %vm4902_vm13, %v4686_v34, %v4910_v32  ;;  %v4687_v63 = vpop.f32.mrf.mxu3 }
 0x446   : > { %v4923_v50 = vpack.c.bf16 %v4918_v62, %v4917_v36 }
 0x448   : > { %4927 = vst [vmem:[#allocation2 + $0x18] sm:$0xff] %v4923_v50 }
 0x449   : > { %v4711_v15 = vpop.f32.mrf.mxu1 }
 0x44a   : > { %v4712_v2 = vadd.f32 %v4711_v15, %v4699_v1 }
 0x44c   : > { %v4725_v4 = vadd.f32 %v4724_v3, %v4712_v2 }
 0x44d   : > { %v4737_v57 = vpop.f32.mrf.mxu3 }
 0x44e   : > { %v4738_v22 = vadd.f32 %v4737_v57, %v4725_v4 }
 0x451   : > { %v4713_v9 = vpop.f32.mrf.mxu1 }
 0x455   : > { %v4739_v16 = vpop.f32.mrf.mxu3 }
 0x45f   : > { %v4750_v49 = vpop.f32.mrf.mxu0 }
 0x460   : > { %v4751_v38 = vadd.f32 %v4750_v49, %v4738_v22 }
 0x461   : > { %v4763_v18 = vpop.f32.mrf.mxu1 }
 0x462   : > { %v4764_v41 = vadd.f32 %v4763_v18, %v4751_v38 }
 0x467   : > { %v4752_v29 = vpop.f32.mrf.mxu0 }
 0x469   : > { %v4776_v40 = vpop.f32.mrf.mxu2  ;;  %v4765_v19 = vpop.f32.mrf.mxu1 }
 0x46a   : > { %v4777_v47 = vadd.f32 %v4776_v40, %v4764_v41 }
 0x46b   : > { %v4789_v52 = vpop.f32.mrf.mxu3 }
 0x46c   : > { %v4790_v48 = vadd.f32 %v4789_v52, %v4777_v47 }
 0x46e   : > { %v4911_v27 = vmul.f32 0.2, %v4790_v48  ;;  %vm4903_vm14 = vcmp.gt.f32.partialorder %v4790_v48, 0.0 }
 0x470   : > { %v4919_v8 = vsel %vm4903_vm14, %v4790_v48, %v4911_v27 }
 0x471   : > { %v4778_v20 = vpop.f32.mrf.mxu2 }
 0x473   : > { %v4791_v59 = vpop.f32.mrf.mxu3 }
 0x47f   : > { %v4802_v21 = vpop.f32.mrf.mxu0 }
 0x480   : > { %v4803_v55 = vadd.f32 %v4802_v21, %v1468_v61 }
 0x481   : > { %v4815_v14 = vpop.f32.mrf.mxu1 }
 0x482   : > { %v4816_v12 = vadd.f32 %v4815_v14, %v4803_v55 }
 0x487   : > { %v4804_v11 = vpop.f32.mrf.mxu0 }
 0x489   : > { %v4828_v24 = vpop.f32.mrf.mxu2  ;;  %v4817_v26 = vpop.f32.mrf.mxu1 }
 0x48a   : > { %v4829_v39 = vadd.f32 %v4828_v24, %v4816_v12 }
 0x48b   : > { %v4841_v25 = vpop.f32.mrf.mxu3 }
 0x48c   : > { %v4842_v43 = vadd.f32 %v4841_v25, %v4829_v39 }
 0x491   : > { %v4830_v7 = vpop.f32.mrf.mxu2 }
 0x493   : > { %v4843_v35 = vpop.f32.mrf.mxu3 }
 0x4ba   : > { %v4854_v44 = vpop.f32.mrf.mxu0 }
 0x4bb   : > { %v4855_v23 = vadd.f32 %v4854_v44, %v4842_v43 }
 0x4bc   : > { %v4867_v46 = vpop.f32.mrf.mxu1 }
 0x4bd   : > { %v4868_v37 = vadd.f32 %v4867_v46, %v4855_v23 }
 0x4c2   : > { %v4856_v53 = vpop.f32.mrf.mxu0 }
 0x4c4   : > { %v4880_v17 = vpop.f32.mrf.mxu2  ;;  %v4869_v54 = vpop.f32.mrf.mxu1 }
 0x4c5   : > { %v4881_v51 = vadd.f32 %v4880_v17, %v4868_v37 }
 0x4c6   : > { %v4893_v45 = vpop.f32.mrf.mxu3 }
 0x4c7   : > { %v4894_v6 = vadd.f32 %v4893_v45, %v4881_v51 }
 0x4c9   : > { %vm4904_vm15 = vcmp.gt.f32.partialorder %v4894_v6, 0.0  ;;  %v4912_v5 = vmul.f32 0.2, %v4894_v6 }
 0x4ca   : > { %4932 = sbr.rel (%p8041_p1) target bundleno = 1438 (0x59e), region = 84 }
 0x4cb   : > { %v4920_v42 = vsel %vm4904_vm15, %v4894_v6, %v4912_v5 }
 0x4cc   : > { %v4924_v56 = vpack.c.bf16 %v4920_v42, %v4919_v8  ;;  %v4882_v31 = vpop.f32.mrf.mxu2 }
 0x4ce   : > { %v4895_v58 = vpop.f32.mrf.mxu3  ;;  %4928 = vst [vmem:[#allocation2 + $0x8] sm:$0xff] %v4924_v56 }
 0x4cf   : > { %v8886_v34 = vld [vmem:[#allocation12 + $0x38] sm:$0xff]  ;;  %v8885_v36 = vld [vmem:[#allocation12 + $0x30] sm:$0xff]  ;;  %v8884_v63 = vld [vmem:[#allocation12 + $0x28] sm:$0xff] }
 0x4d0   : > { %v8894_v60 = vld [vmem:[#allocation12 + $0x78] sm:$0xff]  ;;  %5481 = vmatpush.bf16.msra.mxu0 %v8886_v34  ;;  %v8893_v62 = vld [vmem:[#allocation12 + $0x70] sm:$0xff]  ;;  %v8892_v0 = vld [vmem:[#allocation12 + $0x68] sm:$0xff] }
 0x4d1   : > { %v8902_v28 = vld [vmem:[#allocation12 + $0xb8] sm:$0xff]  ;;  %5494 = vmatpush.bf16.msra.mxu1 %v8894_v60  ;;  %v8901_v50 = vld [vmem:[#allocation12 + $0xb0] sm:$0xff]  ;;  %v8900_v30 = vld [vmem:[#allocation12 + $0xa8] sm:$0xff] }
 0x4d2   : > { %v8910_v32 = vld [vmem:[#allocation12 + $0xf8] sm:$0xff]  ;;  %5507 = vmatpush.bf16.msra.mxu2 %v8902_v28  ;;  %v8909_v33 = vld [vmem:[#allocation12 + $0xf0] sm:$0xff]  ;;  %v8908_v1 = vld [vmem:[#allocation12 + $0xe8] sm:$0xff] }
 0x4d3   : > { %5520 = vmatpush.bf16.msra.mxu3 %v8910_v32  ;;  %v8883_v15 = vld [vmem:[#allocation12 + $0x20] sm:$0xff]  ;;  %v8882_v57 = vld [vmem:[#allocation12 + $0x18] sm:$0xff]  ;;  %v8881_v10 = vld [vmem:[#allocation12 + $0x10] sm:$0xff] }
 0x4d4   : > { %5482 = vmatpush.bf16.msra.mxu0 %v8885_v36  ;;  %v8891_v2 = vld [vmem:[#allocation12 + $0x60] sm:$0xff]  ;;  %v8890_v22 = vld [vmem:[#allocation12 + $0x58] sm:$0xff]  ;;  %v8889_v16 = vld [vmem:[#allocation12 + $0x50] sm:$0xff] }
 0x4d5   : > { %5495 = vmatpush.bf16.msra.mxu1 %v8893_v62  ;;  %v8899_v3 = vld [vmem:[#allocation12 + $0xa0] sm:$0xff]  ;;  %v8898_v13 = vld [vmem:[#allocation12 + $0x98] sm:$0xff]  ;;  %v8897_v49 = vld [vmem:[#allocation12 + $0x90] sm:$0xff] }
 0x4d6   : > { %5508 = vmatpush.bf16.msra.mxu2 %v8901_v50  ;;  %v8907_v4 = vld [vmem:[#allocation12 + $0xe0] sm:$0xff]  ;;  %v8906_v9 = vld [vmem:[#allocation12 + $0xd8] sm:$0xff]  ;;  %v8905_v18 = vld [vmem:[#allocation12 + $0xd0] sm:$0xff] }
 0x4d7   : > { %5521 = vmatpush.bf16.msra.mxu3 %v8909_v33  ;;  %v8880_v40 = vld [vmem:[#allocation12 + $0x8] sm:$0xff]  ;;  %v4933_v59 = vld [vmem:[#allocation2 + $0x10] sm:$0xff]  ;;  %v8879_v21 = vld [vmem:[#allocation12] sm:$0xff] }
 0x4d8   : > { %5483 = vmatpush.bf16.msra.mxu0 %v8884_v63  ;;  %v8888_v52 = vld [vmem:[#allocation12 + $0x48] sm:$0xff]  ;;  %v8887_v14 = vld [vmem:[#allocation12 + $0x40] sm:$0xff]  ;;  %v5073_v61 = vunpack.c.l.b16 %v4933_v59  ;;  %v5074_v7 = vunpack.c.h.b16 %v4933_v59  ;;  %v8918_v35 = vld [vmem:[#allocation12 + $0x138] sm:$0xff] }
 0x4d9   : > { %5496 = vmatpush.bf16.msra.mxu1 %v8892_v0  ;;  %v8896_v29 = vld [vmem:[#allocation12 + $0x88] sm:$0xff]  ;;  %v8895_v11 = vld [vmem:[#allocation12 + $0x80] sm:$0xff]  ;;  %v8926_v55 = vld [vmem:[#allocation12 + $0x178] sm:$0xff] }
 0x4da   : > { %5509 = vmatpush.bf16.msra.mxu2 %v8900_v30  ;;  %v8904_v19 = vld [vmem:[#allocation12 + $0xc8] sm:$0xff]  ;;  %v8903_v26 = vld [vmem:[#allocation12 + $0xc0] sm:$0xff]  ;;  %v8934_v12 = vld [vmem:[#allocation12 + $0x1b8] sm:$0xff]  ;;  %v5081_v43 = vpack.c.b16 %v5073_v61, %v5073_v61  ;;  %v5082_v44 = vpack.c.b16 %v5074_v7, %v5074_v7 }
 0x4db   : > { %5522 = vmatpush.bf16.msra.mxu3 %v8908_v1  ;;  %v4934_v20 = vld [vmem:[#allocation2] sm:$0xff]  ;;  %v8942_v38 = vld [vmem:[#allocation12 + $0x1f8] sm:$0xff]  ;;  %v8917_v46 = vld [vmem:[#allocation12 + $0x130] sm:$0xff] }
 0x4dc   : > { %5484 = vmatpush.bf16.msra.mxu0 %v8883_v15  ;;  %v5075_v24 = vunpack.c.l.b16 %v4934_v20  ;;  %v5076_v25 = vunpack.c.h.b16 %v4934_v20  ;;  %v8925_v47 = vld [vmem:[#allocation12 + $0x170] sm:$0xff]  ;;  %v8916_v37 = vld [vmem:[#allocation12 + $0x128] sm:$0xff]  ;;  %v8915_v53 = vld [vmem:[#allocation12 + $0x120] sm:$0xff] }
 0x4dd   : > { %5497 = vmatpush.bf16.msra.mxu1 %v8891_v2  ;;  %v8933_v23 = vld [vmem:[#allocation12 + $0x1b0] sm:$0xff]  ;;  %v8924_v17 = vld [vmem:[#allocation12 + $0x168] sm:$0xff]  ;;  %v8923_v54 = vld [vmem:[#allocation12 + $0x160] sm:$0xff] }
 0x4de   : > { %5510 = vmatpush.bf16.msra.mxu2 %v8899_v3  ;;  %v5083_v39 = vpack.c.b16 %v5075_v24, %v5075_v24  ;;  %v5084_v41 = vpack.c.b16 %v5076_v25, %v5076_v25  ;;  %v8941_v48 = vld [vmem:[#allocation12 + $0x1f0] sm:$0xff]  ;;  %v8932_v51 = vld [vmem:[#allocation12 + $0x1a8] sm:$0xff]  ;;  %v8931_v27 = vld [vmem:[#allocation12 + $0x1a0] sm:$0xff] }
 0x4df   : > { %5523 = vmatpush.bf16.msra.mxu3 %v8907_v4  ;;  %v8940_v45 = vld [vmem:[#allocation12 + $0x1e8] sm:$0xff]  ;;  %v8939_v6 = vld [vmem:[#allocation12 + $0x1e0] sm:$0xff]  ;;  %v8914_v5 = vld [vmem:[#allocation12 + $0x118] sm:$0xff] }
 0x4e0   : > { %5485 = vmatpush.bf16.msra.mxu0 %v8882_v57  ;;  %v8922_v8 = vld [vmem:[#allocation12 + $0x158] sm:$0xff]  ;;  %v8913_v31 = vld [vmem:[#allocation12 + $0x110] sm:$0xff]  ;;  %v8912_v28 = vld [vmem:[#allocation12 + $0x108] sm:$0xff] }
 0x4e1   : > { %5498 = vmatpush.bf16.msra.mxu1 %v8890_v22  ;;  %v8930_v42 = vld [vmem:[#allocation12 + $0x198] sm:$0xff]  ;;  %v8921_v58 = vld [vmem:[#allocation12 + $0x150] sm:$0xff]  ;;  %v8920_v32 = vld [vmem:[#allocation12 + $0x148] sm:$0xff] }
 0x4e2   : > { %5511 = vmatpush.bf16.msra.mxu2 %v8898_v13  ;;  %v8938_v56 = vld [vmem:[#allocation12 + $0x1d8] sm:$0xff]  ;;  %v8929_v34 = vld [vmem:[#allocation12 + $0x190] sm:$0xff]  ;;  %v8928_v62 = vld [vmem:[#allocation12 + $0x188] sm:$0xff] }
 0x4e3   : > { %5524 = vmatpush.bf16.msra.mxu3 %v8906_v9  ;;  %v8937_v60 = vld [vmem:[#allocation12 + $0x1d0] sm:$0xff]  ;;  %v4935_v36 = vld [vmem:[#allocation2 + $0x18] sm:$0xff]  ;;  %v8936_v50 = vld [vmem:[#allocation12 + $0x1c8] sm:$0xff] }
 0x4e4   : > { %5486 = vmatpush.bf16.msra.mxu0 %v8881_v10  ;;  %v4936_v33 = vld [vmem:[#allocation2 + $0x8] sm:$0xff]  ;;  %v5077_v63 = vunpack.c.l.b16 %v4935_v36  ;;  %v5078_v0 = vunpack.c.h.b16 %v4935_v36  ;;  %v8911_v30 = vld [vmem:[#allocation12 + $0x100] sm:$0xff] }
 0x4e5   : > { %5499 = vmatpush.bf16.msra.mxu1 %v8889_v16  ;;  %v8919_v1 = vld [vmem:[#allocation12 + $0x140] sm:$0xff]  ;;  %v5079_v15 = vunpack.c.l.b16 %v4936_v33  ;;  %v5080_v2 = vunpack.c.h.b16 %v4936_v33 }
 0x4e6   : > { %5512 = vmatpush.bf16.msra.mxu2 %v8897_v49  ;;  %v8927_v3 = vld [vmem:[#allocation12 + $0x180] sm:$0xff]  ;;  %v5085_v57 = vpack.c.b16 %v5077_v63, %v5077_v63  ;;  %v5086_v22 = vpack.c.b16 %v5078_v0, %v5078_v0 }
 0x4e7   : > { %5525 = vmatpush.bf16.msra.mxu3 %v8905_v18  ;;  %v8935_v4 = vld [vmem:[#allocation12 + $0x1c0] sm:$0xff]  ;;  %v5087_v13 = vpack.c.b16 %v5079_v15, %v5079_v15  ;;  %v5088_v9 = vpack.c.b16 %v5080_v2, %v5080_v2 }
 0x4e8   : > { %5487 = vmatpush.bf16.msra.mxu0 %v8880_v40 }
 0x4e9   : > { %5500 = vmatpush.bf16.msra.mxu1 %v8888_v52 }
 0x4ea   : > { %5513 = vmatpush.bf16.msra.mxu2 %v8896_v29  ;;  %v9051_v29 = vld [vmem:[#allocation14] ss:$0 sm:$0xff] }
 0x4eb   : > { %5526 = vmatpush.bf16.msra.mxu3 %v8904_v19 }
 0x4ec   : > { %5488 = vmatpush.bf16.msra.mxu0 %v8879_v21 }
 0x4ed   : > { %5501 = vmatpush.bf16.msra.mxu1 %v8887_v14 }
 0x4ee   : > { %5514 = vmatpush.bf16.msra.mxu2 %v8895_v11 }
 0x4ef   : > { %5527 = vmatpush.bf16.msra.mxu3 %v8903_v26  ;;  %5489 = vmatmul.bf16.vlgmr.msra.gmra.mxu0 %v5081_v43 }
 0x4f0   : > { %5533 = vmatpush.bf16.msrb.mxu0 %v8918_v35  ;;  %5502 = vmatmul.bf16.vlgmr.msra.gmra.mxu1 %v5082_v44 }
 0x4f1   : > { %5546 = vmatpush.bf16.msrb.mxu1 %v8926_v55  ;;  %5515 = vmatmul.bf16.vlgmr.msra.gmra.mxu2 %v5083_v39 }
 0x4f2   : > { %5559 = vmatpush.bf16.msrb.mxu2 %v8934_v12  ;;  %5528 = vmatmul.bf16.vlgmr.msra.gmra.mxu3 %v5084_v41 }
 0x4f3   : > { %5572 = vmatpush.bf16.msrb.mxu3 %v8942_v38 }
 0x4f4   : > { %5534 = vmatpush.bf16.msrb.mxu0 %v8917_v46 }
 0x4f5   : > { %5547 = vmatpush.bf16.msrb.mxu1 %v8925_v47 }
 0x4f6   : > { %5560 = vmatpush.bf16.msrb.mxu2 %v8933_v23 }
 0x4f7   : > { %5573 = vmatpush.bf16.msrb.mxu3 %v8941_v48 }
 0x4f8   : > { %5535 = vmatpush.bf16.msrb.mxu0 %v8916_v37 }
 0x4f9   : > { %5548 = vmatpush.bf16.msrb.mxu1 %v8924_v17 }
 0x4fa   : > { %5561 = vmatpush.bf16.msrb.mxu2 %v8932_v51 }
 0x4fb   : > { %5574 = vmatpush.bf16.msrb.mxu3 %v8940_v45 }
 0x4fc   : > { %5536 = vmatpush.bf16.msrb.mxu0 %v8915_v53 }
 0x4fd   : > { %5549 = vmatpush.bf16.msrb.mxu1 %v8923_v54 }
 0x4fe   : > { %5562 = vmatpush.bf16.msrb.mxu2 %v8931_v27 }
 0x4ff   : > { %5575 = vmatpush.bf16.msrb.mxu3 %v8939_v6 }
 0x500   : > { %5537 = vmatpush.bf16.msrb.mxu0 %v8914_v5 }
 0x501   : > { %5550 = vmatpush.bf16.msrb.mxu1 %v8922_v8 }
 0x502   : > { %5563 = vmatpush.bf16.msrb.mxu2 %v8930_v42 }
 0x503   : > { %5576 = vmatpush.bf16.msrb.mxu3 %v8938_v56 }
 0x504   : > { %5538 = vmatpush.bf16.msrb.mxu0 %v8913_v31 }
 0x505   : > { %5551 = vmatpush.bf16.msrb.mxu1 %v8921_v58 }
 0x506   : > { %5564 = vmatpush.bf16.msrb.mxu2 %v8929_v34 }
 0x507   : > { %5577 = vmatpush.bf16.msrb.mxu3 %v8937_v60 }
 0x508   : > { %5539 = vmatpush.bf16.msrb.mxu0 %v8912_v28 }
 0x509   : > { %5552 = vmatpush.bf16.msrb.mxu1 %v8920_v32 }
 0x50a   : > { %5565 = vmatpush.bf16.msrb.mxu2 %v8928_v62 }
 0x50b   : > { %5578 = vmatpush.bf16.msrb.mxu3 %v8936_v50 }
 0x50c   : > { %5540 = vmatpush.bf16.msrb.mxu0 %v8911_v30 }
 0x50d   : > { %5553 = vmatpush.bf16.msrb.mxu1 %v8919_v1 }
 0x50e   : > { %5566 = vmatpush.bf16.msrb.mxu2 %v8927_v3 }
 0x50f   : > { %5579 = vmatpush.bf16.msrb.mxu3 %v8935_v4  ;;  %5541 = vmatmul.bf16.vlgmr.msrb.gmra.mxu0 %v5085_v57 }
 0x510   : > { %5554 = vmatmul.bf16.vlgmr.msrb.gmra.mxu1 %v5086_v22 }
 0x511   : > { %5567 = vmatmul.bf16.vlgmr.msrb.gmra.mxu2 %v5087_v13 }
 0x512   : > { %5580 = vmatmul.bf16.vlgmr.msrb.gmra.mxu3 %v5088_v9 }
 0x56c   : > { %v5490_v10 = vpop.f32.mrf.mxu0 }
 0x56d   : > { %v5503_v16 = vpop.f32.mrf.mxu1  ;;  %v5491_v59 = vadd.f32 %v9051_v29, %v5490_v10 }
 0x56f   : > { %v5504_v21 = vadd.f32 %v5503_v16, %v5491_v59 }
 0x574   : > { %v5516_v49 = vpop.f32.mrf.mxu2  ;;  %v5492_v40 = vpop.f32.mrf.mxu0 }
 0x575   : > { %v5529_v18 = vpop.f32.mrf.mxu3  ;;  %v5505_v52 = vpop.f32.mrf.mxu1  ;;  %v5517_v14 = vadd.f32 %v5516_v49, %v5504_v21 }
 0x577   : > { %v5530_v24 = vadd.f32 %v5529_v18, %v5517_v14 }
 0x57c   : > { %v5518_v19 = vpop.f32.mrf.mxu2 }
 0x57d   : > { %v5531_v20 = vpop.f32.mrf.mxu3 }
 0x58c   : > { %v5542_v25 = vpop.f32.mrf.mxu0 }
 0x58d   : > { %v5555_v11 = vpop.f32.mrf.mxu1  ;;  %v5543_v26 = vadd.f32 %v5542_v25, %v5530_v24 }
 0x58f   : > { %v5556_v61 = vadd.f32 %v5555_v11, %v5543_v26 }
 0x594   : > { %v5568_v7 = vpop.f32.mrf.mxu2  ;;  %v5544_v12 = vpop.f32.mrf.mxu0 }
 0x595   : > { %v5581_v35 = vpop.f32.mrf.mxu3  ;;  %v5569_v55 = vadd.f32 %v5568_v7, %v5556_v61  ;;  %v5557_v38 = vpop.f32.mrf.mxu1 }
 0x597   : > { %v5582_v39 = vadd.f32 %v5581_v35, %v5569_v55 }
 0x599   : > { %5585 = vst [vmem:[#allocation15] sm:$0xff] %v5582_v39 }
 0x59c   : > { %v5570_v41 = vpop.f32.mrf.mxu2 }
 0x59d   : > { %v5583_v43 = vpop.f32.mrf.mxu3 }
 0x59e PF: > { %p9005_p3 = scmp.eq.s32.totalorder %s9416_s8, 3  ;;  %s9351_s30 = smov [#allocation15]  }
 0x59f   : > { %s5592_s11 = sshll.u32 %s9351_s30, 4  ;;  %s5594_s17 = sshll.u32 %s10790_s7, 4  ;;  %s5593_s11 = int_to_ptr.vmem [resolvable:$true] %s5592_s11  ;;  %s5595_s17 = int_to_ptr.hbm [resolvable:$true] %s5594_s17 }
 0x5a0   : > { %8968 = dma.vmem_to_hbm [thread:$0]  (%p9005_p3), %s5593_s11, 128, %s5595_s17, [#allocation5]  }
 0x5a1   : > { %9323 = dma.done.wait (%p9005_p3), [#allocation5], 128  }
 0x5a2   : > { %9325 = vsyncadd (%p9005_p3), [#allocation5], 4294967168 }
 0x5a3 PF: > { %p21_p4 = scmp.ge.s32.totalorder %s9445_s22, 6   ;;  %s10807_s24 = smov %s9332_s25 }
 0x5a4   : > { %s10808_s25 = smov %s9336_s26  ;;  %s10809_s26 = smov %s9457_s29 }
 0x5a5   : > { %s10810_s27 = smov %s9445_s22  ;;  %23 = sbr.rel (!%p21_p4) target bundleno = 11 (0xb), region = 125 }
 0x5aa   :  { %5608 = vsyncpa [#allocation4], 1 }
 0x5ab   :  { %5610 = vsyncpa [#allocation4 + $0x1], 1 }
 0x5ac   :  { %5611 = vsyncpa [#allocation7], 1 }
 0x5ad   :  { %5612 = vsyncpa [#allocation10], 1 }
 0x5ae   :  { %5614 = vsyncpa [#allocation10 + $0x1], 1 }
 0x5af   :  { %5615 = vsyncpa [#allocation13], 1 }
 0x5b0   :  { %5616 = vsyncpa [#allocation5], 1 }
 0x5b1   :  { %5618 = vsyncpa [#allocation5 + $0x1], 1 }

</bundles_post_ra>
